<compile_context>
chip_gen: v6e
topology: v6e:2x2x1
jax: 0.10.0
libtpu: 0.0.40
codegen_flags: <defaults>
</compile_context>

<pallas_src>
import functools

import jax
import jax.numpy as jnp
from jax.experimental import pallas as pl
from jax.experimental.pallas import tpu as pltpu


# --------------------------------- kernel ------------------------------------

def _gwnet_kernel(x_ref, sw_ref, sb_ref, adpc_ref,
                  wfg_ref, bfg_ref, wpost_ref, bpost_ref, bns_ref, bnb_ref,
                  e1w_ref, e1b_ref, e2w_ref, e2b_ref,
                  out_ref, *, dilations, Tf):
    """Full GWNET forward for one batch block (bb elements)."""
    f32 = jnp.float32
    bb, T, N, cin = x_ref.shape
    cr = sw_ref.shape[1]
    cd = wfg_ref.shape[2] // 2
    cs = e1w_ref.shape[0]

    # ---- start_conv (1x1, K = padded in_dim) --------------------------------
    x = (jnp.dot(x_ref[...].reshape(bb * T * N, cin), sw_ref[...],
                 preferred_element_type=f32) + sb_ref[...])
    x = x.reshape(bb, T, N, cr)

    adpc = adpc_ref[...]                       # (N, 2N) = [adp^T | (adp@adp)^T]

    skip = None
    for l, d in enumerate(dilations):          # static unroll (dilations static)
        To = T - d
        m = bb * To
        M = m * N

        # dilated (1,2) gated temporal conv: taps concatenated along K,
        # filter|gate concatenated along the output dim -> ONE matmul.
        x1 = x[:, d:]                          # (bb, To, N, cr) == residual win
        xx = jnp.concatenate([x[:, :To], x1], axis=-1).reshape(M, 2 * cr)
        fg = jnp.dot(xx, wfg_ref[l], preferred_element_type=f32) + bfg_ref[l]
        xg = jnp.tanh(fg[:, :cd]) * jax.nn.sigmoid(fg[:, cd:])      # (M, cd)

        # fused post-gate matmul: [skip | gcn_x | gcn_Ax | gcn_A2x] weights.
        z = jnp.dot(xg, wpost_ref[l], preferred_element_type=f32) + bpost_ref[l]
        s = z[:, :cs]
        h0 = z[:, cs:cs + cr]
        y1 = z[:, cs + cr:cs + 2 * cr]
        y2 = z[:, cs + 2 * cr:]

        # skip accumulated only over the trailing Tf steps the head consumes.
        s_tail = s.reshape(bb, To, N, cs)[:, To - Tf:]
        skip = s_tail if skip is None else skip + s_tail

        # graph diffusion (order 2, adaptive support), both orders in a single
        # batched matmul:  g[bt, w, :] = sum_v [adpT|adp2T][w, v] * [y1;y2][bt, v, :]
        yc = jnp.concatenate([y1.reshape(m, N, cr), y2.reshape(m, N, cr)],
                             axis=1)                               # (m, 2N, cr)
        g = jax.lax.dot_general(
            jnp.broadcast_to(adpc, (m, N, 2 * N)), yc,
            (((2,), (1,)), ((0,), (0,))), preferred_element_type=f32)

        # gcn mlp sum + residual + eval-mode BatchNorm (folded scale/shift)
        h = h0 + g.reshape(M, cr) + x1.reshape(M, cr)
        h = h * bns_ref[l] + bnb_ref[l]
        x = h.reshape(bb, To, N, cr)
        T = To

    # ---- head: relu(skip) -> end_conv_1 -> relu -> end_conv_2 ---------------
    sk = jnp.maximum(skip.reshape(bb * Tf * N, cs), 0.0)
    h1 = jnp.maximum(jnp.dot(sk, e1w_ref[...], preferred_element_type=f32)
                     + e1b_ref[...], 0.0)
    y = jnp.dot(h1, e2w_ref[...], preferred_element_type=f32) + e2b_ref[...]
    out_ref[...] = y.reshape(bb, Tf, N, y.shape[-1])


# ------------------------------ pallas wrapper --------------------------------

_COMPILER_PARAMS = pltpu.CompilerParams(
    dimension_semantics=("parallel",),        # shard batch-block grid across TCs
    vmem_limit_bytes=32 * 1024 * 1024,        # valid budget on v5e/v6e/v7x
)


def _const_spec(a):
    """Batch-invariant full-array block (weights / adjacency / bn params)."""
    nd = a.ndim
    return pl.BlockSpec(a.shape, lambda i, _n=nd: (0,) * _n)


def _pick_batch_block(B, max_bb=8):
    for bb in range(min(B, max_bb), 0, -1):
        if B % bb == 0:
            return bb
    return 1


def gwnet_forward(params, x_in, *, dilations, batch_block=None):
    """x_in: (B, T, N, in_dim) — same convention as the PyTorch module input.

    Returns (B, out_dim, N, T_out) matching the PyTorch output layout.
    """
    B, T_in, N, cin = x_in.shape
    rf = 1 + sum(dilations)                    # receptive field (kernel_size=2)

    x = x_in.astype(jnp.float32)
    if T_in < rf:
        x = jnp.pad(x, ((0, 0), (rf - T_in, 0), (0, 0), (0, 0)))  # left-pad time
    T = x.shape[1]
    Tf = T - sum(dilations)                    # time window the head consumes

    # zero-pad the tiny in_dim contraction to 8 (exact: both sides padded w/ 0)
    start_w = params["start_w"]
    if cin < 8:
        x = jnp.pad(x, ((0, 0), (0, 0), (0, 0), (0, 8 - cin)))
        start_w = jnp.pad(start_w, ((0, 8 - cin), (0, 0)))

    # adaptive adjacency: softmax(relu(E1 @ E2), dim=1) — N x N, plain JAX
    # (a dedicated launch at this size would be pure overhead).
    adp = jax.nn.softmax(
        jnp.maximum(params["nodevec1"] @ params["nodevec2"], 0.0), axis=1)
    adpT = adp.T                               # einsum('ncvl,vw->ncwl') == A^T x
    adpc = jnp.concatenate([adpT, adpT @ adpT], axis=1)           # (N, 2N)

    # eval-mode BatchNorm folded to per-layer scale/shift
    bns = params["gamma"] * jax.lax.rsqrt(params["var"] + 1e-5)
    bnb = params["beta"] - params["mean"] * bns

    bb = batch_block or _pick_batch_block(B)
    grid = (B // bb,)
    co = params["end2_w"].shape[1]

    consts = [start_w, params["start_b"], adpc,
              params["wfg"], params["bfg"], params["wpost"], params["bpost"],
              bns, bnb,
              params["end1_w"], params["end1_b"],
              params["end2_w"], params["end2_b"]]

    out = pl.pallas_call(
        functools.partial(_gwnet_kernel, dilations=tuple(dilations), Tf=Tf),
        grid=grid,
        in_specs=[pl.BlockSpec((bb,) + x.shape[1:], lambda i: (i, 0, 0, 0))]
                 + [_const_spec(c) for c in consts],
        out_specs=pl.BlockSpec((bb, Tf, N, co), lambda i: (i, 0, 0, 0)),
        out_shape=jax.ShapeDtypeStruct((B, Tf, N, co), jnp.float32),
        compiler_params=_COMPILER_PARAMS,
    )(x, *consts)

    return jnp.transpose(out, (0, 3, 2, 1))    # (B, out_dim, N, Tf)


# ------------------------------ parameter init --------------------------------

def init_params(key, cfg):
    n = cfg["num_nodes"]
    cin, cr = cfg["in_dim"], cfg["residual_channels"]
    cd, cs = cfg["dilation_channels"], cfg["skip_channels"]
    ce, co = cfg["end_channels"], cfg["out_dim"]
    # TODO(synk): only kernel_size=2 (the module's default) is implemented.
    assert cfg["kernel_size"] == 2

    dilations = []
    for _ in range(cfg["blocks"]):
        d = 1
        for _ in range(cfg["layers"]):
            dilations.append(d)
            d *= 2
    L = len(dilations)

    keys = iter(jax.random.split(key, 16))

    def w(*shape, scale=0.1):
        return scale * jax.random.normal(next(keys), shape, jnp.float32)

    params = {
        "start_w": w(cin, cr), "start_b": w(1, cr),
        "nodevec1": jax.random.normal(next(keys), (n, 10), jnp.float32),
        "nodevec2": jax.random.normal(next(keys), (10, n), jnp.float32),
        # stacked per-layer weights (all layers share shapes):
        #   wfg  : [tap t ; tap t+d] -> [filter | gate]       (L, 2*cr, 2*cd)
        #   wpost: [skip | gcn_x | gcn_Ax | gcn_A2x]          (L, cd, cs+3*cr)
        "wfg": w(L, 2 * cr, 2 * cd), "bfg": w(L, 1, 2 * cd),
        "wpost": w(L, cd, cs + 3 * cr),
        "bpost": jnp.concatenate(
            [w(L, 1, cs), w(L, 1, cr), jnp.zeros((L, 1, 2 * cr), jnp.float32)],
            axis=-1),
        "gamma": 1.0 + w(L, 1, cr), "beta": w(L, 1, cr),
        "mean": jnp.zeros((L, 1, cr), jnp.float32),
        "var": jnp.ones((L, 1, cr), jnp.float32),
        "end1_w": w(cs, ce), "end1_b": w(1, ce),
        "end2_w": w(ce, co), "end2_b": w(1, co),
    }
    return params, dilations


# ------------------------------------ main -------------------------------------

if __name__ == "__main__":
    cfg = dict(
        num_nodes=8,
        in_dim=2,
        out_dim=12,
        residual_channels=32,
        dilation_channels=32,
        skip_channels=64,
        end_channels=128,
        kernel_size=2,
        blocks=2,
        layers=2,
    )
    key = jax.random.PRNGKey(0)
    kp, kx = jax.random.split(key)
    params, dilations = init_params(kp, cfg)

    B, T_in = 2, 6  # T_in < receptive_field (=7) exercises the left-pad path
    x = jax.random.normal(kx, (B, T_in, cfg["num_nodes"], cfg["in_dim"]),
                          jnp.float32)

    fwd = jax.jit(functools.partial(gwnet_forward, dilations=tuple(dilations)))
    out = jax.block_until_ready(fwd(params, x))

    assert out.shape == (B, cfg["out_dim"], cfg["num_nodes"], 1), out.shape
    assert bool(jnp.all(jnp.isfinite(out)))
    print("KERNEL_OK")
</pallas_src>

<mosaic_0001>
module attributes {stable_mosaic.version = 11 : i64} {
  func.func @_gwnet_kernel(%arg0: i32, %arg1: memref<2x7x8x8xf32, #tpu.memory_space<vmem>>, %arg2: memref<8x32xf32, #tpu.memory_space<vmem>>, %arg3: memref<1x32xf32, #tpu.memory_space<vmem>>, %arg4: memref<8x16xf32, #tpu.memory_space<vmem>>, %arg5: memref<4x64x64xf32, #tpu.memory_space<vmem>>, %arg6: memref<4x1x64xf32, #tpu.memory_space<vmem>>, %arg7: memref<4x32x160xf32, #tpu.memory_space<vmem>>, %arg8: memref<4x1x160xf32, #tpu.memory_space<vmem>>, %arg9: memref<4x1x32xf32, #tpu.memory_space<vmem>>, %arg10: memref<4x1x32xf32, #tpu.memory_space<vmem>>, %arg11: memref<64x128xf32, #tpu.memory_space<vmem>>, %arg12: memref<1x128xf32, #tpu.memory_space<vmem>>, %arg13: memref<128x12xf32, #tpu.memory_space<vmem>>, %arg14: memref<1x12xf32, #tpu.memory_space<vmem>>, %arg15: memref<2x1x8x12xf32, #tpu.memory_space<vmem>>) attributes {dimension_semantics = [#tpu.dimension_semantics<parallel>], iteration_bounds = array<i64: 1>, scalar_prefetch = 0 : i64, scratch_operands = 0 : i64, tpu.core_type = #tpu.core_type<tc>, window_params = [{transform_indices = @transform_0, window_bounds = array<i64: 2, 7, 8, 8>}, {pipeline_mode = #tpu.pipeline_mode<synchronous>, transform_indices = @transform_1, window_bounds = array<i64: 8, 32>}, {pipeline_mode = #tpu.pipeline_mode<synchronous>, transform_indices = @transform_2, window_bounds = array<i64: 1, 32>}, {pipeline_mode = #tpu.pipeline_mode<synchronous>, transform_indices = @transform_3, window_bounds = array<i64: 8, 16>}, {pipeline_mode = #tpu.pipeline_mode<synchronous>, transform_indices = @transform_4, window_bounds = array<i64: 4, 64, 64>}, {pipeline_mode = #tpu.pipeline_mode<synchronous>, transform_indices = @transform_5, window_bounds = array<i64: 4, 1, 64>}, {pipeline_mode = #tpu.pipeline_mode<synchronous>, transform_indices = @transform_6, window_bounds = array<i64: 4, 32, 160>}, {pipeline_mode = #tpu.pipeline_mode<synchronous>, transform_indices = @transform_7, window_bounds = array<i64: 4, 1, 160>}, {pipeline_mode = #tpu.pipeline_mode<synchronous>, transform_indices = @transform_8, window_bounds = array<i64: 4, 1, 32>}, {pipeline_mode = #tpu.pipeline_mode<synchronous>, transform_indices = @transform_9, window_bounds = array<i64: 4, 1, 32>}, {pipeline_mode = #tpu.pipeline_mode<synchronous>, transform_indices = @transform_10, window_bounds = array<i64: 64, 128>}, {pipeline_mode = #tpu.pipeline_mode<synchronous>, transform_indices = @transform_11, window_bounds = array<i64: 1, 128>}, {pipeline_mode = #tpu.pipeline_mode<synchronous>, transform_indices = @transform_12, window_bounds = array<i64: 128, 12>}, {pipeline_mode = #tpu.pipeline_mode<synchronous>, transform_indices = @transform_13, window_bounds = array<i64: 1, 12>}, {transform_indices = @transform_14, window_bounds = array<i64: 2, 1, 8, 12>}]} {
    %c0 = arith.constant 0 : index
    %c0_0 = arith.constant 0 : index
    %c0_1 = arith.constant 0 : index
    %c0_2 = arith.constant 0 : index
    %0 = vector.load %arg1[%c0, %c0_0, %c0_1, %c0_2] : memref<2x7x8x8xf32, #tpu.memory_space<vmem>>, vector<2x7x8x8xf32>
    %1 = vector.shape_cast %0 : vector<2x7x8x8xf32> to vector<112x8xf32>
    %c0_3 = arith.constant 0 : index
    %c0_4 = arith.constant 0 : index
    %2 = vector.load %arg2[%c0_3, %c0_4] : memref<8x32xf32, #tpu.memory_space<vmem>>, vector<8x32xf32>
    %cst = arith.constant dense<0.000000e+00> : vector<112x32xf32>
    %3 = tpu.matmul %1, %2, %cst {dimension_numbers = #tpu.dot_dimension_numbers<[1], [0], [0], [1], [0, 0, 1, 1], [], []>} : vector<112x8xf32>, vector<8x32xf32>, vector<112x32xf32> -> vector<112x32xf32>
    %c0_5 = arith.constant 0 : index
    %c0_6 = arith.constant 0 : index
    %4 = vector.load %arg3[%c0_5, %c0_6] : memref<1x32xf32, #tpu.memory_space<vmem>>, vector<1x32xf32>
    %5 = vector.broadcast %4 : vector<1x32xf32> to vector<112x32xf32>
    %6 = arith.addf %3, %5 : vector<112x32xf32>
    %7 = vector.shape_cast %6 : vector<112x32xf32> to vector<2x7x8x32xf32>
    %c0_7 = arith.constant 0 : index
    %c0_8 = arith.constant 0 : index
    %8 = vector.load %arg4[%c0_7, %c0_8] : memref<8x16xf32, #tpu.memory_space<vmem>>, vector<8x16xf32>
    %9 = vector.extract_strided_slice %7 {offsets = [0, 1, 0, 0], sizes = [2, 6, 8, 32], strides = [1, 1, 1, 1]} : vector<2x7x8x32xf32> to vector<2x6x8x32xf32>
    %10 = vector.extract_strided_slice %7 {offsets = [0, 0, 0, 0], sizes = [2, 6, 8, 32], strides = [1, 1, 1, 1]} : vector<2x7x8x32xf32> to vector<2x6x8x32xf32>
    %11 = tpu.concatenate %10, %9 in 3 : vector<2x6x8x32xf32>, vector<2x6x8x32xf32> -> vector<2x6x8x64xf32>
    %12 = vector.shape_cast %11 : vector<2x6x8x64xf32> to vector<96x64xf32>
    %c0_9 = arith.constant 0 : index
    %c0_10 = arith.constant 0 : index
    %c0_11 = arith.constant 0 : index
    %13 = vector.load %arg5[%c0_9, %c0_10, %c0_11] : memref<4x64x64xf32, #tpu.memory_space<vmem>>, vector<1x64x64xf32>
    %14 = vector.shape_cast %13 : vector<1x64x64xf32> to vector<64x64xf32>
    %cst_12 = arith.constant dense<0.000000e+00> : vector<96x64xf32>
    %15 = tpu.matmul %12, %14, %cst_12 {dimension_numbers = #tpu.dot_dimension_numbers<[1], [0], [0], [1], [0, 0, 1, 1], [], []>} : vector<96x64xf32>, vector<64x64xf32>, vector<96x64xf32> -> vector<96x64xf32>
    %c0_13 = arith.constant 0 : index
    %c0_14 = arith.constant 0 : index
    %c0_15 = arith.constant 0 : index
    %16 = vector.load %arg6[%c0_13, %c0_14, %c0_15] : memref<4x1x64xf32, #tpu.memory_space<vmem>>, vector<1x1x64xf32>
    %17 = vector.shape_cast %16 : vector<1x1x64xf32> to vector<1x64xf32>
    %18 = vector.broadcast %17 : vector<1x64xf32> to vector<96x64xf32>
    %19 = arith.addf %15, %18 : vector<96x64xf32>
    %20 = vector.extract_strided_slice %19 {offsets = [0, 0], sizes = [96, 32], strides = [1, 1]} : vector<96x64xf32> to vector<96x32xf32>
    %21 = math.tanh %20 : vector<96x32xf32>
    %22 = vector.extract_strided_slice %19 {offsets = [0, 32], sizes = [96, 32], strides = [1, 1]} : vector<96x64xf32> to vector<96x32xf32>
    %23 = arith.negf %22 : vector<96x32xf32>
    %24 = math.exp %23 : vector<96x32xf32>
    %cst_16 = arith.constant 1.000000e+00 : f32
    %25 = vector.broadcast %cst_16 : f32 to vector<96x32xf32>
    %26 = arith.addf %25, %24 : vector<96x32xf32>
    %27 = arith.divf %25, %26 : vector<96x32xf32>
    %28 = arith.mulf %21, %27 : vector<96x32xf32>
    %c0_17 = arith.constant 0 : index
    %c0_18 = arith.constant 0 : index
    %c0_19 = arith.constant 0 : index
    %29 = vector.load %arg7[%c0_17, %c0_18, %c0_19] : memref<4x32x160xf32, #tpu.memory_space<vmem>>, vector<1x32x160xf32>
    %30 = vector.shape_cast %29 : vector<1x32x160xf32> to vector<32x160xf32>
    %cst_20 = arith.constant dense<0.000000e+00> : vector<96x160xf32>
    %31 = tpu.matmul %28, %30, %cst_20 {dimension_numbers = #tpu.dot_dimension_numbers<[1], [0], [0], [1], [0, 0, 1, 1], [], []>} : vector<96x32xf32>, vector<32x160xf32>, vector<96x160xf32> -> vector<96x160xf32>
    %c0_21 = arith.constant 0 : index
    %c0_22 = arith.constant 0 : index
    %c0_23 = arith.constant 0 : index
    %32 = vector.load %arg8[%c0_21, %c0_22, %c0_23] : memref<4x1x160xf32, #tpu.memory_space<vmem>>, vector<1x1x160xf32>
    %33 = vector.shape_cast %32 : vector<1x1x160xf32> to vector<1x160xf32>
    %34 = vector.broadcast %33 : vector<1x160xf32> to vector<96x160xf32>
    %35 = arith.addf %31, %34 : vector<96x160xf32>
    %36 = vector.extract_strided_slice %35 {offsets = [0, 0], sizes = [96, 64], strides = [1, 1]} : vector<96x160xf32> to vector<96x64xf32>
    %37 = vector.extract_strided_slice %35 {offsets = [0, 64], sizes = [96, 32], strides = [1, 1]} : vector<96x160xf32> to vector<96x32xf32>
    %38 = vector.extract_strided_slice %35 {offsets = [0, 96], sizes = [96, 32], strides = [1, 1]} : vector<96x160xf32> to vector<96x32xf32>
    %39 = vector.extract_strided_slice %35 {offsets = [0, 128], sizes = [96, 32], strides = [1, 1]} : vector<96x160xf32> to vector<96x32xf32>
    %40 = vector.shape_cast %36 : vector<96x64xf32> to vector<2x6x8x64xf32>
    %41 = vector.extract_strided_slice %40 {offsets = [0, 5, 0, 0], sizes = [2, 1, 8, 64], strides = [1, 1, 1, 1]} : vector<2x6x8x64xf32> to vector<2x1x8x64xf32>
    %42 = vector.shape_cast %38 : vector<96x32xf32> to vector<12x8x32xf32>
    %43 = vector.shape_cast %39 : vector<96x32xf32> to vector<12x8x32xf32>
    %44 = tpu.concatenate %42, %43 in 1 : vector<12x8x32xf32>, vector<12x8x32xf32> -> vector<12x16x32xf32>
    %45 = vector.shape_cast %8 : vector<8x16xf32> to vector<1x8x16xf32>
    %46 = vector.broadcast %45 : vector<1x8x16xf32> to vector<12x8x16xf32>
    %cst_24 = arith.constant dense<0.000000e+00> : vector<12x8x32xf32>
    %47 = tpu.matmul %46, %44, %cst_24 {dimension_numbers = #tpu.dot_dimension_numbers<[2], [1], [1], [2], [0, 0, 0, 1, 1, 2], [0], [0]>} : vector<12x8x16xf32>, vector<12x16x32xf32>, vector<12x8x32xf32> -> vector<12x8x32xf32>
    %48 = vector.shape_cast %47 : vector<12x8x32xf32> to vector<96x32xf32>
    %49 = arith.addf %37, %48 : vector<96x32xf32>
    %50 = vector.shape_cast %9 : vector<2x6x8x32xf32> to vector<96x32xf32>
    %51 = arith.addf %49, %50 : vector<96x32xf32>
    %c0_25 = arith.constant 0 : index
    %c0_26 = arith.constant 0 : index
    %c0_27 = arith.constant 0 : index
    %52 = vector.load %arg9[%c0_25, %c0_26, %c0_27] : memref<4x1x32xf32, #tpu.memory_space<vmem>>, vector<1x1x32xf32>
    %53 = vector.shape_cast %52 : vector<1x1x32xf32> to vector<1x32xf32>
    %54 = vector.broadcast %53 : vector<1x32xf32> to vector<96x32xf32>
    %55 = arith.mulf %51, %54 : vector<96x32xf32>
    %c0_28 = arith.constant 0 : index
    %c0_29 = arith.constant 0 : index
    %c0_30 = arith.constant 0 : index
    %56 = vector.load %arg10[%c0_28, %c0_29, %c0_30] : memref<4x1x32xf32, #tpu.memory_space<vmem>>, vector<1x1x32xf32>
    %57 = vector.shape_cast %56 : vector<1x1x32xf32> to vector<1x32xf32>
    %58 = vector.broadcast %57 : vector<1x32xf32> to vector<96x32xf32>
    %59 = arith.addf %55, %58 : vector<96x32xf32>
    %60 = vector.shape_cast %59 : vector<96x32xf32> to vector<2x6x8x32xf32>
    %61 = vector.extract_strided_slice %60 {offsets = [0, 2, 0, 0], sizes = [2, 4, 8, 32], strides = [1, 1, 1, 1]} : vector<2x6x8x32xf32> to vector<2x4x8x32xf32>
    %62 = vector.extract_strided_slice %60 {offsets = [0, 0, 0, 0], sizes = [2, 4, 8, 32], strides = [1, 1, 1, 1]} : vector<2x6x8x32xf32> to vector<2x4x8x32xf32>
    %63 = tpu.concatenate %62, %61 in 3 : vector<2x4x8x32xf32>, vector<2x4x8x32xf32> -> vector<2x4x8x64xf32>
    %64 = vector.shape_cast %63 : vector<2x4x8x64xf32> to vector<64x64xf32>
    %c1 = arith.constant 1 : index
    %c0_31 = arith.constant 0 : index
    %c0_32 = arith.constant 0 : index
    %65 = vector.load %arg5[%c1, %c0_31, %c0_32] : memref<4x64x64xf32, #tpu.memory_space<vmem>>, vector<1x64x64xf32>
    %66 = vector.shape_cast %65 : vector<1x64x64xf32> to vector<64x64xf32>
    %cst_33 = arith.constant dense<0.000000e+00> : vector<64x64xf32>
    %67 = tpu.matmul %64, %66, %cst_33 {dimension_numbers = #tpu.dot_dimension_numbers<[1], [0], [0], [1], [0, 0, 1, 1], [], []>} : vector<64x64xf32>, vector<64x64xf32>, vector<64x64xf32> -> vector<64x64xf32>
    %c1_34 = arith.constant 1 : index
    %c0_35 = arith.constant 0 : index
    %c0_36 = arith.constant 0 : index
    %68 = vector.load %arg6[%c1_34, %c0_35, %c0_36] : memref<4x1x64xf32, #tpu.memory_space<vmem>>, vector<1x1x64xf32>
    %69 = vector.shape_cast %68 : vector<1x1x64xf32> to vector<1x64xf32>
    %70 = vector.broadcast %69 : vector<1x64xf32> to vector<64x64xf32>
    %71 = arith.addf %67, %70 : vector<64x64xf32>
    %72 = vector.extract_strided_slice %71 {offsets = [0, 0], sizes = [64, 32], strides = [1, 1]} : vector<64x64xf32> to vector<64x32xf32>
    %73 = math.tanh %72 : vector<64x32xf32>
    %74 = vector.extract_strided_slice %71 {offsets = [0, 32], sizes = [64, 32], strides = [1, 1]} : vector<64x64xf32> to vector<64x32xf32>
    %75 = arith.negf %74 : vector<64x32xf32>
    %76 = math.exp %75 : vector<64x32xf32>
    %cst_37 = arith.constant 1.000000e+00 : f32
    %77 = vector.broadcast %cst_37 : f32 to vector<64x32xf32>
    %78 = arith.addf %77, %76 : vector<64x32xf32>
    %79 = arith.divf %77, %78 : vector<64x32xf32>
    %80 = arith.mulf %73, %79 : vector<64x32xf32>
    %c1_38 = arith.constant 1 : index
    %c0_39 = arith.constant 0 : index
    %c0_40 = arith.constant 0 : index
    %81 = vector.load %arg7[%c1_38, %c0_39, %c0_40] : memref<4x32x160xf32, #tpu.memory_space<vmem>>, vector<1x32x160xf32>
    %82 = vector.shape_cast %81 : vector<1x32x160xf32> to vector<32x160xf32>
    %cst_41 = arith.constant dense<0.000000e+00> : vector<64x160xf32>
    %83 = tpu.matmul %80, %82, %cst_41 {dimension_numbers = #tpu.dot_dimension_numbers<[1], [0], [0], [1], [0, 0, 1, 1], [], []>} : vector<64x32xf32>, vector<32x160xf32>, vector<64x160xf32> -> vector<64x160xf32>
    %c1_42 = arith.constant 1 : index
    %c0_43 = arith.constant 0 : index
    %c0_44 = arith.constant 0 : index
    %84 = vector.load %arg8[%c1_42, %c0_43, %c0_44] : memref<4x1x160xf32, #tpu.memory_space<vmem>>, vector<1x1x160xf32>
    %85 = vector.shape_cast %84 : vector<1x1x160xf32> to vector<1x160xf32>
    %86 = vector.broadcast %85 : vector<1x160xf32> to vector<64x160xf32>
    %87 = arith.addf %83, %86 : vector<64x160xf32>
    %88 = vector.extract_strided_slice %87 {offsets = [0, 0], sizes = [64, 64], strides = [1, 1]} : vector<64x160xf32> to vector<64x64xf32>
    %89 = vector.extract_strided_slice %87 {offsets = [0, 64], sizes = [64, 32], strides = [1, 1]} : vector<64x160xf32> to vector<64x32xf32>
    %90 = vector.extract_strided_slice %87 {offsets = [0, 96], sizes = [64, 32], strides = [1, 1]} : vector<64x160xf32> to vector<64x32xf32>
    %91 = vector.extract_strided_slice %87 {offsets = [0, 128], sizes = [64, 32], strides = [1, 1]} : vector<64x160xf32> to vector<64x32xf32>
    %92 = vector.shape_cast %88 : vector<64x64xf32> to vector<2x4x8x64xf32>
    %93 = vector.extract_strided_slice %92 {offsets = [0, 3, 0, 0], sizes = [2, 1, 8, 64], strides = [1, 1, 1, 1]} : vector<2x4x8x64xf32> to vector<2x1x8x64xf32>
    %94 = arith.addf %41, %93 : vector<2x1x8x64xf32>
    %95 = vector.shape_cast %90 : vector<64x32xf32> to vector<8x8x32xf32>
    %96 = vector.shape_cast %91 : vector<64x32xf32> to vector<8x8x32xf32>
    %97 = tpu.concatenate %95, %96 in 1 : vector<8x8x32xf32>, vector<8x8x32xf32> -> vector<8x16x32xf32>
    %98 = vector.shape_cast %8 : vector<8x16xf32> to vector<1x8x16xf32>
    %99 = vector.broadcast %98 : vector<1x8x16xf32> to vector<8x8x16xf32>
    %cst_45 = arith.constant dense<0.000000e+00> : vector<8x8x32xf32>
    %100 = tpu.matmul %99, %97, %cst_45 {dimension_numbers = #tpu.dot_dimension_numbers<[2], [1], [1], [2], [0, 0, 0, 1, 1, 2], [0], [0]>} : vector<8x8x16xf32>, vector<8x16x32xf32>, vector<8x8x32xf32> -> vector<8x8x32xf32>
    %101 = vector.shape_cast %100 : vector<8x8x32xf32> to vector<64x32xf32>
    %102 = arith.addf %89, %101 : vector<64x32xf32>
    %103 = vector.shape_cast %61 : vector<2x4x8x32xf32> to vector<64x32xf32>
    %104 = arith.addf %102, %103 : vector<64x32xf32>
    %c1_46 = arith.constant 1 : index
    %c0_47 = arith.constant 0 : index
    %c0_48 = arith.constant 0 : index
    %105 = vector.load %arg9[%c1_46, %c0_47, %c0_48] : memref<4x1x32xf32, #tpu.memory_space<vmem>>, vector<1x1x32xf32>
    %106 = vector.shape_cast %105 : vector<1x1x32xf32> to vector<1x32xf32>
    %107 = vector.broadcast %106 : vector<1x32xf32> to vector<64x32xf32>
    %108 = arith.mulf %104, %107 : vector<64x32xf32>
    %c1_49 = arith.constant 1 : index
    %c0_50 = arith.constant 0 : index
    %c0_51 = arith.constant 0 : index
    %109 = vector.load %arg10[%c1_49, %c0_50, %c0_51] : memref<4x1x32xf32, #tpu.memory_space<vmem>>, vector<1x1x32xf32>
    %110 = vector.shape_cast %109 : vector<1x1x32xf32> to vector<1x32xf32>
    %111 = vector.broadcast %110 : vector<1x32xf32> to vector<64x32xf32>
    %112 = arith.addf %108, %111 : vector<64x32xf32>
    %113 = vector.shape_cast %112 : vector<64x32xf32> to vector<2x4x8x32xf32>
    %114 = vector.extract_strided_slice %113 {offsets = [0, 1, 0, 0], sizes = [2, 3, 8, 32], strides = [1, 1, 1, 1]} : vector<2x4x8x32xf32> to vector<2x3x8x32xf32>
    %115 = vector.extract_strided_slice %113 {offsets = [0, 0, 0, 0], sizes = [2, 3, 8, 32], strides = [1, 1, 1, 1]} : vector<2x4x8x32xf32> to vector<2x3x8x32xf32>
    %116 = tpu.concatenate %115, %114 in 3 : vector<2x3x8x32xf32>, vector<2x3x8x32xf32> -> vector<2x3x8x64xf32>
    %117 = vector.shape_cast %116 : vector<2x3x8x64xf32> to vector<48x64xf32>
    %c2 = arith.constant 2 : index
    %c0_52 = arith.constant 0 : index
    %c0_53 = arith.constant 0 : index
    %118 = vector.load %arg5[%c2, %c0_52, %c0_53] : memref<4x64x64xf32, #tpu.memory_space<vmem>>, vector<1x64x64xf32>
    %119 = vector.shape_cast %118 : vector<1x64x64xf32> to vector<64x64xf32>
    %cst_54 = arith.constant dense<0.000000e+00> : vector<48x64xf32>
    %120 = tpu.matmul %117, %119, %cst_54 {dimension_numbers = #tpu.dot_dimension_numbers<[1], [0], [0], [1], [0, 0, 1, 1], [], []>} : vector<48x64xf32>, vector<64x64xf32>, vector<48x64xf32> -> vector<48x64xf32>
    %c2_55 = arith.constant 2 : index
    %c0_56 = arith.constant 0 : index
    %c0_57 = arith.constant 0 : index
    %121 = vector.load %arg6[%c2_55, %c0_56, %c0_57] : memref<4x1x64xf32, #tpu.memory_space<vmem>>, vector<1x1x64xf32>
    %122 = vector.shape_cast %121 : vector<1x1x64xf32> to vector<1x64xf32>
    %123 = vector.broadcast %122 : vector<1x64xf32> to vector<48x64xf32>
    %124 = arith.addf %120, %123 : vector<48x64xf32>
    %125 = vector.extract_strided_slice %124 {offsets = [0, 0], sizes = [48, 32], strides = [1, 1]} : vector<48x64xf32> to vector<48x32xf32>
    %126 = math.tanh %125 : vector<48x32xf32>
    %127 = vector.extract_strided_slice %124 {offsets = [0, 32], sizes = [48, 32], strides = [1, 1]} : vector<48x64xf32> to vector<48x32xf32>
    %128 = arith.negf %127 : vector<48x32xf32>
    %129 = math.exp %128 : vector<48x32xf32>
    %cst_58 = arith.constant 1.000000e+00 : f32
    %130 = vector.broadcast %cst_58 : f32 to vector<48x32xf32>
    %131 = arith.addf %130, %129 : vector<48x32xf32>
    %132 = arith.divf %130, %131 : vector<48x32xf32>
    %133 = arith.mulf %126, %132 : vector<48x32xf32>
    %c2_59 = arith.constant 2 : index
    %c0_60 = arith.constant 0 : index
    %c0_61 = arith.constant 0 : index
    %134 = vector.load %arg7[%c2_59, %c0_60, %c0_61] : memref<4x32x160xf32, #tpu.memory_space<vmem>>, vector<1x32x160xf32>
    %135 = vector.shape_cast %134 : vector<1x32x160xf32> to vector<32x160xf32>
    %cst_62 = arith.constant dense<0.000000e+00> : vector<48x160xf32>
    %136 = tpu.matmul %133, %135, %cst_62 {dimension_numbers = #tpu.dot_dimension_numbers<[1], [0], [0], [1], [0, 0, 1, 1], [], []>} : vector<48x32xf32>, vector<32x160xf32>, vector<48x160xf32> -> vector<48x160xf32>
    %c2_63 = arith.constant 2 : index
    %c0_64 = arith.constant 0 : index
    %c0_65 = arith.constant 0 : index
    %137 = vector.load %arg8[%c2_63, %c0_64, %c0_65] : memref<4x1x160xf32, #tpu.memory_space<vmem>>, vector<1x1x160xf32>
    %138 = vector.shape_cast %137 : vector<1x1x160xf32> to vector<1x160xf32>
    %139 = vector.broadcast %138 : vector<1x160xf32> to vector<48x160xf32>
    %140 = arith.addf %136, %139 : vector<48x160xf32>
    %141 = vector.extract_strided_slice %140 {offsets = [0, 0], sizes = [48, 64], strides = [1, 1]} : vector<48x160xf32> to vector<48x64xf32>
    %142 = vector.extract_strided_slice %140 {offsets = [0, 64], sizes = [48, 32], strides = [1, 1]} : vector<48x160xf32> to vector<48x32xf32>
    %143 = vector.extract_strided_slice %140 {offsets = [0, 96], sizes = [48, 32], strides = [1, 1]} : vector<48x160xf32> to vector<48x32xf32>
    %144 = vector.extract_strided_slice %140 {offsets = [0, 128], sizes = [48, 32], strides = [1, 1]} : vector<48x160xf32> to vector<48x32xf32>
    %145 = vector.shape_cast %141 : vector<48x64xf32> to vector<2x3x8x64xf32>
    %146 = vector.extract_strided_slice %145 {offsets = [0, 2, 0, 0], sizes = [2, 1, 8, 64], strides = [1, 1, 1, 1]} : vector<2x3x8x64xf32> to vector<2x1x8x64xf32>
    %147 = arith.addf %94, %146 : vector<2x1x8x64xf32>
    %148 = vector.shape_cast %143 : vector<48x32xf32> to vector<6x8x32xf32>
    %149 = vector.shape_cast %144 : vector<48x32xf32> to vector<6x8x32xf32>
    %150 = tpu.concatenate %148, %149 in 1 : vector<6x8x32xf32>, vector<6x8x32xf32> -> vector<6x16x32xf32>
    %151 = vector.shape_cast %8 : vector<8x16xf32> to vector<1x8x16xf32>
    %152 = vector.broadcast %151 : vector<1x8x16xf32> to vector<6x8x16xf32>
    %cst_66 = arith.constant dense<0.000000e+00> : vector<6x8x32xf32>
    %153 = tpu.matmul %152, %150, %cst_66 {dimension_numbers = #tpu.dot_dimension_numbers<[2], [1], [1], [2], [0, 0, 0, 1, 1, 2], [0], [0]>} : vector<6x8x16xf32>, vector<6x16x32xf32>, vector<6x8x32xf32> -> vector<6x8x32xf32>
    %154 = vector.shape_cast %153 : vector<6x8x32xf32> to vector<48x32xf32>
    %155 = arith.addf %142, %154 : vector<48x32xf32>
    %156 = vector.shape_cast %114 : vector<2x3x8x32xf32> to vector<48x32xf32>
    %157 = arith.addf %155, %156 : vector<48x32xf32>
    %c2_67 = arith.constant 2 : index
    %c0_68 = arith.constant 0 : index
    %c0_69 = arith.constant 0 : index
    %158 = vector.load %arg9[%c2_67, %c0_68, %c0_69] : memref<4x1x32xf32, #tpu.memory_space<vmem>>, vector<1x1x32xf32>
    %159 = vector.shape_cast %158 : vector<1x1x32xf32> to vector<1x32xf32>
    %160 = vector.broadcast %159 : vector<1x32xf32> to vector<48x32xf32>
    %161 = arith.mulf %157, %160 : vector<48x32xf32>
    %c2_70 = arith.constant 2 : index
    %c0_71 = arith.constant 0 : index
    %c0_72 = arith.constant 0 : index
    %162 = vector.load %arg10[%c2_70, %c0_71, %c0_72] : memref<4x1x32xf32, #tpu.memory_space<vmem>>, vector<1x1x32xf32>
    %163 = vector.shape_cast %162 : vector<1x1x32xf32> to vector<1x32xf32>
    %164 = vector.broadcast %163 : vector<1x32xf32> to vector<48x32xf32>
    %165 = arith.addf %161, %164 : vector<48x32xf32>
    %166 = vector.shape_cast %165 : vector<48x32xf32> to vector<2x3x8x32xf32>
    %167 = vector.extract_strided_slice %166 {offsets = [0, 2, 0, 0], sizes = [2, 1, 8, 32], strides = [1, 1, 1, 1]} : vector<2x3x8x32xf32> to vector<2x1x8x32xf32>
    %168 = vector.extract_strided_slice %166 {offsets = [0, 0, 0, 0], sizes = [2, 1, 8, 32], strides = [1, 1, 1, 1]} : vector<2x3x8x32xf32> to vector<2x1x8x32xf32>
    %169 = tpu.concatenate %168, %167 in 3 : vector<2x1x8x32xf32>, vector<2x1x8x32xf32> -> vector<2x1x8x64xf32>
    %170 = vector.shape_cast %169 : vector<2x1x8x64xf32> to vector<16x64xf32>
    %c3 = arith.constant 3 : index
    %c0_73 = arith.constant 0 : index
    %c0_74 = arith.constant 0 : index
    %171 = vector.load %arg5[%c3, %c0_73, %c0_74] : memref<4x64x64xf32, #tpu.memory_space<vmem>>, vector<1x64x64xf32>
    %172 = vector.shape_cast %171 : vector<1x64x64xf32> to vector<64x64xf32>
    %cst_75 = arith.constant dense<0.000000e+00> : vector<16x64xf32>
    %173 = tpu.matmul %170, %172, %cst_75 {dimension_numbers = #tpu.dot_dimension_numbers<[1], [0], [0], [1], [0, 0, 1, 1], [], []>} : vector<16x64xf32>, vector<64x64xf32>, vector<16x64xf32> -> vector<16x64xf32>
    %c3_76 = arith.constant 3 : index
    %c0_77 = arith.constant 0 : index
    %c0_78 = arith.constant 0 : index
    %174 = vector.load %arg6[%c3_76, %c0_77, %c0_78] : memref<4x1x64xf32, #tpu.memory_space<vmem>>, vector<1x1x64xf32>
    %175 = vector.shape_cast %174 : vector<1x1x64xf32> to vector<1x64xf32>
    %176 = vector.broadcast %175 : vector<1x64xf32> to vector<16x64xf32>
    %177 = arith.addf %173, %176 : vector<16x64xf32>
    %178 = vector.extract_strided_slice %177 {offsets = [0, 0], sizes = [16, 32], strides = [1, 1]} : vector<16x64xf32> to vector<16x32xf32>
    %179 = math.tanh %178 : vector<16x32xf32>
    %180 = vector.extract_strided_slice %177 {offsets = [0, 32], sizes = [16, 32], strides = [1, 1]} : vector<16x64xf32> to vector<16x32xf32>
    %181 = arith.negf %180 : vector<16x32xf32>
    %182 = math.exp %181 : vector<16x32xf32>
    %cst_79 = arith.constant 1.000000e+00 : f32
    %183 = vector.broadcast %cst_79 : f32 to vector<16x32xf32>
    %184 = arith.addf %183, %182 : vector<16x32xf32>
    %185 = arith.divf %183, %184 : vector<16x32xf32>
    %186 = arith.mulf %179, %185 : vector<16x32xf32>
    %c3_80 = arith.constant 3 : index
    %c0_81 = arith.constant 0 : index
    %c0_82 = arith.constant 0 : index
    %187 = vector.load %arg7[%c3_80, %c0_81, %c0_82] : memref<4x32x160xf32, #tpu.memory_space<vmem>>, vector<1x32x160xf32>
    %188 = vector.shape_cast %187 : vector<1x32x160xf32> to vector<32x160xf32>
    %cst_83 = arith.constant dense<0.000000e+00> : vector<16x160xf32>
    %189 = tpu.matmul %186, %188, %cst_83 {dimension_numbers = #tpu.dot_dimension_numbers<[1], [0], [0], [1], [0, 0, 1, 1], [], []>} : vector<16x32xf32>, vector<32x160xf32>, vector<16x160xf32> -> vector<16x160xf32>
    %c3_84 = arith.constant 3 : index
    %c0_85 = arith.constant 0 : index
    %c0_86 = arith.constant 0 : index
    %190 = vector.load %arg8[%c3_84, %c0_85, %c0_86] : memref<4x1x160xf32, #tpu.memory_space<vmem>>, vector<1x1x160xf32>
    %191 = vector.shape_cast %190 : vector<1x1x160xf32> to vector<1x160xf32>
    %192 = vector.broadcast %191 : vector<1x160xf32> to vector<16x160xf32>
    %193 = arith.addf %189, %192 : vector<16x160xf32>
    %194 = vector.extract_strided_slice %193 {offsets = [0, 0], sizes = [16, 64], strides = [1, 1]} : vector<16x160xf32> to vector<16x64xf32>
    %195 = vector.shape_cast %194 : vector<16x64xf32> to vector<2x1x8x64xf32>
    %196 = arith.addf %147, %195 : vector<2x1x8x64xf32>
    %197 = vector.shape_cast %196 : vector<2x1x8x64xf32> to vector<16x64xf32>
    %cst_87 = arith.constant 0.000000e+00 : f32
    %198 = vector.broadcast %cst_87 : f32 to vector<16x64xf32>
    %199 = arith.maximumf %197, %198 : vector<16x64xf32>
    %c0_88 = arith.constant 0 : index
    %c0_89 = arith.constant 0 : index
    %200 = vector.load %arg11[%c0_88, %c0_89] : memref<64x128xf32, #tpu.memory_space<vmem>>, vector<64x128xf32>
    %cst_90 = arith.constant dense<0.000000e+00> : vector<16x128xf32>
    %201 = tpu.matmul %199, %200, %cst_90 {dimension_numbers = #tpu.dot_dimension_numbers<[1], [0], [0], [1], [0, 0, 1, 1], [], []>} : vector<16x64xf32>, vector<64x128xf32>, vector<16x128xf32> -> vector<16x128xf32>
    %c0_91 = arith.constant 0 : index
    %c0_92 = arith.constant 0 : index
    %202 = vector.load %arg12[%c0_91, %c0_92] : memref<1x128xf32, #tpu.memory_space<vmem>>, vector<1x128xf32>
    %203 = vector.broadcast %202 : vector<1x128xf32> to vector<16x128xf32>
    %204 = arith.addf %201, %203 : vector<16x128xf32>
    %cst_93 = arith.constant 0.000000e+00 : f32
    %205 = vector.broadcast %cst_93 : f32 to vector<16x128xf32>
    %206 = arith.maximumf %204, %205 : vector<16x128xf32>
    %c0_94 = arith.constant 0 : index
    %c0_95 = arith.constant 0 : index
    %207 = vector.load %arg13[%c0_94, %c0_95] : memref<128x12xf32, #tpu.memory_space<vmem>>, vector<128x12xf32>
    %cst_96 = arith.constant dense<0.000000e+00> : vector<16x12xf32>
    %208 = tpu.matmul %206, %207, %cst_96 {dimension_numbers = #tpu.dot_dimension_numbers<[1], [0], [0], [1], [0, 0, 1, 1], [], []>} : vector<16x128xf32>, vector<128x12xf32>, vector<16x12xf32> -> vector<16x12xf32>
    %c0_97 = arith.constant 0 : index
    %c0_98 = arith.constant 0 : index
    %209 = vector.load %arg14[%c0_97, %c0_98] : memref<1x12xf32, #tpu.memory_space<vmem>>, vector<1x12xf32>
    %210 = vector.broadcast %209 : vector<1x12xf32> to vector<16x12xf32>
    %211 = arith.addf %208, %210 : vector<16x12xf32>
    %212 = vector.shape_cast %211 : vector<16x12xf32> to vector<2x1x8x12xf32>
    %c0_99 = arith.constant 0 : index
    %c0_100 = arith.constant 0 : index
    %c0_101 = arith.constant 0 : index
    %c0_102 = arith.constant 0 : index
    %213 = vector.load %arg15[%c0_99, %c0_100, %c0_101, %c0_102] : memref<2x1x8x12xf32, #tpu.memory_space<vmem>>, vector<2x1x8x12xf32>
    tpu.vector_store %arg15[%c0_99, %c0_100, %c0_101, %c0_102], %212 {strides = array<i32>} : memref<2x1x8x12xf32, #tpu.memory_space<vmem>>, vector<2x1x8x12xf32>,
    return
  }
  func.func @transform_0(%arg0: i32) -> (i32, i32, i32, i32) {
    %c0_i32 = arith.constant 0 : i32
    %c0_i32_0 = arith.constant 0 : i32
    %c0_i32_1 = arith.constant 0 : i32
    %c0_i32_2 = arith.constant 0 : i32
    return %arg0, %c0_i32, %c0_i32_0, %c0_i32_1 : i32, i32, i32, i32
  }
  func.func @transform_1(%arg0: i32) -> (i32, i32) {
    %c0_i32 = arith.constant 0 : i32
    %c0_i32_0 = arith.constant 0 : i32
    %c0_i32_1 = arith.constant 0 : i32
    return %c0_i32, %c0_i32_0 : i32, i32
  }
  func.func @transform_2(%arg0: i32) -> (i32, i32) {
    %c0_i32 = arith.constant 0 : i32
    %c0_i32_0 = arith.constant 0 : i32
    %c0_i32_1 = arith.constant 0 : i32
    return %c0_i32, %c0_i32_0 : i32, i32
  }
  func.func @transform_3(%arg0: i32) -> (i32, i32) {
    %c0_i32 = arith.constant 0 : i32
    %c0_i32_0 = arith.constant 0 : i32
    %c0_i32_1 = arith.constant 0 : i32
    return %c0_i32, %c0_i32_0 : i32, i32
  }
  func.func @transform_4(%arg0: i32) -> (i32, i32, i32) {
    %c0_i32 = arith.constant 0 : i32
    %c0_i32_0 = arith.constant 0 : i32
    %c0_i32_1 = arith.constant 0 : i32
    %c0_i32_2 = arith.constant 0 : i32
    return %c0_i32, %c0_i32_0, %c0_i32_1 : i32, i32, i32
  }
  func.func @transform_5(%arg0: i32) -> (i32, i32, i32) {
    %c0_i32 = arith.constant 0 : i32
    %c0_i32_0 = arith.constant 0 : i32
    %c0_i32_1 = arith.constant 0 : i32
    %c0_i32_2 = arith.constant 0 : i32
    return %c0_i32, %c0_i32_0, %c0_i32_1 : i32, i32, i32
  }
  func.func @transform_6(%arg0: i32) -> (i32, i32, i32) {
    %c0_i32 = arith.constant 0 : i32
    %c0_i32_0 = arith.constant 0 : i32
    %c0_i32_1 = arith.constant 0 : i32
    %c0_i32_2 = arith.constant 0 : i32
    return %c0_i32, %c0_i32_0, %c0_i32_1 : i32, i32, i32
  }
  func.func @transform_7(%arg0: i32) -> (i32, i32, i32) {
    %c0_i32 = arith.constant 0 : i32
    %c0_i32_0 = arith.constant 0 : i32
    %c0_i32_1 = arith.constant 0 : i32
    %c0_i32_2 = arith.constant 0 : i32
    return %c0_i32, %c0_i32_0, %c0_i32_1 : i32, i32, i32
  }
  func.func @transform_8(%arg0: i32) -> (i32, i32, i32) {
    %c0_i32 = arith.constant 0 : i32
    %c0_i32_0 = arith.constant 0 : i32
    %c0_i32_1 = arith.constant 0 : i32
    %c0_i32_2 = arith.constant 0 : i32
    return %c0_i32, %c0_i32_0, %c0_i32_1 : i32, i32, i32
  }
  func.func @transform_9(%arg0: i32) -> (i32, i32, i32) {
    %c0_i32 = arith.constant 0 : i32
    %c0_i32_0 = arith.constant 0 : i32
    %c0_i32_1 = arith.constant 0 : i32
    %c0_i32_2 = arith.constant 0 : i32
    return %c0_i32, %c0_i32_0, %c0_i32_1 : i32, i32, i32
  }
  func.func @transform_10(%arg0: i32) -> (i32, i32) {
    %c0_i32 = arith.constant 0 : i32
    %c0_i32_0 = arith.constant 0 : i32
    %c0_i32_1 = arith.constant 0 : i32
    return %c0_i32, %c0_i32_0 : i32, i32
  }
  func.func @transform_11(%arg0: i32) -> (i32, i32) {
    %c0_i32 = arith.constant 0 : i32
    %c0_i32_0 = arith.constant 0 : i32
    %c0_i32_1 = arith.constant 0 : i32
    return %c0_i32, %c0_i32_0 : i32, i32
  }
  func.func @transform_12(%arg0: i32) -> (i32, i32) {
    %c0_i32 = arith.constant 0 : i32
    %c0_i32_0 = arith.constant 0 : i32
    %c0_i32_1 = arith.constant 0 : i32
    return %c0_i32, %c0_i32_0 : i32, i32
  }
  func.func @transform_13(%arg0: i32) -> (i32, i32) {
    %c0_i32 = arith.constant 0 : i32
    %c0_i32_0 = arith.constant 0 : i32
    %c0_i32_1 = arith.constant 0 : i32
    return %c0_i32, %c0_i32_0 : i32, i32
  }
  func.func @transform_14(%arg0: i32) -> (i32, i32, i32, i32) {
    %c0_i32 = arith.constant 0 : i32
    %c0_i32_0 = arith.constant 0 : i32
    %c0_i32_1 = arith.constant 0 : i32
    %c0_i32_2 = arith.constant 0 : i32
    return %arg0, %c0_i32, %c0_i32_0, %c0_i32_1 : i32, i32, i32, i32
  }
}

</mosaic_0001>

<bundles_post_ra>
// kernel: gwnet_forward.1
= control target key start
LH: loop header
LB: loop body
LE: loop exit
PB: predicated region body
PF: predicated region fallthrough
CT: control target
= control target key end

     0   :  { %19 = vsyncpa [#allocation3], 0  ;;  %s6691_s0 = inlined_call_operand.vmem [shape: f32[2,7,8,8], index: 0, kind: input, shape index: {}]   ;;  %s6692_s1 = inlined_call_operand.vmem [shape: f32[8,32], index: 1, kind: input, shape index: {}]   ;;  %s6693_s2 = inlined_call_operand.hbm [shape: f32[1,32], index: 2, kind: input, shape index: {}]   ;;  %s6694_s3 = inlined_call_operand.vmem [shape: f32[8,16], index: 3, kind: input, shape index: {}]   ;;  %s6695_s4 = inlined_call_operand.vmem [shape: f32[4,64,64], index: 4, kind: input, shape index: {}]   ;;  %s6696_s5 = inlined_call_operand.hbm [shape: f32[4,1,64], index: 5, kind: input, shape index: {}]   ;;  %s6697_s6 = inlined_call_operand.vmem [shape: f32[4,32,160], index: 6, kind: input, shape index: {}]   ;;  %s6698_s7 = inlined_call_operand.hbm [shape: f32[4,1,160], index: 7, kind: input, shape index: {}]   ;;  %s6699_s8 = inlined_call_operand.vmem [shape: f32[4,1,32], index: 8, kind: input, shape index: {}]   ;;  %s6700_s9 = inlined_call_operand.vmem [shape: f32[4,1,32], index: 9, kind: input, shape index: {}]   ;;  %s6701_s10 = inlined_call_operand.vmem [shape: f32[64,128], index: 10, kind: input, shape index: {}]   ;;  %s6702_s11 = inlined_call_operand.hbm [shape: f32[1,128], index: 11, kind: input, shape index: {}]   ;;  %s6703_s12 = inlined_call_operand.vmem [shape: f32[128,12], index: 12, kind: input, shape index: {}]   ;;  %s6704_s13 = inlined_call_operand.hbm [shape: f32[1,12], index: 13, kind: input, shape index: {}]   ;;  %s6705_s14 = inlined_call_operand.hbm [shape: f32[2,1,8,12], index: 14, kind: output, shape index: {}]  }
   0x1   :  { %20 = vsyncpa [#allocation6], 0 }
   0x2   :  { %21 = vsyncpa [#allocation9], 0 }
   0x3   :  { %22 = vsyncpa [#allocation4], 0  ;;  %s5446_s29 = smov [#allocation5]  }
   0x4   :  { %s46_s30 = sshll.u32 %s5446_s29, 4  ;;  %s47_s30 = int_to_ptr.vmem [resolvable:$true] %s46_s30 }
   0x5   :  { %s5326_s15 = scalar_lea.vmem %s47_s30, 64  ;;  %p5331_p1 = scmp.lt.s32.totalorder %s47_s30, %s47_s30 }
   0x6   :  { %p5327_p0 = scmp.ne.s32.totalorder %s47_s30, %s5326_s15  ;;  %p5332_p2 = scmp.lt.s32.totalorder %s5326_s15, %s5326_s15 }
   0x8   :  { %p5333_p3 = por %p5332_p2, %p5331_p1 }
   0xa   :  { %p5334_p4 = pnand %p5333_p3, %p5327_p0 }
   0xc   :  { %5337 = shalt.err (!%p5334_p4)
}
   0xd   :  { %s5447_s16 = smov 16   ;;  %s5448_s17 = smov 1  }
   0xe   :  { %52 = dma.hbm_to_vmem [thread:$0]  %s6696_s5, 64, %s47_s30, [#allocation6], %s5447_s16, %s5447_s16, %s5448_s17  }
   0xf   :  { %s5449_s20 = smov [#allocation8]   ;;  %s5450_s22 = smov [#allocation2]  }
  0x10   :  { %s79_s21 = sshll.u32 %s5449_s20, 4  ;;  %s33_s23 = sshll.u32 %s5450_s22, 4  ;;  %s80_s21 = int_to_ptr.vmem [resolvable:$true] %s79_s21  ;;  %s34_s23 = int_to_ptr.vmem [resolvable:$true] %s33_s23 }
  0x11   :  { %s5346_s24 = scalar_lea.vmem %s80_s21, 16  ;;  %s5350_s25 = scalar_lea.vmem %s80_s21, 32 }
  0x12   :  { %p5347_p5 = scmp.ne.s32.totalorder %s80_s21, %s5346_s24  ;;  %p5351_p6 = scmp.lt.s32.totalorder %s80_s21, %s80_s21 }
  0x13   :  { %p5352_p7 = scmp.lt.s32.totalorder %s5350_s25, %s5346_s24 }
  0x15   :  { %p5353_p8 = por %p5352_p7, %p5351_p6 }
  0x17   :  { %p5354_p9 = pnand %p5353_p8, %p5347_p5 }
  0x19   :  { %5357 = shalt.err (!%p5354_p9)
}
  0x1a   :  { %82 = dma.hbm_to_vmem [thread:$0]  %s6702_s11, 16, %s80_s21, [#allocation9]  }
  0x1b   :  { %s5366_s28 = scalar_lea.vmem %s34_s23, 16  ;;  %s5370_s5 = scalar_lea.vmem %s34_s23, 32 }
  0x1c   :  { %p5367_p10 = scmp.ne.s32.totalorder %s34_s23, %s5366_s28  ;;  %p5371_p11 = scmp.lt.s32.totalorder %s34_s23, %s34_s23 }
  0x1d   :  { %p5372_p12 = scmp.lt.s32.totalorder %s5370_s5, %s5366_s28 }
  0x1f   :  { %p5373_p13 = por %p5372_p12, %p5371_p11 }
  0x21   :  { %p5374_p0 = pnand %p5373_p13, %p5367_p10 }
  0x23   :  { %5377 = shalt.err (!%p5374_p0)
}
  0x24   :  { %36 = dma.hbm_to_vmem [thread:$0]  %s6693_s2, 16, %s34_s23, [#allocation3]  }
  0x25   :  { %s5451_s15 = smov [#allocation7]  }
  0x26   :  { %s60_s16 = sshll.u32 %s5451_s15, 4  ;;  %s61_s16 = int_to_ptr.vmem [resolvable:$true] %s60_s16 }
  0x27   :  { %s5386_s17 = scalar_lea.vmem %s61_s16, 128  ;;  %p5391_p2 = scmp.lt.s32.totalorder %s61_s16, %s61_s16 }
  0x28   :  { %p5387_p1 = scmp.ne.s32.totalorder %s61_s16, %s5386_s17  ;;  %p5392_p3 = scmp.lt.s32.totalorder %s5386_s17, %s5386_s17 }
  0x2a   :  { %p5393_p4 = por %p5392_p3, %p5391_p2 }
  0x2c   :  { %p5394_p5 = pnand %p5393_p4, %p5387_p1 }
  0x2e   :  { %5397 = shalt.err (!%p5394_p5)
}
  0x2f   :  { %s5452_s11 = smov 32   ;;  %s5453_s18 = smov 2  }
  0x30   :  { %66 = dma.hbm_to_vmem [thread:$0]  %s6698_s7, 128, %s61_s16, [#allocation6], %s5452_s11, %s5452_s11, %s5453_s18  }
  0x31   :  { %s5454_s21 = smov [#allocation10]  }
  0x32   :  { %s91_s2 = sshll.u32 %s5454_s21, 4  ;;  %s92_s2 = int_to_ptr.vmem [resolvable:$true] %s91_s2 }
  0x33   :  { %s5406_s22 = scalar_lea.vmem %s92_s2, 16  ;;  %s5410_s23 = scalar_lea.vmem %s92_s2, 32 }
  0x34   :  { %p5407_p6 = scmp.ne.s32.totalorder %s92_s2, %s5406_s22  ;;  %p5411_p7 = scmp.lt.s32.totalorder %s92_s2, %s92_s2 }
  0x35   :  { %p5412_p8 = scmp.lt.s32.totalorder %s5410_s23, %s5406_s22 }
  0x37   :  { %p5413_p9 = por %p5412_p8, %p5411_p7 }
  0x39   :  { %p5414_p10 = pnand %p5413_p9, %p5407_p6 }
  0x3b   :  { %5417 = shalt.err (!%p5414_p10)
}
  0x3c   :  { %94 = dma.hbm_to_vmem [thread:$0]  %s6704_s13, 16, %s92_s2, [#allocation9]  }
  0x3d   :  { %5438 = dma.done.wait [#allocation3], 16  }
  0x3e   :  { %5439 = vsyncadd [#allocation3], 4294967280 }
  0x3f   :  { %5440 = dma.done.wait [#allocation6], 192  }
  0x40   :  { %5441 = vsyncadd [#allocation6], 4294967104 }
  0x41   :  { %5442 = dma.done.wait [#allocation9], 32  }
  0x42   :  { %5443 = vsyncadd [#allocation9], 4294967264  ;;  %vm132_vm0 = vcmask 64512   ;;  %v124_v0 = vld [vmem:[%s6692_s1] sm:$0xff]  ;;  %v111_v2 = vld [vmem:[%s6691_s0 + $0x8] sm:$0xff]  ;;  %vm359_vm1 = vcmask 261120  }
  0x43   :  { %v110_v1 = vld [vmem:[%s6691_s0] sm:$0xff]  ;;  %4782 = vmatprep.subr.mxu0 %v124_v0  ;;  %v112_v3 = vld [vmem:[%s6691_s0 + $0x10] sm:$0xff]  ;;  %v113_v4 = vld [vmem:[%s6691_s0 + $0x18] sm:$0xff]  ;;  %vm387_vm2 = vcmask 523264   ;;  %s5456_s23 = smov 96   ;;  %vm5457_vm3 = vmmov 0  }
  0x44   :  { %4784 = vmatprep.mubr.msk.f32.mxu0 %vm132_vm0, %v110_v1  ;;  %4783 = vmatpush3.msra.mxu0 %v124_v0  ;;  %v114_v5 = vld [vmem:[%s6691_s0 + $0x20] sm:$0xff]  ;;  %v115_v6 = vld [vmem:[%s6691_s0 + $0x28] sm:$0xff]  ;;  %v116_v7 = vld [vmem:[%s6691_s0 + $0x30] sm:$0xff]  ;;  %s5458_s24 = smov 64   ;;  %vm929_vm4 = vcmask 130048   ;;  %vm4396_vm5 = vcmask 97280  }
  0x45   :  { %4785 = vmatmul.mubr.msk.f32.vlgmr.msra.gmra.mxu0 %vm132_vm0, %v111_v2  ;;  %v117_v8 = vld [vmem:[%s6691_s0 + $0x38] sm:$0xff]  ;;  %v118_v9 = vld [vmem:[%s6691_s0 + $0x40] sm:$0xff]  ;;  %v119_v10 = vld [vmem:[%s6691_s0 + $0x48] sm:$0xff]  ;;  %s5459_s19 = smov [#allocation11]  }
  0x46   :  { %4787 = vmatprep.mubr.msk.f32.mxu0 %vm132_vm0, %v112_v3  ;;  %v120_v11 = vld [vmem:[%s6691_s0 + $0x50] sm:$0xff]  ;;  %v121_v12 = vld [vmem:[%s6691_s0 + $0x58] sm:$0xff]  ;;  %v122_v13 = vld [vmem:[%s6691_s0 + $0x60] sm:$0xff]  ;;  %s4404_s20 = sshll.u32 %s5459_s19, 4  ;;  %s4405_s20 = int_to_ptr.vmem [resolvable:$true] %s4404_s20 }
  0x47   :  { %v123_v14 = vld [vmem:[%s6691_s0 + $0x68] sm:$0xff]  ;;  %v379_v15 = vld [vmem:[%s6695_s4 + $0x38] sm:$0xff]  ;;  %v378_v16 = vld [vmem:[%s6695_s4 + $0x30] sm:$0xff]  ;;  %p5423_p12 = scmp.lt.s32.totalorder %s4405_s20, %s4405_s20 }
  0x48   :  { %4805 = vmatprep.subr.mxu1 %v379_v15  ;;  %v377_v17 = vld [vmem:[%s6695_s4 + $0x28] sm:$0xff]  ;;  %v376_v18 = vld [vmem:[%s6695_s4 + $0x20] sm:$0xff]  ;;  %v375_v19 = vld [vmem:[%s6695_s4 + $0x18] sm:$0xff] }
  0x49   :  { %4788 = vmatmul.mubr.msk.f32.gmra.mxu0 %vm132_vm0, %v113_v4  ;;  %4806 = vmatpush3.msra.mxu1 %v379_v15  ;;  %v374_v20 = vld [vmem:[%s6695_s4 + $0x10] sm:$0xff]  ;;  %v373_v21 = vld [vmem:[%s6695_s4 + $0x8] sm:$0xff]  ;;  %v372_v22 = vld [vmem:[%s6695_s4] sm:$0xff] }
  0x4a   :  { %4790 = vmatprep.mubr.msk.f32.mxu0 %vm132_vm0, %v114_v5  ;;  %4807 = vmatprep.subr.mxu1 %v378_v16  ;;  %v4418_v23 = vld [vmem:[#allocation2] ss:$0 sm:$0xff] }
  0x4b   :  { %4808 = vmatpush3.msra.mxu1 %v378_v16  ;;  %v697_v15 = vld [vmem:[%s6697_s6 + $0x20] sm:$0xff] }
  0x4c   :  { %4809 = vmatprep.subr.mxu1 %v377_v17  ;;  %v5731_v16 = vld [vmem:[#allocation5] ss:$0 sm:$0xff] }
  0x4d   :  { %4791 = vmatmul.mubr.msk.f32.gmra.mxu0 %vm132_vm0, %v115_v6  ;;  %4810 = vmatpush3.msra.mxu1 %v377_v17 }
  0x4e   :  { %4793 = vmatprep.mubr.msk.f32.mxu0 %vm132_vm0, %v116_v7  ;;  %4811 = vmatprep.subr.mxu1 %v376_v18 }
  0x4f   :  { %4812 = vmatpush3.msra.mxu1 %v376_v18 }
  0x50   :  { %4813 = vmatprep.subr.mxu1 %v375_v19 }
  0x51   :  { %4794 = vmatmul.mubr.msk.f32.gmra.mxu0 %vm132_vm0, %v117_v8  ;;  %4814 = vmatpush3.msra.mxu1 %v375_v19 }
  0x52   :  { %4796 = vmatprep.mubr.msk.f32.mxu0 %vm132_vm0, %v118_v9  ;;  %4815 = vmatprep.subr.mxu1 %v374_v20 }
  0x53   :  { %4816 = vmatpush3.msra.mxu1 %v374_v20 }
  0x54   :  { %4817 = vmatprep.subr.mxu1 %v373_v21 }
  0x55   :  { %4797 = vmatmul.mubr.msk.f32.gmra.mxu0 %vm132_vm0, %v119_v10  ;;  %4818 = vmatpush3.msra.mxu1 %v373_v21 }
  0x56   :  { %4799 = vmatprep.mubr.msk.f32.mxu0 %vm132_vm0, %v120_v11  ;;  %4819 = vmatprep.subr.mxu1 %v372_v22 }
  0x57   :  { %4820 = vmatpush3.msra.mxu1 %v372_v22 }
  0x59   :  { %4800 = vmatmul.mubr.msk.f32.gmra.mxu0 %vm132_vm0, %v121_v12  ;;  %v700_v12 = vld [vmem:[%s6697_s6 + $0x38] sm:$0xff] }
  0x5a   :  { %4802 = vmatprep.mubr.msk.f32.mxu0 %vm132_vm0, %v122_v13  ;;  %v699_v13 = vld [vmem:[%s6697_s6 + $0x30] sm:$0xff]  ;;  %773 = vmatprep.subr.mxu0 %v700_v12 }
  0x5b   :  { %774 = vmatpush1.msra.mxu0 %v699_v13 }
  0x5d   :  { %4803 = vmatmul.mubr.msk.f32.gmra.mxu0 %vm132_vm0, %v123_v14  ;;  %v698_v14 = vld [vmem:[%s6697_s6 + $0x28] sm:$0xff] }
  0x5e   :  { %775 = vmatprep.subr.mxu0 %v698_v14 }
  0x5f   :  { %776 = vmatpush1.msra.mxu0 %v697_v15 }
 0x105   :  { %v4786_v24 = vpop.f32.mrf.mxu0 }
 0x106   :  { %v5637_v25 = vadd.f32 %v4786_v24, %v4418_v23 }
 0x107   :  { %v241_v26 = vpop.f32.mrf.mxu0 }
 0x108   :  { %v242_v27 = vadd.f32 %v4418_v23, %v241_v26  ;;  %323 = vrot.lane.b32.xlu0 %v5637_v25, %s5452_s11 }
 0x109   :  { %v4789_v28 = vpop.f32.mrf.mxu0 }
 0x10a   :  { %v5641_v29 = vadd.f32 %v4789_v28, %v4418_v23 }
 0x10b   :  { %v251_v30 = vpop.f32.mrf.mxu0 }
 0x10c   :  { %v5643_v31 = vadd.f32 %v4418_v23, %v251_v30  ;;  %327 = vrot.lane.b32.xlu1 %v5641_v29, %s5452_s11 }
 0x10d   :  { %v4792_v32 = vpop.f32.mrf.mxu0 }
 0x10e   :  { %v5647_v33 = vadd.f32 %v4792_v32, %v4418_v23  ;;  %325 = vrot.lane.b32.xlu0 %v5643_v31, %s5452_s11 }
 0x10f   :  { %v261_v34 = vpop.f32.mrf.mxu0 }
 0x110   :  { %v5651_v35 = vadd.f32 %v4418_v23, %v261_v34 }
 0x111   :  { %v4795_v36 = vpop.f32.mrf.mxu0 }
 0x112   :  { %v277_v37 = vadd.f32 %v4795_v36, %v4418_v23  ;;  %329 = vrot.lane.b32.xlu1 %v5651_v35, %s5452_s11  ;;  %331 = vrot.lane.b32.xlu0 %v5647_v33, %s5452_s11 }
 0x113   :  { %v271_v38 = vpop.f32.mrf.mxu0 }
 0x114   :  { %v5657_v39 = vadd.f32 %v4418_v23, %v271_v38 }
 0x115   :  { %v4798_v40 = vpop.f32.mrf.mxu0 }
 0x116   :  { %v5659_v41 = vadd.f32 %v4798_v40, %v4418_v23  ;;  %333 = vrot.lane.b32.xlu1 %v5657_v39, %s5452_s11 }
 0x117   :  { %v281_v42 = vpop.f32.mrf.mxu0 }
 0x118   :  { %v5663_v43 = vadd.f32 %v4418_v23, %v281_v42 }
 0x119   :  { %v4801_v44 = vpop.f32.mrf.mxu0 }
 0x11a   :  { %v5665_v45 = vadd.f32 %v4801_v44, %v4418_v23  ;;  %337 = vrot.lane.b32.xlu1 %v5659_v41, %s5452_s11  ;;  %335 = vrot.lane.b32.xlu0 %v5663_v43, %s5452_s11 }
 0x11b   :  { %v291_v46 = vpop.f32.mrf.mxu0 }
 0x11c   :  { %v5671_v47 = vadd.f32 %v4418_v23, %v291_v46 }
 0x11d   :  { %v4804_v48 = vpop.f32.mrf.mxu0 }
 0x11e   :  { %v5673_v49 = vadd.f32 %v4804_v48, %v4418_v23  ;;  %341 = vrot.lane.b32.xlu1 %v5665_v45, %s5452_s11  ;;  %339 = vrot.lane.b32.xlu0 %v5671_v47, %s5452_s11 }
 0x11f   :  { %v301_v50 = vpop.f32.mrf.mxu0 }
 0x120   :  { %v5679_v51 = vadd.f32 %v4418_v23, %v301_v50 }
 0x122   :  { %345 = vrot.lane.b32.xlu1 %v5673_v49, %s5452_s11  ;;  %343 = vrot.lane.b32.xlu0 %v5679_v51, %s5452_s11 }
 0x17a   :  { %v324_v52 = vpop.permute.xlu0 %323 }
 0x17b   :  { %v360_v53 = vsel %vm359_vm1, %v242_v27, %v324_v52 }
 0x17c   :  { %4821 = vmatprep.mubr.msk.f32.mxu1 %vm387_vm2, %v360_v53 }
 0x17e   :  { %v328_v54 = vpop.permute.xlu1 %327 }
 0x17f   :  { %v362_v57 = vsel %vm359_vm1, %v5643_v31, %v328_v54 }
 0x180   :  { %v326_v55 = vpop.permute.xlu0 %325 }
 0x181   :  { %v361_v56 = vsel %vm359_vm1, %v5637_v25, %v326_v55 }
 0x182   :  { %4822 = vmatmul.mubr.msk.f32.vlgmr.msra.gmra.mxu1 %vm387_vm2, %v361_v56 }
 0x183   :  { %4824 = vmatprep.mubr.msk.f32.mxu1 %vm387_vm2, %v362_v57 }
 0x184   :  { %v330_v58 = vpop.permute.xlu1 %329  ;;  %v332_v59 = vpop.permute.xlu0 %331 }
 0x185   :  { %v363_v60 = vsel %vm359_vm1, %v5641_v29, %v330_v58  ;;  %v364_v61 = vsel %vm359_vm1, %v5651_v35, %v332_v59 }
 0x186   :  { %4825 = vmatmul.mubr.msk.f32.gmra.mxu1 %vm387_vm2, %v363_v60 }
 0x187   :  { %4827 = vmatprep.mubr.msk.f32.mxu1 %vm387_vm2, %v364_v61 }
 0x188   :  { %v334_v62 = vpop.permute.xlu1 %333 }
 0x189   :  { %v365_v63 = vsel %vm359_vm1, %v5647_v33, %v334_v62 }
 0x18a   :  { %4828 = vmatmul.mubr.msk.f32.gmra.mxu1 %vm387_vm2, %v365_v63 }
 0x18c   :  { %v338_v0 = vpop.permute.xlu1 %337  ;;  %v336_v1 = vpop.permute.xlu0 %335 }
 0x18d   :  { %v367_v2 = vsel %vm359_vm1, %v5663_v43, %v338_v0  ;;  %v366_v3 = vsel %vm359_vm1, %v277_v37, %v336_v1  ;;  %v696_v0 = vld [vmem:[%s6697_s6 + $0x18] sm:$0xff]  ;;  %v695_v1 = vld [vmem:[%s6697_s6 + $0x10] sm:$0xff] }
 0x18e   :  { %4830 = vmatprep.mubr.msk.f32.mxu1 %vm387_vm2, %v366_v3  ;;  %777 = vmatprep.subr.mxu0 %v696_v0 }
 0x18f   :  { %4831 = vmatmul.mubr.msk.f32.gmra.mxu1 %vm387_vm2, %v367_v2  ;;  %778 = vmatpush1.msra.mxu0 %v695_v1 }
 0x190   :  { %v342_v4 = vpop.permute.xlu1 %341  ;;  %v340_v5 = vpop.permute.xlu0 %339 }
 0x191   :  { %v369_v6 = vsel %vm359_vm1, %v5671_v47, %v342_v4  ;;  %v368_v7 = vsel %vm359_vm1, %v5659_v41, %v340_v5 }
 0x192   :  { %4833 = vmatprep.mubr.msk.f32.mxu1 %vm387_vm2, %v368_v7  ;;  %v694_v7 = vld [vmem:[%s6697_s6 + $0x8] sm:$0xff] }
 0x193   :  { %4834 = vmatmul.mubr.msk.f32.gmra.mxu1 %vm387_vm2, %v369_v6  ;;  %779 = vmatprep.subr.mxu0 %v694_v7 }
 0x194   :  { %v346_v8 = vpop.permute.xlu1 %345  ;;  %v344_v9 = vpop.permute.xlu0 %343 }
 0x195   :  { %v371_v10 = vsel %vm359_vm1, %v5679_v51, %v346_v8  ;;  %v370_v11 = vsel %vm359_vm1, %v5665_v45, %v344_v9  ;;  %v693_v8 = vld [vmem:[%s6697_s6] sm:$0xff] }
 0x196   :  { %4836 = vmatprep.mubr.msk.f32.mxu1 %vm387_vm2, %v370_v11  ;;  %780 = vmatpush1.msra.mxu0 %v693_v8 }
 0x197   :  { %4837 = vmatmul.mubr.msk.f32.gmra.mxu1 %vm387_vm2, %v371_v10  ;;  %v5455_v10 = vmov 0.0  }
 0x198   :  { %813 = vmatprep.mubr.f32.mxu0 %v5455_v10  ;;  %4839 = vmatprep.subr.mxu1 %v5455_v10 }
 0x199   :  { %4909 = vmatprep.subr.mxu0 %v5455_v10  ;;  %4843 = vmatprep.mubr.msk.f32.mxu1 %vm5457_vm3, %v5455_v10 }
 0x242   :  { %v4823_v17 = vpop.f32.mrf.mxu1 }
 0x243   :  { %v5734_v18 = vadd.f32 %v4823_v17, %v5731_v16 }
 0x244   :  { %v490_v19 = vpop.f32.mrf.mxu1 }
 0x245   :  { %v4447_v20 = vmul.f32 -1.442695, %v5734_v18  ;;  %v5738_v21 = vadd.f32 %v5731_v16, %v490_v19 }
 0x246   :  { %v4826_v22 = vpop.f32.mrf.mxu1 }
 0x247   :  { %5149 = vpow2.f32 %v4447_v20  ;;  %v4446_v23 = vmul.f32 -1.442695, %v5738_v21  ;;  %v5742_v24 = vadd.f32 %v4826_v22, %v5731_v16 }
 0x248   :  { %v500_v26 = vpop.f32.mrf.mxu1 }
 0x249   :  { %5151 = vpow2.f32 %v4446_v23  ;;  %v4449_v27 = vmul.f32 -1.442695, %v5742_v24  ;;  %v5746_v28 = vadd.f32 %v5731_v16, %v500_v26 }
 0x24a   :  { %v4829_v30 = vpop.f32.mrf.mxu1 }
 0x24b   :  { %5153 = vpow2.f32 %v4449_v27  ;;  %v4448_v32 = vmul.f32 -1.442695, %v5746_v28  ;;  %v5750_v34 = vadd.f32 %v4829_v30, %v5731_v16 }
 0x24c   :  { %v510_v36 = vpop.f32.mrf.mxu1 }
 0x24d   :  { %5155 = vpow2.f32 %v4448_v32  ;;  %v4451_v37 = vmul.f32 -1.442695, %v5750_v34  ;;  %v5754_v38 = vadd.f32 %v5731_v16, %v510_v36 }
 0x24f   :  { %5157 = vpow2.f32 %v4451_v37  ;;  %v4450_v40 = vmul.f32 -1.442695, %v5754_v38  ;;  %v4832_v42 = vpop.f32.mrf.mxu1 }
 0x250   :  { %v5758_v44 = vadd.f32 %v4832_v42, %v5731_v16 }
 0x251   :  { %5159 = vpow2.f32 %v4450_v40  ;;  %v520_v46 = vpop.f32.mrf.mxu1 }
 0x252   :  { %v4453_v48 = vmul.f32 -1.442695, %v5758_v44  ;;  %v5762_v50 = vadd.f32 %v5731_v16, %v520_v46 }
 0x253   :  { %v4835_v52 = vpop.f32.mrf.mxu1 }
 0x254   :  { %v5150_v53 = vpop.eup %5149  ;;  %5161 = vpow2.f32 %v4453_v48  ;;  %v4452_v54 = vmul.f32 -1.442695, %v5762_v50  ;;  %v5766_v55 = vadd.f32 %v4835_v52, %v5731_v16 }
 0x255   :  { %v598_v56 = vadd.f32 1.0, %v5150_v53  ;;  %v530_v57 = vpop.f32.mrf.mxu1 }
 0x256   :  { %v5152_v58 = vpop.eup %5151  ;;  %5163 = vpow2.f32 %v4452_v54  ;;  %v4455_v59 = vmul.f32 -1.442695, %v5766_v55  ;;  %v5770_v60 = vadd.f32 %v5731_v16, %v530_v57 }
 0x257   :  { %5165 = vrcp.f32 %v598_v56  ;;  %v597_v61 = vadd.f32 1.0, %v5152_v58  ;;  %v4838_v62 = vpop.f32.mrf.mxu1 }
 0x258   :  { %v5154_v63 = vpop.eup %5153  ;;  %v4454_v4 = vmul.f32 -1.442695, %v5770_v60  ;;  %v5780_v5 = vadd.f32 %v4838_v62, %v5731_v16 }
 0x259   :  { %5167 = vrcp.f32 %v597_v61  ;;  %v600_v2 = vadd.f32 1.0, %v5154_v63  ;;  %v540_v6 = vpop.f32.mrf.mxu1 }
 0x25a   :  { %v5156_v3 = vpop.eup %5155  ;;  %5169 = vpow2.f32 %v4455_v59  ;;  %v5791_v13 = vadd.f32 %v5731_v16, %v540_v6  ;;  %v4457_v15 = vmul.f32 -1.442695, %v5780_v5 }
 0x25b   :  { %5171 = vrcp.f32 %v600_v2  ;;  %v599_v9 = vadd.f32 1.0, %v5156_v3 }
 0x25c   :  { %v5158_v11 = vpop.eup %5157  ;;  %v4456_v20 = vmul.f32 -1.442695, %v5791_v13 }
 0x25d   :  { %5173 = vrcp.f32 %v599_v9  ;;  %v602_v12 = vadd.f32 1.0, %v5158_v11 }
 0x25e   :  { %v5160_v14 = vpop.eup %5159  ;;  %5175 = vpow2.f32 %v4454_v4 }
 0x25f   :  { %5177 = vrcp.f32 %v602_v12  ;;  %v601_v17 = vadd.f32 1.0, %v5160_v14 }
 0x261   :  { %v5162_v19 = vpop.eup %5161  ;;  %5179 = vrcp.f32 %v601_v17 }
 0x262   :  { %v604_v22 = vadd.f32 1.0, %v5162_v19  ;;  %5181 = vpow2.f32 %v4457_v15 }
 0x263   :  { %v5164_v23 = vpop.eup %5163 }
 0x264   :  { %v5166_v26 = vpop.eup %5165  ;;  %5183 = vrcp.f32 %v604_v22  ;;  %v603_v27 = vadd.f32 1.0, %v5164_v23 }
 0x265   :  { %5185 = vpow2.f32 %v4456_v20  ;;  %647 = vrot.lane.b32.xlu1 %v5166_v26, %s5456_s23 }
 0x266   :  { %v5168_v16 = vpop.eup %5167  ;;  %5187 = vrcp.f32 %v603_v27 }
 0x267   :  { %v5170_v30 = vpop.eup %5169  ;;  %645 = vrot.lane.b32.xlu0 %v5168_v16, %s5456_s23 }
 0x268   :  { %v5172_v32 = vpop.eup %5171  ;;  %v606_v36 = vadd.f32 1.0, %v5170_v30 }
 0x269   :  { %651 = vrot.lane.b32.xlu1 %v5172_v32, %s5456_s23 }
 0x26a   :  { %v5174_v37 = vpop.eup %5173  ;;  %5189 = vrcp.f32 %v606_v36 }
 0x26b   :  { %v5176_v40 = vpop.eup %5175  ;;  %649 = vrot.lane.b32.xlu0 %v5174_v37, %s5456_s23  ;;  %v703_v37 = vlaneseq }
 0x26c   :  { %v5178_v42 = vpop.eup %5177  ;;  %v605_v46 = vadd.f32 1.0, %v5176_v40 }
 0x26d   :  { %655 = vrot.lane.b32.xlu1 %v5178_v42, %s5456_s23  ;;  %v704_v40 = vshrl.u32 %v703_v37, 7 }
 0x26e   :  { %v5180_v48 = vpop.eup %5179  ;;  %5191 = vrcp.f32 %v605_v46  ;;  %v701_v46 = vld [vmem:[#allocation7] sm:$0x3] }
 0x26f   :  { %v5182_v52 = vpop.eup %5181  ;;  %653 = vrot.lane.b32.xlu0 %v5180_v48, %s5456_s23  ;;  %v5843_v42 = vsub.s32 1, %v704_v40 }
 0x270   :  { %v608_v53 = vadd.f32 1.0, %v5182_v52 }
 0x271   :  { %v5184_v54 = vpop.eup %5183  ;;  %v710_v48 = vrot.slane %v701_v46, %v5843_v42 }
 0x272   :  { %v5186_v56 = vpop.eup %5185  ;;  %5193 = vrcp.f32 %v608_v53  ;;  %659 = vrot.lane.b32.xlu1 %v5184_v54, %s5456_s23 }
 0x273   :  { %v5188_v57 = vpop.eup %5187  ;;  %v607_v58 = vadd.f32 1.0, %v5186_v56 }
 0x274   :  { %657 = vrot.lane.b32.xlu0 %v5188_v57, %s5456_s23 }
 0x275   :  { %5195 = vrcp.f32 %v607_v58 }
 0x276   :  { %5197 = vtanh.f32 %v5738_v21 }
 0x277   :  { %v5190_v59 = vpop.eup %5189  ;;  %5199 = vtanh.f32 %v5734_v18 }
 0x278   :  { %663 = vrot.lane.b32.xlu1 %v5190_v59, %s5456_s23  ;;  %5201 = vtanh.f32 %v5746_v28 }
 0x279   :  { %5203 = vtanh.f32 %v5742_v24 }
 0x27a   :  { %5205 = vtanh.f32 %v5754_v38 }
 0x27b   :  { %v5192_v61 = vpop.eup %5191  ;;  %5207 = vtanh.f32 %v5750_v34 }
 0x27c   :  { %661 = vrot.lane.b32.xlu0 %v5192_v61, %s5456_s23  ;;  %5209 = vtanh.f32 %v5762_v50 }
 0x27d   :  { %5211 = vtanh.f32 %v5758_v44 }
 0x27e   :  { %5213 = vtanh.f32 %v5770_v60 }
 0x27f   :  { %v5194_v62 = vpop.eup %5193  ;;  %5215 = vtanh.f32 %v5766_v55 }
 0x280   :  { %667 = vrot.lane.b32.xlu1 %v5194_v62, %s5456_s23  ;;  %5217 = vtanh.f32 %v5791_v13 }
 0x281   :  { %5219 = vtanh.f32 %v5780_v5 }
 0x282   :  { %v5196_v63 = vpop.eup %5195 }
 0x283   :  { %665 = vrot.lane.b32.xlu0 %v5196_v63, %s5456_s23  ;;  %v5198_v0 = vpop.eup %5197 }
 0x284   :  { %v5200_v4 = vpop.eup %5199 }
 0x285   :  { %v5202_v18 = vpop.eup %5201 }
 0x286   :  { %v5204_v28 = vpop.eup %5203 }
 0x287   :  { %v5206_v34 = vpop.eup %5205 }
 0x288   :  { %v5208_v50 = vpop.eup %5207 }
 0x289   :  { %v5210_v44 = vpop.eup %5209 }
 0x28a   :  { %v5212_v60 = vpop.eup %5211 }
 0x28b   :  { %v5214_v55 = vpop.eup %5213 }
 0x28c   :  { %v5216_v26 = vpop.eup %5215 }
 0x28d   :  { %v5218_v16 = vpop.eup %5217 }
 0x28e   :  { %v5220_v32 = vpop.eup %5219 }
 0x2d7   :  { %v648_v3 = vpop.permute.xlu1 %647 }
 0x2d8   :  { %v682_v6 = vmul.f32 %v5200_v4, %v648_v3 }
 0x2d9   :  { %v646_v1 = vpop.permute.xlu0 %645 }
 0x2da   :  { %v681_v2 = vmul.f32 %v5198_v0, %v646_v1 }
 0x2db   :  { %v652_v24 = vpop.permute.xlu1 %651 }
 0x2dc   :  { %4458 = vmatmul.mubr.msk.f32.vlgmr.msra.gmra.mxu0 %vm359_vm1, %v681_v2  ;;  %v684_v38 = vmul.f32 %v5204_v28, %v652_v24 }
 0x2dd   :  { %819 = vmatprep.mubr.f32.mxu0 %v5455_v10  ;;  %v650_v7 = vpop.permute.xlu0 %649 }
 0x2de   :  { %v683_v21 = vmul.f32 %v5202_v18, %v650_v7 }
 0x2df   :  { %v656_v11 = vpop.permute.xlu1 %655 }
 0x2e0   :  { %4459 = vmatmul.mubr.msk.f32.gmra.mxu0 %vm359_vm1, %v682_v6  ;;  %v686_v12 = vmul.f32 %v5208_v50, %v656_v11  ;;  %v5854_v50 = vsub.s32 0, %v704_v40 }
 0x2e1   :  { %825 = vmatprep.mubr.f32.mxu0 %v5455_v10  ;;  %v654_v8 = vpop.permute.xlu0 %653 }
 0x2e2   :  { %v685_v9 = vmul.f32 %v5206_v34, %v654_v8 }
 0x2e4   :  { %4460 = vmatmul.mubr.msk.f32.gmra.mxu0 %vm359_vm1, %v683_v21  ;;  %v660_v17 = vpop.permute.xlu1 %659 }
 0x2e5   :  { %831 = vmatprep.mubr.f32.mxu0 %v5455_v10  ;;  %v688_v19 = vmul.f32 %v5212_v60, %v660_v17 }
 0x2e6   :  { %v658_v14 = vpop.permute.xlu0 %657 }
 0x2e7   :  { %v687_v15 = vmul.f32 %v5210_v44, %v658_v14 }
 0x2e8   :  { %4461 = vmatmul.mubr.msk.f32.gmra.mxu0 %vm359_vm1, %v684_v38 }
 0x2e9   :  { %837 = vmatprep.mubr.f32.mxu0 %v5455_v10 }
 0x2ea   :  { %v664_v23 = vpop.permute.xlu1 %663 }
 0x2eb   :  { %v690_v13 = vmul.f32 %v5216_v26, %v664_v23 }
 0x2ec   :  { %4462 = vmatmul.mubr.msk.f32.gmra.mxu0 %vm359_vm1, %v685_v9 }
 0x2ed   :  { %843 = vmatprep.mubr.f32.mxu0 %v5455_v10 }
 0x2ee   :  { %v662_v20 = vpop.permute.xlu0 %661 }
 0x2ef   :  { %v689_v22 = vmul.f32 %v5214_v55, %v662_v20 }
 0x2f0   :  { %4463 = vmatmul.mubr.msk.f32.gmra.mxu0 %vm359_vm1, %v686_v12 }
 0x2f1   :  { %849 = vmatprep.mubr.f32.mxu0 %v5455_v10 }
 0x2f2   :  { %v668_v30 = vpop.permute.xlu1 %667 }
 0x2f3   :  { %v692_v36 = vmul.f32 %v5220_v32, %v668_v30 }
 0x2f4   :  { %4464 = vmatmul.mubr.msk.f32.gmra.mxu0 %vm359_vm1, %v687_v15  ;;  %v706_v15 = vrot.slane %v701_v46, %v5854_v50 }
 0x2f5   :  { %855 = vmatprep.mubr.f32.mxu0 %v5455_v10  ;;  %v666_v27 = vpop.permute.xlu0 %665 }
 0x2f6   :  { %v691_v5 = vmul.f32 %v5218_v16, %v666_v27 }
 0x2f8   :  { %4465 = vmatmul.mubr.msk.f32.gmra.mxu0 %vm359_vm1, %v688_v19 }
 0x2f9   :  { %861 = vmatprep.mubr.f32.mxu0 %v5455_v10 }
 0x2fc   :  { %4466 = vmatmul.mubr.msk.f32.gmra.mxu0 %vm359_vm1, %v689_v22 }
 0x2fd   :  { %867 = vmatprep.mubr.f32.mxu0 %v5455_v10 }
 0x300   :  { %4467 = vmatmul.mubr.msk.f32.gmra.mxu0 %vm359_vm1, %v690_v13 }
 0x301   :  { %873 = vmatprep.mubr.f32.mxu0 %v5455_v10 }
 0x304   :  { %4468 = vmatmul.mubr.msk.f32.gmra.mxu0 %vm359_vm1, %v691_v5 }
 0x305   :  { %879 = vmatprep.mubr.f32.mxu0 %v5455_v10 }
 0x308   :  { %4469 = vmatmul.mubr.msk.f32.gmra.mxu0 %vm359_vm1, %v692_v36 }
 0x309   :  { %4913 = vmatprep.mubr.msk.f32.mxu0 %vm5457_vm3, %v5455_v10 }
 0x39c   :  { %v815_v52 = vpop.f32.mrf.mxu0 }
 0x39d   :  { %v5865_v27 = vadd.f32 %v815_v52, %v706_v15 }
 0x39e   :  { %v817_v53 = vpop.f32.mrf.mxu0 }
 0x39f   :  { %v818_v54 = vadd.f32 %v817_v53, %v710_v48 }
 0x3a0   :  { %v821_v56 = vpop.f32.mrf.mxu0 }
 0x3a1   :  { %898 = vrot.lane.b32.xlu0 %v818_v54, %s5456_s23  ;;  %v5869_v16 = vadd.f32 %v821_v56, %v706_v15 }
 0x3a2   :  { %v823_v57 = vpop.f32.mrf.mxu0 }
 0x3a3   :  { %v824_v58 = vadd.f32 %v823_v57, %v710_v48 }
 0x3a4   :  { %v827_v59 = vpop.f32.mrf.mxu0 }
 0x3a5   :  { %900 = vrot.lane.b32.xlu1 %v824_v58, %s5456_s23  ;;  %v5873_v5 = vadd.f32 %v827_v59, %v706_v15 }
 0x3a6   :  { %v829_v61 = vpop.f32.mrf.mxu0 }
 0x3a7   :  { %v830_v62 = vadd.f32 %v829_v61, %v710_v48 }
 0x3a8   :  { %v833_v63 = vpop.f32.mrf.mxu0 }
 0x3a9   :  { %902 = vrot.lane.b32.xlu0 %v830_v62, %s5456_s23  ;;  %v5877_v30 = vadd.f32 %v833_v63, %v706_v15 }
 0x3aa   :  { %v835_v0 = vpop.f32.mrf.mxu0 }
 0x3ab   :  { %v836_v1 = vadd.f32 %v835_v0, %v710_v48 }
 0x3ac   :  { %v839_v2 = vpop.f32.mrf.mxu0 }
 0x3ad   :  { %904 = vrot.lane.b32.xlu1 %v836_v1, %s5456_s23  ;;  %v5881_v32 = vadd.f32 %v839_v2, %v706_v15  ;;  %v4482_v2 = vld [vmem:[%s6699_s8] ss:$0 sm:$0xff] }
 0x3ae   :  { %v841_v3 = vpop.f32.mrf.mxu0 }
 0x3af   :  { %v842_v4 = vadd.f32 %v841_v3, %v710_v48 }
 0x3b0   :  { %v845_v6 = vpop.f32.mrf.mxu0 }
 0x3b1   :  { %906 = vrot.lane.b32.xlu0 %v842_v4, %s5456_s23  ;;  %v5885_v36 = vadd.f32 %v845_v6, %v706_v15 }
 0x3b2   :  { %v847_v7 = vpop.f32.mrf.mxu0 }
 0x3b3   :  { %v848_v18 = vadd.f32 %v847_v7, %v710_v48 }
 0x3b4   :  { %v851_v21 = vpop.f32.mrf.mxu0 }
 0x3b5   :  { %908 = vrot.lane.b32.xlu1 %v848_v18, %s5456_s23  ;;  %v5889_v37 = vadd.f32 %v851_v21, %v706_v15 }
 0x3b6   :  { %v853_v24 = vpop.f32.mrf.mxu0 }
 0x3b7   :  { %v854_v28 = vadd.f32 %v853_v24, %v710_v48 }
 0x3b8   :  { %v857_v38 = vpop.f32.mrf.mxu0 }
 0x3b9   :  { %910 = vrot.lane.b32.xlu0 %v854_v28, %s5456_s23  ;;  %v5893_v40 = vadd.f32 %v857_v38, %v706_v15 }
 0x3ba   :  { %v859_v8 = vpop.f32.mrf.mxu0 }
 0x3bb   :  { %v860_v34 = vadd.f32 %v859_v8, %v710_v48 }
 0x3bc   :  { %v863_v9 = vpop.f32.mrf.mxu0 }
 0x3bd   :  { %912 = vrot.lane.b32.xlu1 %v860_v34, %s5456_s23  ;;  %v5897_v46 = vadd.f32 %v863_v9, %v706_v15 }
 0x3be   :  { %v865_v11 = vpop.f32.mrf.mxu0 }
 0x3bf   :  { %v866_v12 = vadd.f32 %v865_v11, %v710_v48 }
 0x3c0   :  { %v869_v14 = vpop.f32.mrf.mxu0 }
 0x3c1   :  { %914 = vrot.lane.b32.xlu0 %v866_v12, %s5456_s23 }
 0x3c2   :  { %v871_v44 = vpop.f32.mrf.mxu0 }
 0x3c3   :  { %v872_v17 = vadd.f32 %v871_v44, %v710_v48 }
 0x3c4   :  { %v875_v60 = vpop.f32.mrf.mxu0 }
 0x3c5   :  { %v5858_v19 = vadd.f32 %v875_v60, %v706_v15  ;;  %916 = vrot.lane.b32.xlu1 %v872_v17, %s5456_s23 }
 0x3c6   :  { %v877_v20 = vpop.f32.mrf.mxu0 }
 0x3c7   :  { %v878_v55 = vadd.f32 %v877_v20, %v710_v48 }
 0x3c8   :  { %v881_v22 = vpop.f32.mrf.mxu0 }
 0x3c9   :  { %v5861_v23 = vadd.f32 %v881_v22, %v706_v15  ;;  %918 = vrot.lane.b32.xlu0 %v878_v55, %s5456_s23 }
 0x3ca   :  { %v883_v26 = vpop.f32.mrf.mxu0 }
 0x3cb   :  { %v884_v13 = vadd.f32 %v883_v26, %v710_v48  ;;  %v5901_v48 = vadd.f32 %v869_v14, %v706_v15 }
 0x3cd   :  { %920 = vrot.lane.b32.xlu1 %v884_v13, %s5456_s23 }
 0x3d1   :  { %923 = vrot.lane.b32.xlu1 %v5865_v27, %s5452_s11 }
 0x3d5   :  { %1004 = vrot.lane.b32.xlu1 %v5869_v16, %s5452_s11 }
 0x3d9   :  { %1081 = vrot.lane.b32.xlu1 %v5873_v5, %s5452_s11 }
 0x3dd   :  { %1158 = vrot.lane.b32.xlu1 %v5877_v30, %s5452_s11 }
 0x3e1   :  { %1235 = vrot.lane.b32.xlu1 %v5881_v32, %s5452_s11 }
 0x3e5   :  { %1312 = vrot.lane.b32.xlu1 %v5885_v36, %s5452_s11 }
 0x3e9   :  { %1389 = vrot.lane.b32.xlu1 %v5889_v37, %s5452_s11 }
 0x3ed   :  { %1466 = vrot.lane.b32.xlu1 %v5893_v40, %s5452_s11 }
 0x3f1   :  { %1543 = vrot.lane.b32.xlu1 %v5897_v46, %s5452_s11 }
 0x3f5   :  { %1620 = vrot.lane.b32.xlu1 %v5901_v48, %s5452_s11 }
 0x413   :  { %v899_v52 = vpop.permute.xlu0 %898 }
 0x414   :  { %925 = vrot.lane.b32.xlu0 %v899_v52, %s5452_s11 }
 0x417   :  { %v901_v53 = vpop.permute.xlu1 %900 }
 0x418   :  { %1006 = vrot.lane.b32.xlu0 %v901_v53, %s5452_s11 }
 0x41b   :  { %v903_v54 = vpop.permute.xlu0 %902 }
 0x41c   :  { %1083 = vrot.lane.b32.xlu0 %v903_v54, %s5452_s11 }
 0x41f   :  { %v905_v56 = vpop.permute.xlu1 %904 }
 0x420   :  { %1160 = vrot.lane.b32.xlu0 %v905_v56, %s5452_s11 }
 0x423   :  { %v907_v57 = vpop.permute.xlu0 %906 }
 0x424   :  { %1237 = vrot.lane.b32.xlu0 %v907_v57, %s5452_s11 }
 0x427   :  { %v909_v58 = vpop.permute.xlu1 %908 }
 0x428   :  { %1314 = vrot.lane.b32.xlu0 %v909_v58, %s5452_s11 }
 0x42b   :  { %v911_v59 = vpop.permute.xlu0 %910 }
 0x42c   :  { %1391 = vrot.lane.b32.xlu0 %v911_v59, %s5452_s11 }
 0x42f   :  { %v913_v61 = vpop.permute.xlu1 %912 }
 0x430   :  { %1468 = vrot.lane.b32.xlu0 %v913_v61, %s5452_s11 }
 0x433   :  { %v915_v62 = vpop.permute.xlu0 %914 }
 0x434   :  { %1545 = vrot.lane.b32.xlu0 %v915_v62, %s5452_s11 }
 0x437   :  { %v917_v63 = vpop.permute.xlu1 %916 }
 0x438   :  { %1622 = vrot.lane.b32.xlu0 %v917_v63, %s5452_s11 }
 0x43b   :  { %v919_v0 = vpop.permute.xlu0 %918 }
 0x43c   :  { %1699 = vrot.lane.b32.xlu0 %v919_v0, %s5452_s11 }
 0x43f   :  { %v921_v1 = vpop.permute.xlu1 %920 }
 0x440   :  { %1697 = vrot.lane.b32.xlu0 %v5858_v19, %s5452_s11  ;;  %1776 = vrot.lane.b32.xlu1 %v921_v1, %s5452_s11 }
 0x444   :  { %1910 = vrot.lane.b32.xlu0 %v5637_v25, %s5458_s24  ;;  %1774 = vrot.lane.b32.xlu1 %v5861_v23, %s5452_s11  ;;  %v4483_v25 = vld [vmem:[%s6700_s9] ss:$0 sm:$0xff] }
 0x448   :  { %1912 = vrot.lane.b32.xlu0 %v5643_v31, %s5458_s24  ;;  %1914 = vrot.lane.b32.xlu1 %v5641_v29, %s5458_s24  ;;  %v924_v29 = vpop.permute.xlu1 %923 }
 0x44c   :  { %1964 = vrot.lane.b32.xlu0 %v4482_v2, %s5458_s24  ;;  %1916 = vrot.lane.b32.xlu1 %v5651_v35, %s5458_s24  ;;  %v1005_v31 = vpop.permute.xlu1 %1004  ;;  %v5948_v35 = vld [vmem:[%s6694_s3] sm:$0xff] }
 0x450   :  { %1918 = vrot.lane.b32.xlu0 %v5647_v33, %s5458_s24  ;;  %1985 = vrot.lane.b32.xlu1 %v4483_v25, %s5458_s24  ;;  %v1082_v3 = vpop.permute.xlu1 %1081 }
 0x454   :  { %1920 = vrot.lane.b32.xlu1 %v5657_v39, %s5458_s24  ;;  %v1159_v6 = vpop.permute.xlu1 %1158 }
 0x458   :  { %v1236_v39 = vpop.permute.xlu1 %1235 }
 0x45c   :  { %v1313_v21 = vpop.permute.xlu1 %1312 }
 0x460   :  { %v1390_v28 = vpop.permute.xlu1 %1389 }
 0x464   :  { %v1467_v34 = vpop.permute.xlu1 %1466 }
 0x468   :  { %v1544_v11 = vpop.permute.xlu1 %1543 }
 0x46c   :  { %v1621_v44 = vpop.permute.xlu1 %1620 }
 0x486   :  { %v926_v4 = vpop.permute.xlu0 %925 }
 0x487   :  { %4840 = vmatpush3.msra.mxu1 %v926_v4 }
 0x488   :  { %4841 = vmatprep.subr.mxu1 %v5455_v10 }
 0x489   :  { %4842 = vmatpush3.msra.mxu1 %v924_v29 }
 0x48a   :  { %v1007_v33 = vpop.permute.xlu0 %1006  ;;  %4844 = vmatmul.mubr.msk.f32.vlgmr.msra.gmra.mxu1 %vm929_vm4, %v5948_v35  ;;  %4846 = vmatprep.subr.mxu1 %v5455_v10 }
 0x48b   :  { %4847 = vmatpush3.msra.mxu1 %v1007_v33  ;;  %4850 = vmatprep.mubr.msk.f32.mxu1 %vm5457_vm3, %v5455_v10 }
 0x48c   :  { %4848 = vmatprep.subr.mxu1 %v5455_v10 }
 0x48d   :  { %4849 = vmatpush3.msra.mxu1 %v1005_v31 }
 0x48e   :  { %v1084_v7 = vpop.permute.xlu0 %1083  ;;  %4851 = vmatmul.mubr.msk.f32.vlgmr.msra.gmra.mxu1 %vm929_vm4, %v5948_v35  ;;  %4853 = vmatprep.subr.mxu1 %v5455_v10 }
 0x48f   :  { %4854 = vmatpush3.msra.mxu1 %v1084_v7  ;;  %4857 = vmatprep.mubr.msk.f32.mxu1 %vm5457_vm3, %v5455_v10 }
 0x490   :  { %4855 = vmatprep.subr.mxu1 %v5455_v10 }
 0x491   :  { %4856 = vmatpush3.msra.mxu1 %v1082_v3  ;;  %v4491_v3 = vld [vmem:[%s6695_s4 + $0x78] sm:$0xff] }
 0x492   :  { %v1161_v18 = vpop.permute.xlu0 %1160  ;;  %4858 = vmatmul.mubr.msk.f32.vlgmr.msra.gmra.mxu1 %vm929_vm4, %v5948_v35  ;;  %4860 = vmatprep.subr.mxu1 %v5455_v10 }
 0x493   :  { %4861 = vmatpush3.msra.mxu1 %v1161_v18  ;;  %4864 = vmatprep.mubr.msk.f32.mxu1 %vm5457_vm3, %v5455_v10 }
 0x494   :  { %4862 = vmatprep.subr.mxu1 %v5455_v10 }
 0x495   :  { %4863 = vmatpush3.msra.mxu1 %v1159_v6 }
 0x496   :  { %v1238_v24 = vpop.permute.xlu0 %1237  ;;  %4865 = vmatmul.mubr.msk.f32.vlgmr.msra.gmra.mxu1 %vm929_vm4, %v5948_v35  ;;  %4867 = vmatprep.subr.mxu1 %v5455_v10 }
 0x497   :  { %4868 = vmatpush3.msra.mxu1 %v1238_v24  ;;  %4871 = vmatprep.mubr.msk.f32.mxu1 %vm5457_vm3, %v5455_v10 }
 0x498   :  { %4869 = vmatprep.subr.mxu1 %v5455_v10 }
 0x499   :  { %4870 = vmatpush3.msra.mxu1 %v1236_v39 }
 0x49a   :  { %v1315_v38 = vpop.permute.xlu0 %1314  ;;  %4872 = vmatmul.mubr.msk.f32.vlgmr.msra.gmra.mxu1 %vm929_vm4, %v5948_v35  ;;  %4874 = vmatprep.subr.mxu1 %v5455_v10 }
 0x49b   :  { %4875 = vmatpush3.msra.mxu1 %v1315_v38  ;;  %4878 = vmatprep.mubr.msk.f32.mxu1 %vm5457_vm3, %v5455_v10  ;;  %v4486_v38 = vld [vmem:[%s6695_s4 + $0x50] sm:$0xff] }
 0x49c   :  { %4876 = vmatprep.subr.mxu1 %v5455_v10 }
 0x49d   :  { %4877 = vmatpush3.msra.mxu1 %v1313_v21  ;;  %v4489_v21 = vld [vmem:[%s6695_s4 + $0x68] sm:$0xff] }
 0x49e   :  { %v1392_v8 = vpop.permute.xlu0 %1391  ;;  %4879 = vmatmul.mubr.msk.f32.vlgmr.msra.gmra.mxu1 %vm929_vm4, %v5948_v35  ;;  %4881 = vmatprep.subr.mxu1 %v5455_v10 }
 0x49f   :  { %4882 = vmatpush3.msra.mxu1 %v1392_v8  ;;  %4885 = vmatprep.mubr.msk.f32.mxu1 %vm5457_vm3, %v5455_v10 }
 0x4a0   :  { %4883 = vmatprep.subr.mxu1 %v5455_v10 }
 0x4a1   :  { %4884 = vmatpush3.msra.mxu1 %v1390_v28 }
 0x4a2   :  { %v1469_v9 = vpop.permute.xlu0 %1468  ;;  %4886 = vmatmul.mubr.msk.f32.vlgmr.msra.gmra.mxu1 %vm929_vm4, %v5948_v35  ;;  %4888 = vmatprep.subr.mxu1 %v5455_v10 }
 0x4a3   :  { %4889 = vmatpush3.msra.mxu1 %v1469_v9  ;;  %4892 = vmatprep.mubr.msk.f32.mxu1 %vm5457_vm3, %v5455_v10 }
 0x4a4   :  { %4890 = vmatprep.subr.mxu1 %v5455_v10 }
 0x4a5   :  { %4891 = vmatpush3.msra.mxu1 %v1467_v34 }
 0x4a6   :  { %v1546_v12 = vpop.permute.xlu0 %1545  ;;  %4893 = vmatmul.mubr.msk.f32.vlgmr.msra.gmra.mxu1 %vm929_vm4, %v5948_v35  ;;  %4895 = vmatprep.subr.mxu1 %v5455_v10 }
 0x4a7   :  { %4896 = vmatpush3.msra.mxu1 %v1546_v12  ;;  %4899 = vmatprep.mubr.msk.f32.mxu1 %vm5457_vm3, %v5455_v10 }
 0x4a8   :  { %4897 = vmatprep.subr.mxu1 %v5455_v10 }
 0x4a9   :  { %4898 = vmatpush3.msra.mxu1 %v1544_v11 }
 0x4aa   :  { %v1623_v14 = vpop.permute.xlu0 %1622  ;;  %4900 = vmatmul.mubr.msk.f32.vlgmr.msra.gmra.mxu1 %vm929_vm4, %v5948_v35  ;;  %4902 = vmatprep.subr.mxu1 %v5455_v10 }
 0x4ab   :  { %4903 = vmatpush3.msra.mxu1 %v1623_v14  ;;  %4906 = vmatprep.mubr.msk.f32.mxu1 %vm5457_vm3, %v5455_v10  ;;  %v4485_v14 = vld [vmem:[%s6695_s4 + $0x48] sm:$0xff] }
 0x4ac   :  { %4904 = vmatprep.subr.mxu1 %v5455_v10 }
 0x4ad   :  { %4905 = vmatpush3.msra.mxu1 %v1621_v44 }
 0x4ae   :  { %v1700_v15 = vpop.permute.xlu0 %1699  ;;  %4907 = vmatmul.mubr.msk.f32.vlgmr.msra.gmra.mxu1 %vm929_vm4, %v5948_v35  ;;  %4916 = vmatprep.subr.mxu1 %v5455_v10 }
 0x4af   :  { %4910 = vmatpush3.msra.mxu0 %v1700_v15  ;;  %4920 = vmatprep.mubr.msk.f32.mxu1 %vm5457_vm3, %v5455_v10 }
 0x4b0   :  { %4911 = vmatprep.subr.mxu0 %v5455_v10 }
 0x4b2   :  { %v1698_v17 = vpop.permute.xlu0 %1697  ;;  %v1777_v60 = vpop.permute.xlu1 %1776 }
 0x4b3   :  { %4912 = vmatpush3.msra.mxu0 %v1698_v17  ;;  %4917 = vmatpush3.msra.mxu1 %v1777_v60  ;;  %v4484_v17 = vld [vmem:[%s6695_s4 + $0x40] sm:$0xff] }
 0x4b4   :  { %4914 = vmatmul.mubr.msk.f32.vlgmr.msra.gmra.mxu0 %vm929_vm4, %v5948_v35  ;;  %4918 = vmatprep.subr.mxu1 %v5455_v10 }
 0x4b5   :  { %4923 = vmatprep.subr.mxu0 %v4491_v3 }
 0x4b6   :  { %v1775_v20 = vpop.permute.xlu1 %1774  ;;  %4924 = vmatpush3.msra.mxu0 %v4491_v3  ;;  %v1911_v6 = vpop.permute.xlu0 %1910 }
 0x4b7   :  { %4919 = vmatpush3.msra.mxu1 %v1775_v20 }
 0x4b8   :  { %4921 = vmatmul.mubr.msk.f32.vlgmr.msra.gmra.mxu1 %vm929_vm4, %v5948_v35 }
 0x4b9   :  { %2420 = vmatprep.mubr.f32.mxu1 %v5455_v10 }
 0x4ba   :  { %v1913_v33 = vpop.permute.xlu0 %1912  ;;  %v1915_v39 = vpop.permute.xlu1 %1914 }
 0x4be   :  { %v6047_v7 = vpop.permute.xlu0 %1964  ;;  %v1917_v18 = vpop.permute.xlu1 %1916 }
 0x4c2   :  { %v1919_v24 = vpop.permute.xlu0 %1918  ;;  %v6055_v28 = vpop.permute.xlu1 %1985 }
 0x4c6   :  { %v1921_v11 = vpop.permute.xlu1 %1920 }
 0x54a   :  { %v999_v55 = vpop.f32.mrf.mxu1 }
 0x54b   :  { %1862 = vrot.lane.b32.xlu0 %v999_v55, %s5458_s24 }
 0x54c   :  { %v4845_v22 = vpop.f32.mrf.mxu1 }
 0x54e   :  { %v1076_v26 = vpop.f32.mrf.mxu1 }
 0x54f   :  { %1864 = vrot.lane.b32.xlu0 %v1076_v26, %s5458_s24 }
 0x550   :  { %v4852_v13 = vpop.f32.mrf.mxu1 }
 0x552   :  { %v1153_v52 = vpop.f32.mrf.mxu1 }
 0x553   :  { %1922 = vrot.lane.b32.xlu0 %v5663_v43, %s5458_s24  ;;  %1866 = vrot.lane.b32.xlu1 %v1153_v52, %s5458_s24 }
 0x554   :  { %v4859_v53 = vpop.f32.mrf.mxu1 }
 0x556   :  { %v1230_v54 = vpop.f32.mrf.mxu1 }
 0x557   :  { %1868 = vrot.lane.b32.xlu1 %v1230_v54, %s5458_s24 }
 0x558   :  { %v4866_v56 = vpop.f32.mrf.mxu1 }
 0x55a   :  { %v1307_v57 = vpop.f32.mrf.mxu1 }
 0x55b   :  { %1926 = vrot.lane.b32.xlu1 %v5671_v47, %s5458_s24  ;;  %1870 = vrot.lane.b32.xlu0 %v1307_v57, %s5458_s24 }
 0x55c   :  { %v4873_v58 = vpop.f32.mrf.mxu1 }
 0x55e   :  { %v1384_v59 = vpop.f32.mrf.mxu1 }
 0x55f   :  { %1872 = vrot.lane.b32.xlu1 %v1384_v59, %s5458_s24 }
 0x560   :  { %v4880_v61 = vpop.f32.mrf.mxu1 }
 0x562   :  { %v1461_v62 = vpop.f32.mrf.mxu1 }
 0x563   :  { %1874 = vrot.lane.b32.xlu0 %v1461_v62, %s5458_s24 }
 0x564   :  { %v4887_v43 = vpop.f32.mrf.mxu1 }
 0x566   :  { %v1538_v63 = vpop.f32.mrf.mxu1 }
 0x567   :  { %1876 = vrot.lane.b32.xlu0 %v1538_v63, %s5458_s24 }
 0x568   :  { %v4894_v0 = vpop.f32.mrf.mxu1 }
 0x56a   :  { %v1615_v1 = vpop.f32.mrf.mxu1 }
 0x56b   :  { %1924 = vrot.lane.b32.xlu0 %v5659_v41, %s5458_s24  ;;  %1878 = vrot.lane.b32.xlu1 %v1615_v1, %s5458_s24  ;;  %v4490_v41 = vld [vmem:[%s6695_s4 + $0x70] sm:$0xff] }
 0x56c   :  { %v4901_v47 = vpop.f32.mrf.mxu1  ;;  %4925 = vmatprep.subr.mxu0 %v4490_v41 }
 0x56d   :  { %4926 = vmatpush3.msra.mxu0 %v4490_v41 }
 0x56e   :  { %v1692_v2 = vpop.f32.mrf.mxu1  ;;  %4927 = vmatprep.subr.mxu0 %v4489_v21 }
 0x56f   :  { %1880 = vrot.lane.b32.xlu1 %v1692_v2, %s5458_s24  ;;  %4928 = vmatpush3.msra.mxu0 %v4489_v21 }
 0x570   :  { %v4908_v25 = vpop.f32.mrf.mxu1 }
 0x573   :  { %1928 = vrot.lane.b32.xlu1 %v5665_v45, %s5458_s24 }
 0x574   :  { %v1769_v29 = vpop.f32.mrf.mxu0 }
 0x575   :  { %1882 = vrot.lane.b32.xlu0 %v1769_v29, %s5458_s24 }
 0x576   :  { %v4915_v31 = vpop.f32.mrf.mxu0 }
 0x578   :  { %v1846_v4 = vpop.f32.mrf.mxu1 }
 0x579   :  { %1930 = vrot.lane.b32.xlu0 %v5679_v51, %s5458_s24  ;;  %1884 = vrot.lane.b32.xlu1 %v1846_v4, %s5458_s24  ;;  %v4488_v51 = vld [vmem:[%s6695_s4 + $0x60] sm:$0xff] }
 0x57a   :  { %v4922_v45 = vpop.f32.mrf.mxu1  ;;  %4929 = vmatprep.subr.mxu0 %v4488_v51 }
 0x57b   :  { %4930 = vmatpush3.msra.mxu0 %v4488_v51 }
 0x57d   :  { %1932 = vrot.lane.b32.xlu1 %v5673_v49, %s5458_s24  ;;  %v4487_v49 = vld [vmem:[%s6695_s4 + $0x58] sm:$0xff] }
 0x57e   :  { %4931 = vmatprep.subr.mxu0 %v4487_v49 }
 0x57f   :  { %4932 = vmatpush3.msra.mxu0 %v4487_v49 }
 0x580   :  { %4933 = vmatprep.subr.mxu0 %v4486_v38 }
 0x581   :  { %4934 = vmatpush3.msra.mxu0 %v4486_v38 }
 0x582   :  { %4935 = vmatprep.subr.mxu0 %v4485_v14 }
 0x583   :  { %4936 = vmatpush3.msra.mxu0 %v4485_v14 }
 0x584   :  { %4937 = vmatprep.subr.mxu0 %v4484_v17 }
 0x585   :  { %4938 = vmatpush3.msra.mxu0 %v4484_v17 }
 0x586   :  { %4951 = vmatprep.subr.mxu0 %v5455_v10 }
 0x5bd   :  { %v1863_v8 = vpop.permute.xlu0 %1862 }
 0x5be   :  { %v1898_v34 = vadd.f32 %v1863_v8, %v5865_v27 }
 0x5c0   :  { %v1946_v9 = vadd.f32 %v1911_v6, %v1898_v34 }
 0x5c1   :  { %v1865_v12 = vpop.permute.xlu0 %1864 }
 0x5c2   :  { %v1967_v44 = vmul.f32 %v6047_v7, %v1946_v9  ;;  %v1899_v15 = vadd.f32 %v1865_v12, %v5869_v16 }
 0x5c4   :  { %v1947_v27 = vadd.f32 %v1913_v33, %v1899_v15  ;;  %v1988_v60 = vadd.f32 %v6055_v28, %v1967_v44 }
 0x5c5   :  { %v1867_v20 = vpop.permute.xlu1 %1866  ;;  %v1923_v13 = vpop.permute.xlu0 %1922 }
 0x5c6   :  { %v1968_v55 = vmul.f32 %v6047_v7, %v1947_v27  ;;  %v1900_v22 = vadd.f32 %v1867_v20, %v5873_v5  ;;  %2008 = vrot.lane.b32.xlu0 %v1988_v60, %s5458_s24 }
 0x5c8   :  { %v1948_v16 = vadd.f32 %v1915_v39, %v1900_v22  ;;  %v1989_v26 = vadd.f32 %v6055_v28, %v1968_v55 }
 0x5c9   :  { %v1869_v52 = vpop.permute.xlu1 %1868 }
 0x5ca   :  { %v1969_v53 = vmul.f32 %v6047_v7, %v1948_v16  ;;  %v1901_v54 = vadd.f32 %v1869_v52, %v5877_v30  ;;  %2010 = vrot.lane.b32.xlu0 %v1989_v26, %s5458_s24 }
 0x5cc   :  { %v1949_v56 = vadd.f32 %v1917_v18, %v1901_v54  ;;  %v6082_v57 = vadd.f32 %v6055_v28, %v1969_v53 }
 0x5cd   :  { %v1871_v5 = vpop.permute.xlu0 %1870  ;;  %v1927_v58 = vpop.permute.xlu1 %1926 }
 0x5ce   :  { %v1970_v59 = vmul.f32 %v6047_v7, %v1949_v56  ;;  %v1902_v61 = vadd.f32 %v1871_v5, %v5881_v32  ;;  %2012 = vrot.lane.b32.xlu0 %v6082_v57, %s5458_s24  ;;  %2036 = vrot.lane.b32.xlu1 %v6082_v57, %s5456_s23 }
 0x5d0   :  { %v1950_v62 = vadd.f32 %v1919_v24, %v1902_v61  ;;  %v6091_v30 = vadd.f32 %v6055_v28, %v1970_v59 }
 0x5d1   :  { %v1873_v43 = vpop.permute.xlu1 %1872 }
 0x5d2   :  { %v1971_v63 = vmul.f32 %v6047_v7, %v1950_v62  ;;  %v1903_v0 = vadd.f32 %v1873_v43, %v5885_v36  ;;  %2014 = vrot.lane.b32.xlu0 %v6091_v30, %s5458_s24  ;;  %2038 = vrot.lane.b32.xlu1 %v6091_v30, %s5456_s23 }
 0x5d4   :  { %v1951_v32 = vadd.f32 %v1921_v11, %v1903_v0  ;;  %v6100_v1 = vadd.f32 %v6055_v28, %v1971_v63 }
 0x5d5   :  { %v1875_v47 = vpop.permute.xlu0 %1874 }
 0x5d6   :  { %v1972_v2 = vmul.f32 %v6047_v7, %v1951_v32  ;;  %v1904_v25 = vadd.f32 %v1875_v47, %v5889_v37  ;;  %2040 = vrot.lane.b32.xlu1 %v6100_v1, %s5456_s23 }
 0x5d8   :  { %v1952_v29 = vadd.f32 %v1923_v13, %v1904_v25  ;;  %v6107_v31 = vadd.f32 %v6055_v28, %v1972_v2 }
 0x5d9   :  { %v1877_v3 = vpop.permute.xlu0 %1876 }
 0x5da   :  { %v1973_v41 = vmul.f32 %v6047_v7, %v1952_v29  ;;  %2042 = vrot.lane.b32.xlu1 %v6107_v31, %s5456_s23  ;;  %v1905_v4 = vadd.f32 %v1877_v3, %v5893_v40 }
 0x5dc   :  { %v1994_v45 = vadd.f32 %v6055_v28, %v1973_v41  ;;  %v4516_v41 = vld [vmem:[%s6697_s6 + $0x78] sm:$0xff] }
 0x5dd   :  { %v1925_v6 = vpop.permute.xlu0 %1924  ;;  %v1879_v33 = vpop.permute.xlu1 %1878  ;;  %2380 = vmatprep.subr.mxu1 %v4516_v41 }
 0x5de   :  { %v1953_v37 = vadd.f32 %v1925_v6, %v1905_v4  ;;  %v1906_v39 = vadd.f32 %v1879_v33, %v5897_v46  ;;  %2016 = vrot.lane.b32.xlu0 %v1994_v45, %s5458_s24  ;;  %v4515_v4 = vld [vmem:[%s6697_s6 + $0x70] sm:$0xff]  ;;  %v4514_v45 = vld [vmem:[%s6697_s6 + $0x68] sm:$0xff]  ;;  %v4513_v6 = vld [vmem:[%s6697_s6 + $0x60] sm:$0xff] }
 0x5df   :  { %2381 = vmatpush1.msra.mxu1 %v4515_v4  ;;  %v4492_v33 = vld [vmem:[#allocation5 + $0x1] ss:$0 sm:$0xff] }
 0x5e0   :  { %v1974_v18 = vmul.f32 %v6047_v7, %v1953_v37  ;;  %v1954_v21 = vadd.f32 %v1927_v58, %v1906_v39  ;;  %2382 = vmatprep.subr.mxu1 %v4514_v45 }
 0x5e1   :  { %v1881_v51 = vpop.permute.xlu1 %1880  ;;  %2383 = vmatpush1.msra.mxu1 %v4513_v6 }
 0x5e2   :  { %v1975_v24 = vmul.f32 %v6047_v7, %v1954_v21  ;;  %v1995_v49 = vadd.f32 %v6055_v28, %v1974_v18  ;;  %v1907_v38 = vadd.f32 %v1881_v51, %v5901_v48 }
 0x5e4   :  { %2018 = vrot.lane.b32.xlu0 %v1995_v49, %s5458_s24  ;;  %v6122_v40 = vadd.f32 %v6055_v28, %v1975_v24 }
 0x5e5   :  { %v1929_v8 = vpop.permute.xlu1 %1928 }
 0x5e6   :  { %v1955_v34 = vadd.f32 %v1929_v8, %v1907_v38  ;;  %2044 = vrot.lane.b32.xlu1 %v6122_v40, %s5456_s23 }
 0x5e7   :  { %v1883_v46 = vpop.permute.xlu0 %1882 }
 0x5e8   :  { %v1976_v9 = vmul.f32 %v6047_v7, %v1955_v34  ;;  %2020 = vrot.lane.b32.xlu0 %v6122_v40, %s5458_s24  ;;  %v1908_v48 = vadd.f32 %v1883_v46, %v5858_v19 }
 0x5ea   :  { %v6130_v11 = vadd.f32 %v6055_v28, %v1976_v9 }
 0x5eb   :  { %v1931_v12 = vpop.permute.xlu0 %1930  ;;  %v1885_v14 = vpop.permute.xlu1 %1884 }
 0x5ec   :  { %v1956_v44 = vadd.f32 %v1931_v12, %v1908_v48  ;;  %2022 = vrot.lane.b32.xlu0 %v6130_v11, %s5458_s24  ;;  %2046 = vrot.lane.b32.xlu1 %v6130_v11, %s5456_s23  ;;  %v1909_v17 = vadd.f32 %v1885_v14, %v5861_v23 }
 0x5ee   :  { %v1977_v15 = vmul.f32 %v6047_v7, %v1956_v44 }
 0x5ef   :  { %v1933_v27 = vpop.permute.xlu1 %1932 }
 0x5f0   :  { %v6140_v60 = vadd.f32 %v6055_v28, %v1977_v15  ;;  %v1957_v20 = vadd.f32 %v1933_v27, %v1909_v17  ;;  %v4512_v15 = vld [vmem:[%s6697_s6 + $0x58] sm:$0xff]  ;;  %v4511_v17 = vld [vmem:[%s6697_s6 + $0x50] sm:$0xff]  ;;  %v4510_v27 = vld [vmem:[%s6697_s6 + $0x48] sm:$0xff] }
 0x5f1   :  { %2384 = vmatprep.subr.mxu1 %v4512_v15 }
 0x5f2   :  { %v1978_v19 = vmul.f32 %v6047_v7, %v1957_v20  ;;  %2048 = vrot.lane.b32.xlu1 %v6140_v60, %s5456_s23  ;;  %2385 = vmatpush1.msra.mxu1 %v4511_v17  ;;  %v4509_v20 = vld [vmem:[%s6697_s6 + $0x40] sm:$0xff] }
 0x5f3   :  { %2386 = vmatprep.subr.mxu1 %v4510_v27 }
 0x5f4   :  { %v6146_v55 = vadd.f32 %v6055_v28, %v1978_v19  ;;  %2387 = vmatpush1.msra.mxu1 %v4509_v20 }
 0x5f5   :  { %4972 = vmatprep.subr.mxu1 %v5455_v10 }
 0x5f6   :  { %2050 = vrot.lane.b32.xlu1 %v6146_v55, %s5456_s23 }
 0x638   :  { %v2009_v22 = vpop.permute.xlu0 %2008 }
 0x63c   :  { %v2011_v16 = vpop.permute.xlu0 %2010 }
 0x640   :  { %v2037_v26 = vpop.permute.xlu1 %2036  ;;  %v2013_v7 = vpop.permute.xlu0 %2012 }
 0x641   :  { %v2060_v13 = vsel %vm359_vm1, %v2009_v22, %v2037_v26 }
 0x642   :  { %4939 = vmatprep.mubr.msk.f32.mxu0 %vm387_vm2, %v2060_v13 }
 0x644   :  { %v2039_v52 = vpop.permute.xlu1 %2038  ;;  %v2015_v56 = vpop.permute.xlu0 %2014 }
 0x645   :  { %v2061_v53 = vsel %vm359_vm1, %v2011_v16, %v2039_v52 }
 0x646   :  { %4940 = vmatmul.mubr.msk.f32.vlgmr.msra.gmra.mxu0 %vm387_vm2, %v2061_v53 }
 0x648   :  { %v2041_v54 = vpop.permute.xlu1 %2040 }
 0x649   :  { %v2062_v28 = vsel %vm359_vm1, %v2013_v7, %v2041_v54 }
 0x64a   :  { %4942 = vmatprep.mubr.msk.f32.mxu0 %vm387_vm2, %v2062_v28 }
 0x64c   :  { %v2043_v5 = vpop.permute.xlu1 %2042 }
 0x64d   :  { %v2063_v58 = vsel %vm359_vm1, %v2015_v56, %v2043_v5 }
 0x64e   :  { %4943 = vmatmul.mubr.msk.f32.gmra.mxu0 %vm387_vm2, %v2063_v58 }
 0x650   :  { %v2017_v59 = vpop.permute.xlu0 %2016 }
 0x656   :  { %v2019_v43 = vpop.permute.xlu0 %2018 }
 0x658   :  { %v2045_v61 = vpop.permute.xlu1 %2044 }
 0x659   :  { %v2064_v62 = vsel %vm359_vm1, %v2017_v59, %v2045_v61 }
 0x65a   :  { %4945 = vmatprep.mubr.msk.f32.mxu0 %vm387_vm2, %v2064_v62  ;;  %v2021_v32 = vpop.permute.xlu0 %2020 }
 0x65e   :  { %v2047_v63 = vpop.permute.xlu1 %2046  ;;  %v2023_v25 = vpop.permute.xlu0 %2022 }
 0x65f   :  { %v2065_v0 = vsel %vm359_vm1, %v2019_v43, %v2047_v63 }
 0x660   :  { %4946 = vmatmul.mubr.msk.f32.gmra.mxu0 %vm387_vm2, %v2065_v0 }
 0x664   :  { %v2049_v47 = vpop.permute.xlu1 %2048 }
 0x665   :  { %v2066_v2 = vsel %vm359_vm1, %v2021_v32, %v2049_v47 }
 0x666   :  { %4948 = vmatprep.mubr.msk.f32.mxu0 %vm387_vm2, %v2066_v2 }
 0x668   :  { %v2051_v29 = vpop.permute.xlu1 %2050 }
 0x669   :  { %v2067_v3 = vsel %vm359_vm1, %v2023_v25, %v2051_v29 }
 0x66a   :  { %4949 = vmatmul.mubr.msk.f32.gmra.mxu0 %vm387_vm2, %v2067_v3 }
 0x66b   :  { %4955 = vmatprep.mubr.msk.f32.mxu0 %vm5457_vm3, %v5455_v10 }
 0x706   :  { %v4941_v37 = vpop.f32.mrf.mxu0 }
 0x707   :  { %v6180_v39 = vadd.f32 %v4941_v37, %v4492_v33 }
 0x708   :  { %v2175_v18 = vpop.f32.mrf.mxu0 }
 0x709   :  { %v4502_v21 = vmul.f32 -1.442695, %v6180_v39  ;;  %v6183_v51 = vadd.f32 %v4492_v33, %v2175_v18 }
 0x70b   :  { %5221 = vpow2.f32 %v4502_v21  ;;  %v4501_v24 = vmul.f32 -1.442695, %v6183_v51 }
 0x70d   :  { %5223 = vpow2.f32 %v4501_v24 }
 0x70e   :  { %v4944_v49 = vpop.f32.mrf.mxu0 }
 0x70f   :  { %v6186_v38 = vadd.f32 %v4944_v49, %v4492_v33 }
 0x710   :  { %v2185_v8 = vpop.f32.mrf.mxu0 }
 0x711   :  { %v4504_v34 = vmul.f32 -1.442695, %v6186_v38  ;;  %v6189_v46 = vadd.f32 %v4492_v33, %v2185_v8 }
 0x713   :  { %5225 = vpow2.f32 %v4504_v34  ;;  %v4503_v9 = vmul.f32 -1.442695, %v6189_v46 }
 0x715   :  { %5227 = vpow2.f32 %v4503_v9 }
 0x718   :  { %v5222_v48 = vpop.eup %5221 }
 0x719   :  { %v2247_v12 = vadd.f32 1.0, %v5222_v48 }
 0x71a   :  { %v5224_v14 = vpop.eup %5223 }
 0x71b   :  { %5229 = vrcp.f32 %v2247_v12  ;;  %v2246_v44 = vadd.f32 1.0, %v5224_v14 }
 0x71d   :  { %5231 = vrcp.f32 %v2246_v44 }
 0x720   :  { %v5226_v19 = vpop.eup %5225  ;;  %v4947_v22 = vpop.f32.mrf.mxu0 }
 0x721   :  { %v2249_v16 = vadd.f32 1.0, %v5226_v19  ;;  %v6204_v26 = vadd.f32 %v4947_v22, %v4492_v33 }
 0x722   :  { %v5228_v13 = vpop.eup %5227  ;;  %v2195_v52 = vpop.f32.mrf.mxu0 }
 0x723   :  { %5233 = vrcp.f32 %v2249_v16  ;;  %v2248_v53 = vadd.f32 1.0, %v5228_v13  ;;  %v4506_v7 = vmul.f32 -1.442695, %v6204_v26  ;;  %v6208_v54 = vadd.f32 %v4492_v33, %v2195_v52 }
 0x725   :  { %5235 = vrcp.f32 %v2248_v53  ;;  %v4505_v28 = vmul.f32 -1.442695, %v6208_v54  ;;  %v2320_v53 = vld [vmem:[#allocation7 + $0x2] sm:$0x3] }
 0x726   :  { %5237 = vpow2.f32 %v4506_v7  ;;  %v2329_v7 = vrot.slane %v2320_v53, %v5843_v42 }
 0x727   :  { %5239 = vpow2.f32 %v4505_v28 }
 0x728   :  { %v5230_v56 = vpop.eup %5229 }
 0x729   :  { %2280 = vrot.lane.b32.xlu1 %v5230_v56, %s5456_s23 }
 0x72a   :  { %v5232_v5 = vpop.eup %5231  ;;  %v4950_v58 = vpop.f32.mrf.mxu0 }
 0x72b   :  { %v2211_v59 = vadd.f32 %v4950_v58, %v4492_v33  ;;  %2278 = vrot.lane.b32.xlu0 %v5232_v5, %s5456_s23 }
 0x72c   :  { %v2205_v61 = vpop.f32.mrf.mxu0 }
 0x72d   :  { %v4508_v62 = vmul.f32 -1.442695, %v2211_v59  ;;  %v2206_v43 = vadd.f32 %v4492_v33, %v2205_v61 }
 0x72f   :  { %5241 = vpow2.f32 %v4508_v62  ;;  %v4507_v63 = vmul.f32 -1.442695, %v2206_v43 }
 0x730   :  { %v5234_v0 = vpop.eup %5233 }
 0x731   :  { %5243 = vpow2.f32 %v4507_v63  ;;  %2284 = vrot.lane.b32.xlu1 %v5234_v0, %s5456_s23 }
 0x732   :  { %v5236_v32 = vpop.eup %5235 }
 0x733   :  { %v5238_v47 = vpop.eup %5237  ;;  %2282 = vrot.lane.b32.xlu0 %v5236_v32, %s5456_s23 }
 0x734   :  { %v2251_v2 = vadd.f32 1.0, %v5238_v47  ;;  %v5240_v25 = vpop.eup %5239  ;;  %v2325_v47 = vrot.slane %v2320_v53, %v5854_v50 }
 0x735   :  { %v2250_v29 = vadd.f32 1.0, %v5240_v25 }
 0x736   :  { %5245 = vrcp.f32 %v2251_v2 }
 0x737   :  { %5247 = vrcp.f32 %v2250_v29 }
 0x73c   :  { %v5242_v3 = vpop.eup %5241 }
 0x73d   :  { %v2253_v41 = vadd.f32 1.0, %v5242_v3 }
 0x73e   :  { %v5244_v4 = vpop.eup %5243 }
 0x73f   :  { %5249 = vrcp.f32 %v2253_v41  ;;  %v2252_v45 = vadd.f32 1.0, %v5244_v4 }
 0x741   :  { %5251 = vrcp.f32 %v2252_v45 }
 0x742   :  { %5253 = vtanh.f32 %v6183_v51 }
 0x743   :  { %v5246_v6 = vpop.eup %5245  ;;  %5255 = vtanh.f32 %v6180_v39 }
 0x744   :  { %2288 = vrot.lane.b32.xlu1 %v5246_v6, %s5456_s23  ;;  %v5248_v33 = vpop.eup %5247  ;;  %5257 = vtanh.f32 %v6189_v46 }
 0x745   :  { %2286 = vrot.lane.b32.xlu0 %v5248_v33, %s5456_s23  ;;  %5259 = vtanh.f32 %v6186_v38 }
 0x746   :  { %5261 = vtanh.f32 %v6208_v54 }
 0x747   :  { %5263 = vtanh.f32 %v6204_v26 }
 0x748   :  { %5265 = vtanh.f32 %v2206_v43 }
 0x749   :  { %5267 = vtanh.f32 %v2211_v59 }
 0x74c   :  { %v5250_v37 = vpop.eup %5249 }
 0x74d   :  { %2292 = vrot.lane.b32.xlu1 %v5250_v37, %s5456_s23 }
 0x74e   :  { %v5252_v18 = vpop.eup %5251 }
 0x74f   :  { %2290 = vrot.lane.b32.xlu0 %v5252_v18, %s5456_s23  ;;  %v5254_v21 = vpop.eup %5253 }
 0x750   :  { %v5256_v34 = vpop.eup %5255 }
 0x751   :  { %v5258_v48 = vpop.eup %5257 }
 0x752   :  { %v5260_v38 = vpop.eup %5259 }
 0x753   :  { %v5262_v14 = vpop.eup %5261 }
 0x754   :  { %v5264_v27 = vpop.eup %5263 }
 0x755   :  { %v5266_v19 = vpop.eup %5265 }
 0x756   :  { %v5268_v13 = vpop.eup %5267 }
 0x79b   :  { %v2281_v8 = vpop.permute.xlu1 %2280 }
 0x79c   :  { %v2303_v9 = vmul.f32 %v5256_v34, %v2281_v8 }
 0x79d   :  { %v2279_v24 = vpop.permute.xlu0 %2278 }
 0x79e   :  { %v2302_v49 = vmul.f32 %v5254_v21, %v2279_v24 }
 0x7a0   :  { %4517 = vmatmul.mubr.msk.f32.vlgmr.msra.gmra.mxu1 %vm359_vm1, %v2302_v49 }
 0x7a1   :  { %2426 = vmatprep.mubr.f32.mxu1 %v5455_v10 }
 0x7a3   :  { %v2285_v46 = vpop.permute.xlu1 %2284 }
 0x7a4   :  { %4518 = vmatmul.mubr.msk.f32.gmra.mxu1 %vm359_vm1, %v2303_v9  ;;  %v2305_v12 = vmul.f32 %v5260_v38, %v2285_v46 }
 0x7a5   :  { %v2283_v51 = vpop.permute.xlu0 %2282  ;;  %2432 = vmatprep.mubr.f32.mxu1 %v5455_v10 }
 0x7a6   :  { %v2304_v39 = vmul.f32 %v5258_v48, %v2283_v51 }
 0x7a8   :  { %4519 = vmatmul.mubr.msk.f32.gmra.mxu1 %vm359_vm1, %v2304_v39 }
 0x7a9   :  { %2438 = vmatprep.mubr.f32.mxu1 %v5455_v10 }
 0x7ac   :  { %4520 = vmatmul.mubr.msk.f32.gmra.mxu1 %vm359_vm1, %v2305_v12 }
 0x7ad   :  { %2444 = vmatprep.mubr.f32.mxu1 %v5455_v10 }
 0x7b6   :  { %v2289_v17 = vpop.permute.xlu1 %2288 }
 0x7b7   :  { %v2287_v44 = vpop.permute.xlu0 %2286  ;;  %v2307_v20 = vmul.f32 %v5264_v27, %v2289_v17 }
 0x7b8   :  { %v2306_v15 = vmul.f32 %v5262_v14, %v2287_v44 }
 0x7ba   :  { %4521 = vmatmul.mubr.msk.f32.gmra.mxu1 %vm359_vm1, %v2306_v15 }
 0x7bb   :  { %2450 = vmatprep.mubr.f32.mxu1 %v5455_v10 }
 0x7be   :  { %4522 = vmatmul.mubr.msk.f32.gmra.mxu1 %vm359_vm1, %v2307_v20 }
 0x7bf   :  { %2456 = vmatprep.mubr.f32.mxu1 %v5455_v10  ;;  %v2293_v26 = vpop.permute.xlu1 %2292 }
 0x7c0   :  { %v2309_v52 = vmul.f32 %v5268_v13, %v2293_v26 }
 0x7c1   :  { %v2291_v22 = vpop.permute.xlu0 %2290 }
 0x7c2   :  { %v2308_v16 = vmul.f32 %v5266_v19, %v2291_v22 }
 0x7c4   :  { %4523 = vmatmul.mubr.msk.f32.gmra.mxu1 %vm359_vm1, %v2308_v16 }
 0x7c5   :  { %2462 = vmatprep.mubr.f32.mxu1 %v5455_v10 }
 0x7c8   :  { %4524 = vmatmul.mubr.msk.f32.gmra.mxu1 %vm359_vm1, %v2309_v52 }
 0x7c9   :  { %4976 = vmatprep.mubr.msk.f32.mxu1 %vm5457_vm3, %v5455_v10 }
 0x860   :  { %v2422_v54 = vpop.f32.mrf.mxu1 }
 0x861   :  { %v6260_v9 = vadd.f32 %v2422_v54, %v2325_v47 }
 0x862   :  { %v2424_v28 = vpop.f32.mrf.mxu1 }
 0x863   :  { %v2425_v56 = vadd.f32 %v2424_v28, %v2329_v7 }
 0x864   :  { %v2428_v5 = vpop.f32.mrf.mxu1 }
 0x865   :  { %2479 = vrot.lane.b32.xlu0 %v2425_v56, %s5456_s23  ;;  %v6264_v48 = vadd.f32 %v2428_v5, %v2325_v47 }
 0x866   :  { %v2430_v58 = vpop.f32.mrf.mxu1 }
 0x867   :  { %v2431_v59 = vadd.f32 %v2430_v58, %v2329_v7 }
 0x868   :  { %v2434_v61 = vpop.f32.mrf.mxu1 }
 0x869   :  { %2481 = vrot.lane.b32.xlu1 %v2431_v59, %s5456_s23  ;;  %v6268_v51 = vadd.f32 %v2434_v61, %v2325_v47 }
 0x86a   :  { %v2436_v62 = vpop.f32.mrf.mxu1 }
 0x86b   :  { %v2437_v43 = vadd.f32 %v2436_v62, %v2329_v7 }
 0x86c   :  { %v2440_v63 = vpop.f32.mrf.mxu1 }
 0x86d   :  { %2483 = vrot.lane.b32.xlu0 %v2437_v43, %s5456_s23  ;;  %v6272_v39 = vadd.f32 %v2440_v63, %v2325_v47 }
 0x86e   :  { %v2442_v0 = vpop.f32.mrf.mxu1 }
 0x86f   :  { %v2443_v32 = vadd.f32 %v2442_v0, %v2329_v7 }
 0x871   :  { %2485 = vrot.lane.b32.xlu1 %v2443_v32, %s5456_s23  ;;  %v4534_v32 = vld [vmem:[%s6699_s8 + $0x1] ss:$0 sm:$0xff] }
 0x87a   :  { %v2446_v2 = vpop.f32.mrf.mxu1 }
 0x87b   :  { %v6248_v25 = vadd.f32 %v2446_v2, %v2325_v47  ;;  %v4536_v2 = vld [vmem:[%s6700_s9 + $0x1] ss:$0 sm:$0xff] }
 0x87c   :  { %v2448_v29 = vpop.f32.mrf.mxu1 }
 0x87d   :  { %v2449_v3 = vadd.f32 %v2448_v29, %v2329_v7 }
 0x87e   :  { %v2452_v41 = vpop.f32.mrf.mxu1 }
 0x87f   :  { %v6250_v4 = vadd.f32 %v2452_v41, %v2325_v47  ;;  %2487 = vrot.lane.b32.xlu0 %v2449_v3, %s5456_s23 }
 0x880   :  { %v2454_v45 = vpop.f32.mrf.mxu1 }
 0x881   :  { %v2455_v6 = vadd.f32 %v2454_v45, %v2329_v7 }
 0x883   :  { %2489 = vrot.lane.b32.xlu1 %v2455_v6, %s5456_s23 }
 0x884   :  { %v2458_v33 = vpop.f32.mrf.mxu1 }
 0x885   :  { %v6254_v37 = vadd.f32 %v2458_v33, %v2325_v47 }
 0x886   :  { %v2460_v18 = vpop.f32.mrf.mxu1 }
 0x887   :  { %v2461_v21 = vadd.f32 %v2460_v18, %v2329_v7 }
 0x888   :  { %v2464_v24 = vpop.f32.mrf.mxu1 }
 0x889   :  { %v6256_v49 = vadd.f32 %v2464_v24, %v2325_v47  ;;  %2491 = vrot.lane.b32.xlu0 %v2461_v21, %s5456_s23  ;;  %v4544_v24 = vld [vmem:[%s6695_s4 + $0xb8] sm:$0xff] }
 0x88a   :  { %v2466_v8 = vpop.f32.mrf.mxu1 }
 0x88b   :  { %v2467_v34 = vadd.f32 %v2466_v8, %v2329_v7  ;;  %v6314_v7 = vld [vmem:[%s6694_s3] sm:$0xff]  ;;  %v4543_v8 = vld [vmem:[%s6695_s4 + $0xb0] sm:$0xff] }
 0x88d   :  { %2493 = vrot.lane.b32.xlu1 %v2467_v34, %s5456_s23 }
 0x891   :  { %2496 = vrot.lane.b32.xlu1 %v6260_v9, %s5452_s11 }
 0x895   :  { %2573 = vrot.lane.b32.xlu1 %v6264_v48, %s5452_s11 }
 0x899   :  { %2650 = vrot.lane.b32.xlu1 %v6268_v51, %s5452_s11 }
 0x89d   :  { %2727 = vrot.lane.b32.xlu1 %v6272_v39, %s5452_s11 }
 0x8d7   :  { %v2480_v46 = vpop.permute.xlu0 %2479 }
 0x8d8   :  { %2498 = vrot.lane.b32.xlu0 %v2480_v46, %s5452_s11  ;;  %v4542_v46 = vld [vmem:[%s6695_s4 + $0xa8] sm:$0xff] }
 0x8db   :  { %v2482_v38 = vpop.permute.xlu1 %2481 }
 0x8dc   :  { %2575 = vrot.lane.b32.xlu0 %v2482_v38, %s5452_s11 }
 0x8df   :  { %v2484_v12 = vpop.permute.xlu0 %2483 }
 0x8e0   :  { %2652 = vrot.lane.b32.xlu0 %v2484_v12, %s5452_s11  ;;  %v4541_v12 = vld [vmem:[%s6695_s4 + $0xa0] sm:$0xff] }
 0x8e3   :  { %v2486_v14 = vpop.permute.xlu1 %2485 }
 0x8e4   :  { %2729 = vrot.lane.b32.xlu0 %v2486_v14, %s5452_s11 }
 0x8f1   :  { %v2488_v44 = vpop.permute.xlu0 %2487 }
 0x8f2   :  { %2806 = vrot.lane.b32.xlu0 %v2488_v44, %s5452_s11  ;;  %v4540_v44 = vld [vmem:[%s6695_s4 + $0x98] sm:$0xff] }
 0x8f5   :  { %v2490_v15 = vpop.permute.xlu1 %2489 }
 0x8f6   :  { %2804 = vrot.lane.b32.xlu0 %v6248_v25, %s5452_s11  ;;  %2883 = vrot.lane.b32.xlu1 %v2490_v15, %s5452_s11  ;;  %v4539_v15 = vld [vmem:[%s6695_s4 + $0x90] sm:$0xff] }
 0x8fa   :  { %2881 = vrot.lane.b32.xlu1 %v6250_v4, %s5452_s11 }
 0x8fb   :  { %v2492_v17 = vpop.permute.xlu0 %2491 }
 0x8fc   :  { %2960 = vrot.lane.b32.xlu0 %v2492_v17, %s5452_s11 }
 0x8ff   :  { %v2494_v27 = vpop.permute.xlu1 %2493 }
 0x900   :  { %2958 = vrot.lane.b32.xlu0 %v6254_v37, %s5452_s11  ;;  %3037 = vrot.lane.b32.xlu1 %v2494_v27, %s5452_s11  ;;  %v4538_v27 = vld [vmem:[%s6695_s4 + $0x88] sm:$0xff] }
 0x903   :  { %v2497_v20 = vpop.permute.xlu1 %2496 }
 0x904   :  { %3035 = vrot.lane.b32.xlu1 %v6256_v49, %s5452_s11 }
 0x907   :  { %v2574_v22 = vpop.permute.xlu1 %2573 }
 0x90b   :  { %v2651_v26 = vpop.permute.xlu1 %2650 }
 0x90f   :  { %v2728_v53 = vpop.permute.xlu1 %2727 }
 0x94a   :  { %v2499_v19 = vpop.permute.xlu0 %2498 }
 0x94b   :  { %4952 = vmatpush3.msra.mxu0 %v2499_v19 }
 0x94c   :  { %4953 = vmatprep.subr.mxu0 %v5455_v10 }
 0x94d   :  { %4954 = vmatpush3.msra.mxu0 %v2497_v20  ;;  %v4537_v20 = vld [vmem:[%s6695_s4 + $0x80] sm:$0xff] }
 0x94e   :  { %v2576_v16 = vpop.permute.xlu0 %2575  ;;  %4956 = vmatmul.mubr.msk.f32.vlgmr.msra.gmra.mxu0 %vm929_vm4, %v5948_v35  ;;  %4958 = vmatprep.subr.mxu0 %v5455_v10 }
 0x94f   :  { %4959 = vmatpush3.msra.mxu0 %v2576_v16  ;;  %4962 = vmatprep.mubr.msk.f32.mxu0 %vm5457_vm3, %v5455_v10 }
 0x950   :  { %4960 = vmatprep.subr.mxu0 %v5455_v10 }
 0x951   :  { %4961 = vmatpush3.msra.mxu0 %v2574_v22 }
 0x952   :  { %v2653_v13 = vpop.permute.xlu0 %2652  ;;  %4963 = vmatmul.mubr.msk.f32.vlgmr.msra.gmra.mxu0 %vm929_vm4, %v5948_v35  ;;  %4965 = vmatprep.subr.mxu0 %v5455_v10 }
 0x953   :  { %4966 = vmatpush3.msra.mxu0 %v2653_v13  ;;  %4969 = vmatprep.mubr.msk.f32.mxu0 %vm5457_vm3, %v5455_v10 }
 0x954   :  { %4967 = vmatprep.subr.mxu0 %v5455_v10 }
 0x955   :  { %4968 = vmatpush3.msra.mxu0 %v2651_v26 }
 0x956   :  { %v2730_v52 = vpop.permute.xlu0 %2729  ;;  %4970 = vmatmul.mubr.msk.f32.vlgmr.msra.gmra.mxu0 %vm929_vm4, %v5948_v35  ;;  %4979 = vmatprep.subr.mxu0 %v5455_v10 }
 0x957   :  { %4973 = vmatpush3.msra.mxu1 %v2730_v52  ;;  %4983 = vmatprep.mubr.msk.f32.mxu0 %vm5457_vm3, %v5455_v10 }
 0x958   :  { %4974 = vmatprep.subr.mxu1 %v5455_v10 }
 0x959   :  { %4975 = vmatpush3.msra.mxu1 %v2728_v53 }
 0x95a   :  { %4977 = vmatmul.mubr.msk.f32.vlgmr.msra.gmra.mxu1 %vm929_vm4, %v6314_v7  ;;  %4986 = vmatprep.subr.mxu1 %v5455_v10 }
 0x95b   :  { %4990 = vmatprep.mubr.msk.f32.mxu1 %vm5457_vm3, %v5455_v10 }
 0x964   :  { %v2807_v35 = vpop.permute.xlu0 %2806 }
 0x965   :  { %4980 = vmatpush3.msra.mxu0 %v2807_v35 }
 0x966   :  { %4981 = vmatprep.subr.mxu0 %v5455_v10 }
 0x968   :  { %v2805_v54 = vpop.permute.xlu0 %2804  ;;  %v2884_v28 = vpop.permute.xlu1 %2883 }
 0x969   :  { %4982 = vmatpush3.msra.mxu0 %v2805_v54  ;;  %4987 = vmatpush3.msra.mxu1 %v2884_v28 }
 0x96a   :  { %4984 = vmatmul.mubr.msk.f32.vlgmr.msra.gmra.mxu0 %vm929_vm4, %v6314_v7  ;;  %4988 = vmatprep.subr.mxu1 %v5455_v10 }
 0x96b   :  { %4993 = vmatprep.subr.mxu0 %v5455_v10  ;;  %4997 = vmatprep.mubr.msk.f32.mxu0 %vm5457_vm3, %v5455_v10 }
 0x96c   :  { %v2882_v56 = vpop.permute.xlu1 %2881 }
 0x96d   :  { %4989 = vmatpush3.msra.mxu1 %v2882_v56 }
 0x96e   :  { %v2961_v5 = vpop.permute.xlu0 %2960  ;;  %4991 = vmatmul.mubr.msk.f32.vlgmr.msra.gmra.mxu1 %vm929_vm4, %v6314_v7  ;;  %5000 = vmatprep.subr.mxu1 %v5455_v10 }
 0x96f   :  { %4994 = vmatpush3.msra.mxu0 %v2961_v5  ;;  %5004 = vmatprep.mubr.msk.f32.mxu1 %vm5457_vm3, %v5455_v10 }
 0x970   :  { %4995 = vmatprep.subr.mxu0 %v5455_v10 }
 0x972   :  { %v2959_v58 = vpop.permute.xlu0 %2958  ;;  %v3038_v59 = vpop.permute.xlu1 %3037 }
 0x973   :  { %4996 = vmatpush3.msra.mxu0 %v2959_v58  ;;  %5001 = vmatpush3.msra.mxu1 %v3038_v59 }
 0x974   :  { %4998 = vmatmul.mubr.msk.f32.vlgmr.msra.gmra.mxu0 %vm929_vm4, %v6314_v7  ;;  %5002 = vmatprep.subr.mxu1 %v5455_v10 }
 0x975   :  { %5007 = vmatprep.subr.mxu0 %v4544_v24 }
 0x976   :  { %v3036_v61 = vpop.permute.xlu1 %3035  ;;  %5008 = vmatpush3.msra.mxu0 %v4544_v24 }
 0x977   :  { %5003 = vmatpush3.msra.mxu1 %v3036_v61  ;;  %5009 = vmatprep.subr.mxu0 %v4543_v8 }
 0x978   :  { %5005 = vmatmul.mubr.msk.f32.vlgmr.msra.gmra.mxu1 %vm929_vm4, %v6314_v7  ;;  %5010 = vmatpush3.msra.mxu0 %v4543_v8 }
 0x979   :  { %3551 = vmatprep.mubr.f32.mxu1 %v5455_v10  ;;  %5011 = vmatprep.subr.mxu0 %v4542_v46 }
 0x97a   :  { %5012 = vmatpush3.msra.mxu0 %v4542_v46 }
 0x97b   :  { %5013 = vmatprep.subr.mxu0 %v4541_v12 }
 0x97c   :  { %5014 = vmatpush3.msra.mxu0 %v4541_v12 }
 0x97d   :  { %5015 = vmatprep.subr.mxu0 %v4540_v44 }
 0x97e   :  { %5016 = vmatpush3.msra.mxu0 %v4540_v44 }
 0x97f   :  { %5017 = vmatprep.subr.mxu0 %v4539_v15 }
 0x980   :  { %5018 = vmatpush3.msra.mxu0 %v4539_v15 }
 0x981   :  { %5019 = vmatprep.subr.mxu0 %v4538_v27 }
 0x982   :  { %5020 = vmatpush3.msra.mxu0 %v4538_v27 }
 0x983   :  { %5021 = vmatprep.subr.mxu0 %v4537_v20 }
 0x984   :  { %5022 = vmatpush3.msra.mxu0 %v4537_v20 }
 0x985   :  { %5032 = vmatprep.subr.mxu0 %v5455_v10 }
 0xa0e   :  { %v2568_v62 = vpop.f32.mrf.mxu0 }
 0xa0f   :  { %3119 = vrot.lane.b32.xlu0 %v2568_v62, %s5458_s24 }
 0xa10   :  { %v4957_v43 = vpop.f32.mrf.mxu0 }
 0xa12   :  { %v2645_v63 = vpop.f32.mrf.mxu0 }
 0xa13   :  { %3121 = vrot.lane.b32.xlu1 %v2645_v63, %s5458_s24 }
 0xa14   :  { %v4964_v0 = vpop.f32.mrf.mxu0 }
 0xa16   :  { %v2722_v47 = vpop.f32.mrf.mxu0 }
 0xa17   :  { %3166 = vrot.lane.b32.xlu1 %v4534_v32, %s5458_s24  ;;  %3123 = vrot.lane.b32.xlu0 %v2722_v47, %s5458_s24 }
 0xa18   :  { %v4971_v29 = vpop.f32.mrf.mxu0 }
 0xa1a   :  { %v2799_v3 = vpop.f32.mrf.mxu1 }
 0xa1b   :  { %3184 = vrot.lane.b32.xlu0 %v4536_v2, %s5458_s24  ;;  %3125 = vrot.lane.b32.xlu1 %v2799_v3, %s5458_s24 }
 0xa1c   :  { %v4978_v41 = vpop.f32.mrf.mxu1 }
 0xa2a   :  { %v2876_v45 = vpop.f32.mrf.mxu0 }
 0xa2b   :  { %3127 = vrot.lane.b32.xlu0 %v2876_v45, %s5458_s24 }
 0xa2c   :  { %v4985_v6 = vpop.f32.mrf.mxu0 }
 0xa2e   :  { %v2953_v33 = vpop.f32.mrf.mxu1 }
 0xa2f   :  { %3129 = vrot.lane.b32.xlu1 %v2953_v33, %s5458_s24 }
 0xa30   :  { %v4992_v18 = vpop.f32.mrf.mxu1 }
 0xa34   :  { %v3030_v21 = vpop.f32.mrf.mxu0 }
 0xa35   :  { %3131 = vrot.lane.b32.xlu0 %v3030_v21, %s5458_s24 }
 0xa36   :  { %v4999_v34 = vpop.f32.mrf.mxu0 }
 0xa38   :  { %v3107_v38 = vpop.f32.mrf.mxu1 }
 0xa39   :  { %3133 = vrot.lane.b32.xlu1 %v3107_v38, %s5458_s24 }
 0xa3a   :  { %v5006_v14 = vpop.f32.mrf.mxu1 }
 0xa81   :  { %v3120_v17 = vpop.permute.xlu0 %3119 }
 0xa82   :  { %v3143_v22 = vadd.f32 %v3120_v17, %v6260_v9 }
 0xa84   :  { %v3151_v53 = vadd.f32 %v3143_v22, %v6082_v57 }
 0xa85   :  { %v3122_v19 = vpop.permute.xlu1 %3121 }
 0xa86   :  { %v3144_v16 = vadd.f32 %v3122_v19, %v6264_v48 }
 0xa88   :  { %v3152_v26 = vadd.f32 %v3144_v16, %v6091_v30 }
 0xa89   :  { %v3124_v13 = vpop.permute.xlu0 %3123  ;;  %v3167_v52 = vpop.permute.xlu1 %3166 }
 0xa8a   :  { %v3145_v35 = vadd.f32 %v3124_v13, %v6268_v51  ;;  %v3170_v28 = vmul.f32 %v3167_v52, %v3152_v26  ;;  %v3169_v56 = vmul.f32 %v3167_v52, %v3151_v53  ;;  %v4565_v26 = vld [vmem:[%s6697_s6 + $0xb8] sm:$0xff]  ;;  %v4564_v13 = vld [vmem:[%s6697_s6 + $0xb0] sm:$0xff]  ;;  %v4562_v53 = vld [vmem:[%s6697_s6 + $0xa0] sm:$0xff] }
 0xa8b   :  { %3511 = vmatprep.subr.mxu1 %v4565_v26 }
 0xa8c   :  { %v3153_v54 = vadd.f32 %v3145_v35, %v6100_v1  ;;  %3512 = vmatpush1.msra.mxu1 %v4564_v13  ;;  %v4545_v35 = vld [vmem:[#allocation5 + $0x2] ss:$0 sm:$0xff] }
 0xa8d   :  { %v3185_v5 = vpop.permute.xlu0 %3184  ;;  %v3126_v9 = vpop.permute.xlu1 %3125 }
 0xa8e   :  { %v3146_v48 = vadd.f32 %v3126_v9, %v6272_v39  ;;  %v6388_v58 = vadd.f32 %v3185_v5, %v3170_v28  ;;  %v3187_v59 = vadd.f32 %v3185_v5, %v3169_v56  ;;  %v3171_v30 = vmul.f32 %v3167_v52, %v3153_v54 }
 0xa90   :  { %v3154_v61 = vadd.f32 %v3146_v48, %v6107_v31  ;;  %3221 = vrot.lane.b32.xlu1 %v6388_v58, %s5456_s23  ;;  %3201 = vrot.lane.b32.xlu0 %v3187_v59, %s5458_s24  ;;  %v3189_v51 = vadd.f32 %v3185_v5, %v3171_v30 }
 0xa92   :  { %v3172_v57 = vmul.f32 %v3167_v52, %v3154_v61 }
 0xa94   :  { %3223 = vrot.lane.b32.xlu1 %v3189_v51, %s5456_s23  ;;  %3203 = vrot.lane.b32.xlu0 %v6388_v58, %s5458_s24  ;;  %v6397_v1 = vadd.f32 %v3185_v5, %v3172_v57 }
 0xa98   :  { %3205 = vrot.lane.b32.xlu0 %v3189_v51, %s5458_s24  ;;  %3225 = vrot.lane.b32.xlu1 %v6397_v1, %s5456_s23  ;;  %v4561_v51 = vld [vmem:[%s6697_s6 + $0x98] sm:$0xff] }
 0xa9d   :  { %v3128_v31 = vpop.permute.xlu0 %3127 }
 0xa9e   :  { %v3147_v62 = vadd.f32 %v3128_v31, %v6248_v25  ;;  %v4560_v31 = vld [vmem:[%s6697_s6 + $0x90] sm:$0xff] }
 0xaa0   :  { %v3155_v43 = vadd.f32 %v3147_v62, %v6122_v40 }
 0xaa1   :  { %v3130_v63 = vpop.permute.xlu1 %3129 }
 0xaa2   :  { %v3173_v0 = vmul.f32 %v3167_v52, %v3155_v43  ;;  %v3148_v32 = vadd.f32 %v3130_v63, %v6250_v4  ;;  %v4559_v63 = vld [vmem:[%s6697_s6 + $0x88] sm:$0xff] }
 0xaa4   :  { %v3191_v47 = vadd.f32 %v3185_v5, %v3173_v0  ;;  %v3156_v2 = vadd.f32 %v3148_v32, %v6130_v11  ;;  %v4558_v0 = vld [vmem:[%s6697_s6 + $0x80] sm:$0xff] }
 0xaa6   :  { %v3174_v29 = vmul.f32 %v3167_v52, %v3156_v2  ;;  %3207 = vrot.lane.b32.xlu0 %v3191_v47, %s5458_s24 }
 0xaa7   :  { %v3132_v3 = vpop.permute.xlu0 %3131 }
 0xaa8   :  { %v3149_v41 = vadd.f32 %v3132_v3, %v6254_v37  ;;  %v6408_v45 = vadd.f32 %v3185_v5, %v3174_v29 }
 0xaaa   :  { %v3157_v6 = vadd.f32 %v3149_v41, %v6140_v60  ;;  %3209 = vrot.lane.b32.xlu0 %v6408_v45, %s5458_s24  ;;  %3227 = vrot.lane.b32.xlu1 %v6408_v45, %s5456_s23 }
 0xaab   :  { %v3134_v40 = vpop.permute.xlu1 %3133 }
 0xaac   :  { %v3175_v25 = vmul.f32 %v3167_v52, %v3157_v6  ;;  %v3150_v11 = vadd.f32 %v3134_v40, %v6256_v49 }
 0xaae   :  { %v3193_v4 = vadd.f32 %v3185_v5, %v3175_v25  ;;  %v3158_v33 = vadd.f32 %v3150_v11, %v6146_v55 }
 0xab0   :  { %v3176_v18 = vmul.f32 %v3167_v52, %v3158_v33  ;;  %3211 = vrot.lane.b32.xlu0 %v3193_v4, %s5458_s24  ;;  %3229 = vrot.lane.b32.xlu1 %v3193_v4, %s5456_s23  ;;  %v4563_v52 = vld [vmem:[%s6697_s6 + $0xa8] sm:$0xff] }
 0xab1   :  { %3513 = vmatprep.subr.mxu1 %v4563_v52 }
 0xab2   :  { %v6419_v37 = vadd.f32 %v3185_v5, %v3176_v18  ;;  %3514 = vmatpush1.msra.mxu1 %v4562_v53 }
 0xab3   :  { %3515 = vmatprep.subr.mxu1 %v4561_v51 }
 0xab4   :  { %3231 = vrot.lane.b32.xlu1 %v6419_v37, %s5456_s23  ;;  %3516 = vmatpush1.msra.mxu1 %v4560_v31 }
 0xab5   :  { %3517 = vmatprep.subr.mxu1 %v4559_v63 }
 0xab6   :  { %3518 = vmatpush1.msra.mxu1 %v4558_v0 }
 0xb02   :  { %v3202_v60 = vpop.permute.xlu0 %3201  ;;  %v3222_v21 = vpop.permute.xlu1 %3221 }
 0xb03   :  { %v3239_v24 = vsel %vm359_vm1, %v3202_v60, %v3222_v21 }
 0xb04   :  { %5023 = vmatprep.mubr.msk.f32.mxu0 %vm387_vm2, %v3239_v24 }
 0xb06   :  { %v3204_v8 = vpop.permute.xlu0 %3203  ;;  %v3224_v34 = vpop.permute.xlu1 %3223 }
 0xb07   :  { %v3240_v55 = vsel %vm359_vm1, %v3204_v8, %v3224_v34 }
 0xb08   :  { %5024 = vmatmul.mubr.msk.f32.vlgmr.msra.gmra.mxu0 %vm387_vm2, %v3240_v55 }
 0xb0a   :  { %v3206_v46 = vpop.permute.xlu0 %3205  ;;  %v3226_v38 = vpop.permute.xlu1 %3225 }
 0xb0b   :  { %v3241_v12 = vsel %vm359_vm1, %v3206_v46, %v3226_v38 }
 0xb0c   :  { %5026 = vmatprep.mubr.msk.f32.mxu0 %vm387_vm2, %v3241_v12 }
 0xb18   :  { %v3208_v14 = vpop.permute.xlu0 %3207 }
 0xb1c   :  { %v3228_v44 = vpop.permute.xlu1 %3227  ;;  %v3210_v17 = vpop.permute.xlu0 %3209 }
 0xb1d   :  { %v3242_v15 = vsel %vm359_vm1, %v3208_v14, %v3228_v44 }
 0xb1e   :  { %5027 = vmatmul.mubr.msk.f32.gmra.mxu0 %vm387_vm2, %v3242_v15 }
 0xb22   :  { %v3230_v27 = vpop.permute.xlu1 %3229  ;;  %v3212_v19 = vpop.permute.xlu0 %3211 }
 0xb23   :  { %v3243_v20 = vsel %vm359_vm1, %v3210_v17, %v3230_v27 }
 0xb24   :  { %5029 = vmatprep.mubr.msk.f32.mxu0 %vm387_vm2, %v3243_v20 }
 0xb26   :  { %v3232_v22 = vpop.permute.xlu1 %3231 }
 0xb27   :  { %v3244_v16 = vsel %vm359_vm1, %v3212_v19, %v3232_v22 }
 0xb28   :  { %5030 = vmatmul.mubr.msk.f32.gmra.mxu0 %vm387_vm2, %v3244_v16 }
 0xb29   :  { %5036 = vmatprep.mubr.msk.f32.mxu0 %vm5457_vm3, %v5455_v10 }
 0xbc8   :  { %v5025_v54 = vpop.f32.mrf.mxu0 }
 0xbc9   :  { %v3352_v28 = vadd.f32 %v5025_v54, %v4545_v35 }
 0xbca   :  { %v3346_v56 = vpop.f32.mrf.mxu0 }
 0xbcb   :  { %v4553_v5 = vmul.f32 -1.442695, %v3352_v28  ;;  %v3347_v9 = vadd.f32 %v4545_v35, %v3346_v56 }
 0xbcd   :  { %5269 = vpow2.f32 %v4553_v5  ;;  %v4552_v48 = vmul.f32 -1.442695, %v3347_v9 }
 0xbcf   :  { %5271 = vpow2.f32 %v4552_v48 }
 0xbda   :  { %v5270_v59 = vpop.eup %5269 }
 0xbdb   :  { %v3400_v30 = vadd.f32 1.0, %v5270_v59  ;;  %v3457_v59 = vld [vmem:[#allocation7 + $0x4] sm:$0x3] }
 0xbdc   :  { %v5272_v61 = vpop.eup %5271 }
 0xbdd   :  { %5273 = vrcp.f32 %v3400_v30  ;;  %v3399_v57 = vadd.f32 1.0, %v5272_v61  ;;  %v3466_v30 = vrot.slane %v3457_v59, %v5843_v42 }
 0xbde   :  { %v5028_v62 = vpop.f32.mrf.mxu0 }
 0xbdf   :  { %5275 = vrcp.f32 %v3399_v57  ;;  %v3362_v43 = vadd.f32 %v5028_v62, %v4545_v35 }
 0xbe0   :  { %v3356_v32 = vpop.f32.mrf.mxu0 }
 0xbe1   :  { %v4555_v47 = vmul.f32 -1.442695, %v3362_v43  ;;  %v3357_v2 = vadd.f32 %v4545_v35, %v3356_v32 }
 0xbe3   :  { %5277 = vpow2.f32 %v4555_v47  ;;  %v4554_v29 = vmul.f32 -1.442695, %v3357_v2 }
 0xbe5   :  { %5279 = vpow2.f32 %v4554_v29 }
 0xbe8   :  { %v5031_v3 = vpop.f32.mrf.mxu0 }
 0xbe9   :  { %v3372_v41 = vadd.f32 %v5031_v3, %v4545_v35 }
 0xbea   :  { %v5274_v6 = vpop.eup %5273  ;;  %v3366_v40 = vpop.f32.mrf.mxu0 }
 0xbeb   :  { %v4557_v25 = vmul.f32 -1.442695, %v3372_v41  ;;  %v3367_v11 = vadd.f32 %v4545_v35, %v3366_v40  ;;  %3425 = vrot.lane.b32.xlu1 %v5274_v6, %s5456_s23  ;;  %v3462_v6 = vrot.slane %v3457_v59, %v5854_v50  ;;  %v4581_v59 = vld [vmem:[%s6695_s4 + $0xc8] sm:$0xff] }
 0xbec   :  { %v5276_v4 = vpop.eup %5275 }
 0xbed   :  { %5281 = vpow2.f32 %v4557_v25  ;;  %v4556_v33 = vmul.f32 -1.442695, %v3367_v11  ;;  %3423 = vrot.lane.b32.xlu0 %v5276_v4, %s5456_s23 }
 0xbef   :  { %5283 = vpow2.f32 %v4556_v33 }
 0xbf0   :  { %v5278_v18 = vpop.eup %5277 }
 0xbf1   :  { %v3402_v60 = vadd.f32 1.0, %v5278_v18 }
 0xbf2   :  { %v5280_v21 = vpop.eup %5279 }
 0xbf3   :  { %5285 = vrcp.f32 %v3402_v60  ;;  %v3401_v24 = vadd.f32 1.0, %v5280_v21 }
 0xbf5   :  { %5287 = vrcp.f32 %v3401_v24 }
 0xbfa   :  { %v5282_v8 = vpop.eup %5281 }
 0xbfb   :  { %v3404_v34 = vadd.f32 1.0, %v5282_v8 }
 0xbfc   :  { %v5284_v55 = vpop.eup %5283 }
 0xbfd   :  { %5289 = vrcp.f32 %v3404_v34  ;;  %v3403_v46 = vadd.f32 1.0, %v5284_v55 }
 0xbff   :  { %5291 = vrcp.f32 %v3403_v46 }
 0xc00   :  { %v5286_v38 = vpop.eup %5285  ;;  %5293 = vtanh.f32 %v3347_v9 }
 0xc01   :  { %3429 = vrot.lane.b32.xlu1 %v5286_v38, %s5456_s23  ;;  %5295 = vtanh.f32 %v3352_v28 }
 0xc02   :  { %v5288_v12 = vpop.eup %5287  ;;  %5297 = vtanh.f32 %v3357_v2 }
 0xc03   :  { %3427 = vrot.lane.b32.xlu0 %v5288_v12, %s5456_s23  ;;  %5299 = vtanh.f32 %v3362_v43 }
 0xc04   :  { %5301 = vtanh.f32 %v3367_v11 }
 0xc05   :  { %5303 = vtanh.f32 %v3372_v41 }
 0xc0a   :  { %v5290_v14 = vpop.eup %5289 }
 0xc0b   :  { %3433 = vrot.lane.b32.xlu1 %v5290_v14, %s5456_s23 }
 0xc0c   :  { %v5292_v44 = vpop.eup %5291 }
 0xc0d   :  { %3431 = vrot.lane.b32.xlu0 %v5292_v44, %s5456_s23  ;;  %v5294_v15 = vpop.eup %5293 }
 0xc0e   :  { %v5296_v19 = vpop.eup %5295 }
 0xc0f   :  { %v5298_v16 = vpop.eup %5297 }
 0xc10   :  { %v5300_v53 = vpop.eup %5299 }
 0xc11   :  { %v5302_v54 = vpop.eup %5301 }
 0xc12   :  { %v5304_v9 = vpop.eup %5303 }
 0xc5d   :  { %v3426_v20 = vpop.permute.xlu1 %3425 }
 0xc5e   :  { %v3442_v22 = vmul.f32 %v5296_v19, %v3426_v20 }
 0xc5f   :  { %v3424_v17 = vpop.permute.xlu0 %3423 }
 0xc60   :  { %v3441_v27 = vmul.f32 %v5294_v15, %v3424_v17 }
 0xc62   :  { %4566 = vmatmul.mubr.msk.f32.vlgmr.msra.gmra.mxu1 %vm359_vm1, %v3441_v27 }
 0xc63   :  { %3557 = vmatprep.mubr.f32.mxu1 %v5455_v10 }
 0xc66   :  { %4567 = vmatmul.mubr.msk.f32.gmra.mxu1 %vm359_vm1, %v3442_v22  ;;  %v4577_v22 = vld [vmem:[%s6699_s8 + $0x2] ss:$0 sm:$0xff] }
 0xc67   :  { %3561 = vmatprep.mubr.f32.mxu1 %v5455_v10 }
 0xc73   :  { %v3430_v52 = vpop.permute.xlu1 %3429 }
 0xc74   :  { %v3444_v35 = vmul.f32 %v5300_v53, %v3430_v52  ;;  %v4585_v52 = vld [vmem:[%s6695_s4 + $0xe8] sm:$0xff]  ;;  %v4579_v53 = vld [vmem:[%s6700_s9 + $0x2] ss:$0 sm:$0xff] }
 0xc75   :  { %v3428_v26 = vpop.permute.xlu0 %3427 }
 0xc76   :  { %v3443_v13 = vmul.f32 %v5298_v16, %v3428_v26  ;;  %v4586_v26 = vld [vmem:[%s6695_s4 + $0xf0] sm:$0xff] }
 0xc78   :  { %4568 = vmatmul.mubr.msk.f32.gmra.mxu1 %vm359_vm1, %v3443_v13 }
 0xc79   :  { %3567 = vmatprep.mubr.f32.mxu1 %v5455_v10 }
 0xc7c   :  { %4569 = vmatmul.mubr.msk.f32.gmra.mxu1 %vm359_vm1, %v3444_v35 }
 0xc7d   :  { %3573 = vmatprep.mubr.f32.mxu1 %v5455_v10  ;;  %v3434_v5 = vpop.permute.xlu1 %3433 }
 0xc7e   :  { %v3446_v48 = vmul.f32 %v5304_v9, %v3434_v5 }
 0xc7f   :  { %v3432_v28 = vpop.permute.xlu0 %3431 }
 0xc80   :  { %v3445_v56 = vmul.f32 %v5302_v54, %v3432_v28  ;;  %v4584_v54 = vld [vmem:[%s6695_s4 + $0xe0] sm:$0xff]  ;;  %v4583_v28 = vld [vmem:[%s6695_s4 + $0xd8] sm:$0xff] }
 0xc82   :  { %4570 = vmatmul.mubr.msk.f32.gmra.mxu1 %vm359_vm1, %v3445_v56  ;;  %v4582_v56 = vld [vmem:[%s6695_s4 + $0xd0] sm:$0xff] }
 0xc83   :  { %3577 = vmatprep.mubr.f32.mxu1 %v5455_v10 }
 0xc86   :  { %4571 = vmatmul.mubr.msk.f32.gmra.mxu1 %vm359_vm1, %v3446_v48 }
 0xd22   :  { %v3553_v61 = vpop.f32.mrf.mxu1 }
 0xd23   :  { %v6484_v25 = vadd.f32 %v3553_v61, %v3462_v6 }
 0xd24   :  { %v3555_v57 = vpop.f32.mrf.mxu1 }
 0xd25   :  { %v3556_v51 = vadd.f32 %v3555_v57, %v3466_v30 }
 0xd26   :  { %v3559_v31 = vpop.f32.mrf.mxu1 }
 0xd27   :  { %3590 = vrot.lane.b32.xlu0 %v3556_v51, %s5456_s23 }
 0xd28   :  { %v3560_v62 = vpop.f32.mrf.mxu1 }
 0xd38   :  { %v3563_v43 = vpop.f32.mrf.mxu1 }
 0xd39   :  { %v6488_v11 = vadd.f32 %v3563_v43, %v3462_v6 }
 0xd3a   :  { %v3565_v63 = vpop.f32.mrf.mxu1 }
 0xd3b   :  { %v3566_v0 = vadd.f32 %v3565_v63, %v3466_v30 }
 0xd3c   :  { %v3569_v32 = vpop.f32.mrf.mxu1 }
 0xd3d   :  { %3592 = vrot.lane.b32.xlu1 %v3566_v0, %s5456_s23  ;;  %v6492_v4 = vadd.f32 %v3569_v32, %v3462_v6 }
 0xd3e   :  { %v3571_v47 = vpop.f32.mrf.mxu1 }
 0xd3f   :  { %v3572_v2 = vadd.f32 %v3571_v47, %v3466_v30 }
 0xd41   :  { %3594 = vrot.lane.b32.xlu0 %v3572_v2, %s5456_s23 }
 0xd42   :  { %v3575_v29 = vpop.f32.mrf.mxu1 }
 0xd44   :  { %v3576_v3 = vpop.f32.mrf.mxu1 }
 0xd46   :  { %v3579_v42 = vpop.f32.mrf.mxu1 }
 0xd47   :  { %v6496_v33 = vadd.f32 %v3579_v42, %v3462_v6 }
 0xd48   :  { %v3581_v41 = vpop.f32.mrf.mxu1 }
 0xd49   :  { %v3582_v40 = vadd.f32 %v3581_v41, %v3466_v30  ;;  %v4580_v30 = vld [vmem:[%s6695_s4 + $0xc0] sm:$0xff] }
 0xd4b   :  { %3596 = vrot.lane.b32.xlu1 %v3582_v40, %s5456_s23 }
 0xd4f   :  { %3599 = vrot.lane.b32.xlu1 %v6484_v25, %s5452_s11 }
 0xd53   :  { %3676 = vrot.lane.b32.xlu1 %v6488_v11, %s5452_s11 }
 0xd57   :  { %3753 = vrot.lane.b32.xlu1 %v6492_v4, %s5452_s11 }
 0xd5b   :  { %3830 = vrot.lane.b32.xlu1 %v6496_v33, %s5452_s11 }
 0xd99   :  { %v3591_v18 = vpop.permute.xlu0 %3590 }
 0xd9a   :  { %3601 = vrot.lane.b32.xlu0 %v3591_v18, %s5452_s11 }
 0xdaf   :  { %v3593_v60 = vpop.permute.xlu1 %3592 }
 0xdb0   :  { %3678 = vrot.lane.b32.xlu0 %v3593_v60, %s5452_s11 }
 0xdb3   :  { %v3595_v21 = vpop.permute.xlu0 %3594 }
 0xdb4   :  { %3755 = vrot.lane.b32.xlu0 %v3595_v21, %s5452_s11  ;;  %v4600_v21 = vld [vmem:[%s6697_s6 + $0xf8] sm:$0xff] }
 0xdbd   :  { %v3597_v24 = vpop.permute.xlu1 %3596 }
 0xdbe   :  { %3832 = vrot.lane.b32.xlu0 %v3597_v24, %s5452_s11  ;;  %v4599_v24 = vld [vmem:[%s6697_s6 + $0xf0] sm:$0xff] }
 0xdc1   :  { %v3600_v34 = vpop.permute.xlu1 %3599 }
 0xdc5   :  { %v3677_v55 = vpop.permute.xlu1 %3676 }
 0xdc9   :  { %v3754_v12 = vpop.permute.xlu1 %3753 }
 0xdcd   :  { %v3831_v44 = vpop.permute.xlu1 %3830 }
 0xe0c   :  { %v3602_v8 = vpop.permute.xlu0 %3601 }
 0xe0d   :  { %5033 = vmatpush3.msra.mxu0 %v3602_v8  ;;  %v4598_v8 = vld [vmem:[%s6697_s6 + $0xe8] sm:$0xff] }
 0xe0e   :  { %5034 = vmatprep.subr.mxu0 %v5455_v10 }
 0xe0f   :  { %5035 = vmatpush3.msra.mxu0 %v3600_v34  ;;  %v4597_v34 = vld [vmem:[%s6697_s6 + $0xe0] sm:$0xff] }
 0xe10   :  { %5037 = vmatmul.mubr.msk.f32.vlgmr.msra.gmra.mxu0 %vm929_vm4, %v6314_v7  ;;  %5039 = vmatprep.subr.mxu0 %v5455_v10 }
 0xe11   :  { %5043 = vmatprep.mubr.msk.f32.mxu0 %vm5457_vm3, %v5455_v10 }
 0xe22   :  { %v3679_v46 = vpop.permute.xlu0 %3678 }
 0xe23   :  { %5040 = vmatpush3.msra.mxu0 %v3679_v46 }
 0xe24   :  { %5041 = vmatprep.subr.mxu0 %v5455_v10 }
 0xe25   :  { %5042 = vmatpush3.msra.mxu0 %v3677_v55  ;;  %v4588_v55 = vld [vmem:[#allocation5 + $0x3] ss:$0 sm:$0xff] }
 0xe26   :  { %v3756_v38 = vpop.permute.xlu0 %3755  ;;  %5044 = vmatmul.mubr.msk.f32.vlgmr.msra.gmra.mxu0 %vm929_vm4, %v6314_v7  ;;  %5046 = vmatprep.subr.mxu0 %v5455_v10 }
 0xe27   :  { %5047 = vmatpush3.msra.mxu0 %v3756_v38  ;;  %5050 = vmatprep.mubr.msk.f32.mxu0 %vm5457_vm3, %v5455_v10 }
 0xe28   :  { %5048 = vmatprep.subr.mxu0 %v5455_v10 }
 0xe29   :  { %5049 = vmatpush3.msra.mxu0 %v3754_v12 }
 0xe2a   :  { %5051 = vmatmul.mubr.msk.f32.vlgmr.msra.gmra.mxu0 %vm929_vm4, %v6314_v7  ;;  %5053 = vmatprep.subr.mxu0 %v5455_v10 }
 0xe2b   :  { %5057 = vmatprep.mubr.msk.f32.mxu0 %vm5457_vm3, %v5455_v10 }
 0xe30   :  { %v3833_v14 = vpop.permute.xlu0 %3832 }
 0xe31   :  { %5054 = vmatpush3.msra.mxu0 %v3833_v14 }
 0xe32   :  { %5055 = vmatprep.subr.mxu0 %v5455_v10 }
 0xe33   :  { %5056 = vmatpush3.msra.mxu0 %v3831_v44 }
 0xe34   :  { %5058 = vmatmul.mubr.msk.f32.vlgmr.msra.gmra.mxu0 %vm929_vm4, %v6314_v7  ;;  %v4587_v7 = vld [vmem:[%s6695_s4 + $0xf8] sm:$0xff]  ;;  %4145 = vmatprep.subr.mxu0 %v4600_v21 }
 0xe35   :  { %4185 = vmatprep.mubr.f32.mxu0 %v5455_v10  ;;  %5060 = vmatprep.subr.mxu1 %v4587_v7 }
 0xe36   :  { %5061 = vmatpush3.msra.mxu1 %v4587_v7  ;;  %4146 = vmatpush1.msra.mxu0 %v4599_v24  ;;  %v4594_v7 = vld [vmem:[%s6697_s6 + $0xc8] sm:$0xff] }
 0xe37   :  { %5062 = vmatprep.subr.mxu1 %v4586_v26  ;;  %4147 = vmatprep.subr.mxu0 %v4598_v8 }
 0xe38   :  { %5063 = vmatpush3.msra.mxu1 %v4586_v26  ;;  %4148 = vmatpush1.msra.mxu0 %v4597_v34  ;;  %v4593_v26 = vld [vmem:[%s6697_s6 + $0xc0] sm:$0xff] }
 0xe39   :  { %5064 = vmatprep.subr.mxu1 %v4585_v52 }
 0xe3a   :  { %5065 = vmatpush3.msra.mxu1 %v4585_v52 }
 0xe3b   :  { %5066 = vmatprep.subr.mxu1 %v4584_v54 }
 0xe3c   :  { %5067 = vmatpush3.msra.mxu1 %v4584_v54 }
 0xe3d   :  { %5068 = vmatprep.subr.mxu1 %v4583_v28 }
 0xe3e   :  { %5069 = vmatpush3.msra.mxu1 %v4583_v28 }
 0xe3f   :  { %5070 = vmatprep.subr.mxu1 %v4582_v56 }
 0xe40   :  { %5071 = vmatpush3.msra.mxu1 %v4582_v56 }
 0xe41   :  { %5072 = vmatprep.subr.mxu1 %v4581_v59 }
 0xe42   :  { %5073 = vmatpush3.msra.mxu1 %v4581_v59 }
 0xe43   :  { %5074 = vmatprep.subr.mxu1 %v4580_v30 }
 0xe44   :  { %5075 = vmatpush3.msra.mxu1 %v4580_v30  ;;  %v4204_v30 = vld [vmem:[%s6701_s10 + $0x20] sm:$0xff] }
 0xed0   :  { %v3671_v15 = vpop.f32.mrf.mxu0 }
 0xed1   :  { %3910 = vrot.lane.b32.xlu0 %v3671_v15, %s5458_s24 }
 0xed2   :  { %v5038_v17 = vpop.f32.mrf.mxu0 }
 0xee6   :  { %v3748_v27 = vpop.f32.mrf.mxu0 }
 0xee7   :  { %3912 = vrot.lane.b32.xlu1 %v3748_v27, %s5458_s24 }
 0xee8   :  { %v5045_v20 = vpop.f32.mrf.mxu0 }
 0xeea   :  { %v3825_v19 = vpop.f32.mrf.mxu0 }
 0xeeb   :  { %3914 = vrot.lane.b32.xlu0 %v3825_v19, %s5458_s24 }
 0xeec   :  { %v5052_v16 = vpop.f32.mrf.mxu0 }
 0xeed   :  { %v4595_v16 = vld [vmem:[%s6697_s6 + $0xd0] sm:$0xff] }
 0xeef   :  { %3937 = vrot.lane.b32.xlu0 %v4577_v22, %s5458_s24  ;;  %v4596_v22 = vld [vmem:[%s6697_s6 + $0xd8] sm:$0xff] }
 0xef0   :  { %4149 = vmatprep.subr.mxu0 %v4596_v22 }
 0xef1   :  { %4150 = vmatpush1.msra.mxu0 %v4595_v16 }
 0xef2   :  { %4151 = vmatprep.subr.mxu0 %v4594_v7 }
 0xef3   :  { %4152 = vmatpush1.msra.mxu0 %v4593_v26 }
 0xef4   :  { %v3902_v13 = vpop.f32.mrf.mxu0 }
 0xef5   :  { %3916 = vrot.lane.b32.xlu1 %v3902_v13, %s5458_s24  ;;  %v4207_v13 = vld [vmem:[%s6701_s10 + $0x38] sm:$0xff] }
 0xef6   :  { %v5059_v35 = vpop.f32.mrf.mxu0  ;;  %5079 = vmatprep.subr.mxu0 %v4207_v13 }
 0xef9   :  { %3951 = vrot.lane.b32.xlu1 %v4579_v53, %s5458_s24 }
 0xf43   :  { %v3911_v5 = vpop.permute.xlu0 %3910 }
 0xf44   :  { %v3922_v61 = vadd.f32 %v3911_v5, %v6484_v25  ;;  %v4206_v5 = vld [vmem:[%s6701_s10 + $0x30] sm:$0xff] }
 0xf46   :  { %v3926_v43 = vadd.f32 %v3922_v61, %v6388_v58  ;;  %v4202_v61 = vld [vmem:[%s6701_s10 + $0x10] sm:$0xff] }
 0xf59   :  { %v3913_v9 = vpop.permute.xlu1 %3912 }
 0xf5a   :  { %v3923_v57 = vadd.f32 %v3913_v9, %v6488_v11 }
 0xf5c   :  { %v3927_v63 = vadd.f32 %v3923_v57, %v6397_v1  ;;  %v4201_v57 = vld [vmem:[%s6701_s10 + $0x8] sm:$0xff] }
 0xf5d   :  { %v3915_v48 = vpop.permute.xlu0 %3914 }
 0xf5e   :  { %v3924_v51 = vadd.f32 %v3915_v48, %v6492_v4  ;;  %v4205_v48 = vld [vmem:[%s6701_s10 + $0x28] sm:$0xff] }
 0xf60   :  { %v3928_v32 = vadd.f32 %v3924_v51, %v6408_v45  ;;  %v4200_v51 = vld [vmem:[%s6701_s10] sm:$0xff] }
 0xf61   :  { %v3938_v31 = vpop.permute.xlu0 %3937 }
 0xf62   :  { %v3940_v47 = vmul.f32 %v3938_v31, %v3926_v43  ;;  %v3941_v2 = vmul.f32 %v3938_v31, %v3927_v63  ;;  %v3942_v40 = vmul.f32 %v3938_v31, %v3928_v32  ;;  %v4311_v43 = vld [vmem:[%s6703_s12 + $0x68] sm:$0xff]  ;;  %v4310_v63 = vld [vmem:[%s6703_s12 + $0x60] sm:$0xff]  ;;  %v4308_v32 = vld [vmem:[%s6703_s12 + $0x50] sm:$0xff] }
 0xf67   :  { %v3917_v62 = vpop.permute.xlu1 %3916 }
 0xf68   :  { %v3925_v0 = vadd.f32 %v3917_v62, %v6496_v33  ;;  %v4312_v62 = vld [vmem:[%s6703_s12 + $0x70] sm:$0xff] }
 0xf6a   :  { %v3929_v29 = vadd.f32 %v3925_v0, %v6419_v37  ;;  %v4309_v0 = vld [vmem:[%s6703_s12 + $0x58] sm:$0xff] }
 0xf6b   :  { %v3952_v3 = vpop.permute.xlu1 %3951 }
 0xf6c   :  { %v3943_v42 = vmul.f32 %v3938_v31, %v3929_v29  ;;  %v3954_v41 = vadd.f32 %v3952_v3, %v3940_v47  ;;  %v3955_v6 = vadd.f32 %v3952_v3, %v3941_v2  ;;  %v3956_v58 = vadd.f32 %v3952_v3, %v3942_v40  ;;  %v4313_v31 = vld [vmem:[%s6703_s12 + $0x78] sm:$0xff]  ;;  %v4307_v47 = vld [vmem:[%s6703_s12 + $0x48] sm:$0xff]  ;;  %v4306_v2 = vld [vmem:[%s6703_s12 + $0x40] sm:$0xff] }
 0xf6d   :  { %5098 = vmatprep.subr.mxu1 %v4313_v31  ;;  %v4305_v29 = vld [vmem:[%s6703_s12 + $0x38] sm:$0xff] }
 0xf6e   :  { %3968 = vrot.lane.b32.xlu1 %v3955_v6, %s5456_s23  ;;  %3960 = vrot.lane.b32.xlu0 %v3954_v41, %s5458_s24  ;;  %v3957_v25 = vadd.f32 %v3952_v3, %v3943_v42  ;;  %v4304_v3 = vld [vmem:[%s6703_s12 + $0x30] sm:$0xff]  ;;  %v4303_v42 = vld [vmem:[%s6703_s12 + $0x28] sm:$0xff] }
 0xf6f   :  { %v4302_v41 = vld [vmem:[%s6703_s12 + $0x20] sm:$0xff]  ;;  %v4108_v6 = vld [vmem:[#allocation7 + $0x6] sm:$0x3] }
 0xf70   :  { %v4113_v40 = vrot.slane %v4108_v6, %v5854_v50 }
 0xf72   :  { %3970 = vrot.lane.b32.xlu1 %v3957_v25, %s5456_s23  ;;  %3962 = vrot.lane.b32.xlu0 %v3956_v58, %s5458_s24  ;;  %v2469_v58 = vadd.f32 %v6272_v39, %v5885_v36  ;;  %v4301_v36 = vld [vmem:[%s6703_s12 + $0x18] sm:$0xff]  ;;  %v4298_v39 = vld [vmem:[%s6703_s12] sm:$0xff] }
 0xfe0   :  { %v3969_v1 = vpop.permute.xlu1 %3968  ;;  %v3961_v45 = vpop.permute.xlu0 %3960 }
 0xfe1   :  { %v3974_v4 = vsel %vm359_vm1, %v3961_v45, %v3969_v1  ;;  %v3584_v1 = vadd.f32 %v6488_v11, %v2469_v58  ;;  %v4603_v11 = vld [vmem:[#allocation8] ss:$0 sm:$0xff] }
 0xfe2   :  { %5076 = vmatprep.mubr.msk.f32.mxu1 %vm387_vm2, %v3974_v4 }
 0xfe4   :  { %v3971_v37 = vpop.permute.xlu1 %3970  ;;  %v3963_v18 = vpop.permute.xlu0 %3962 }
 0xfe5   :  { %v3975_v60 = vsel %vm359_vm1, %v3963_v18, %v3971_v37  ;;  %v2470_v37 = vadd.f32 %v6256_v49, %v5861_v23  ;;  %v4300_v23 = vld [vmem:[%s6703_s12 + $0x10] sm:$0xff]  ;;  %v4299_v49 = vld [vmem:[%s6703_s12 + $0x8] sm:$0xff]  ;;  %s5418_s12 = scalar_lea.vmem %s4405_s20, 256 }
 0xfe6   :  { %5077 = vmatmul.mubr.msk.f32.vlgmr.msra.gmra.mxu1 %vm387_vm2, %v3975_v60  ;;  %p5419_p11 = scmp.ne.s32.totalorder %s4405_s20, %s5418_s12  ;;  %p5424_p13 = scmp.lt.s32.totalorder %s5418_s12, %s5418_s12 }
 0xfe7   :  { %5099 = vmatpush3.msra.mxu1 %v4313_v31  ;;  %v3585_v24 = vadd.f32 %v6496_v33, %v2470_v37 }
 0xfe8   :  { %5100 = vmatprep.subr.mxu1 %v4312_v62  ;;  %p5425_p0 = por %p5424_p13, %p5423_p12 }
 0xfe9   :  { %5101 = vmatpush3.msra.mxu1 %v4312_v62 }
 0xfea   :  { %5102 = vmatprep.subr.mxu1 %v4311_v43  ;;  %p5426_p1 = pnand %p5425_p0, %p5419_p11 }
 0xfeb   :  { %5103 = vmatpush3.msra.mxu1 %v4311_v43 }
 0xfec   :  { %5104 = vmatprep.subr.mxu1 %v4310_v63 }
 0xfed   :  { %5105 = vmatpush3.msra.mxu1 %v4310_v63 }
 0xfee   :  { %5106 = vmatprep.subr.mxu1 %v4309_v0 }
 0xfef   :  { %5107 = vmatpush3.msra.mxu1 %v4309_v0 }
 0xff0   :  { %5108 = vmatprep.subr.mxu1 %v4308_v32 }
 0xff1   :  { %5109 = vmatpush3.msra.mxu1 %v4308_v32 }
 0xff2   :  { %5110 = vmatprep.subr.mxu1 %v4307_v47 }
 0xff3   :  { %5111 = vmatpush3.msra.mxu1 %v4307_v47 }
 0xff4   :  { %5112 = vmatprep.subr.mxu1 %v4306_v2 }
 0xff5   :  { %5113 = vmatpush3.msra.mxu1 %v4306_v2 }
 0xff6   :  { %5114 = vmatprep.subr.mxu1 %v4305_v29 }
 0xff7   :  { %5115 = vmatpush3.msra.mxu1 %v4305_v29 }
 0xff8   :  { %5116 = vmatprep.subr.mxu1 %v4304_v3 }
 0xff9   :  { %5117 = vmatpush3.msra.mxu1 %v4304_v3 }
 0xffa   :  { %5118 = vmatprep.subr.mxu1 %v4303_v42 }
 0xffb   :  { %5119 = vmatpush3.msra.mxu1 %v4303_v42 }
 0xffc   :  { %5120 = vmatprep.subr.mxu1 %v4302_v41 }
 0xffd   :  { %5121 = vmatpush3.msra.mxu1 %v4302_v41 }
 0xffe   :  { %5122 = vmatprep.subr.mxu1 %v4301_v36 }
 0xfff   :  { %5123 = vmatpush3.msra.mxu1 %v4301_v36 }
0x1000   :  { %5124 = vmatprep.subr.mxu1 %v4300_v23 }
0x1001   :  { %5125 = vmatpush3.msra.mxu1 %v4300_v23 }
0x1002   :  { %5126 = vmatprep.subr.mxu1 %v4299_v49 }
0x1003   :  { %5127 = vmatpush3.msra.mxu1 %v4299_v49 }
0x1004   :  { %5128 = vmatprep.subr.mxu1 %v4298_v39 }
0x1005   :  { %5129 = vmatpush3.msra.mxu1 %v4298_v39 }
0x10a6   :  { %v5078_v46 = vpop.f32.mrf.mxu1 }
0x10a7   :  { %v4071_v38 = vadd.f32 %v5078_v46, %v4588_v55 }
0x10a8   :  { %v4065_v12 = vpop.f32.mrf.mxu1 }
0x10a9   :  { %v4592_v14 = vmul.f32 -1.442695, %v4071_v38  ;;  %v4066_v44 = vadd.f32 %v4588_v55, %v4065_v12 }
0x10ab   :  { %5305 = vpow2.f32 %v4592_v14  ;;  %v4591_v15 = vmul.f32 -1.442695, %v4066_v44 }
0x10ad   :  { %5307 = vpow2.f32 %v4591_v15  ;;  %v4606_v15 = vld [vmem:[#allocation10] ss:$0 sm:$0xff] }
0x10b8   :  { %v5306_v17 = vpop.eup %5305 }
0x10b9   :  { %v4083_v27 = vadd.f32 1.0, %v5306_v17 }
0x10ba   :  { %v5308_v20 = vpop.eup %5307 }
0x10bb   :  { %5309 = vrcp.f32 %v4083_v27  ;;  %v4082_v19 = vadd.f32 1.0, %v5308_v20 }
0x10bd   :  { %5311 = vrcp.f32 %v4082_v19 }
0x10be   :  { %5313 = vtanh.f32 %v4066_v44 }
0x10bf   :  { %5315 = vtanh.f32 %v4071_v38 }
0x10c8   :  { %v5310_v52 = vpop.eup %5309 }
0x10c9   :  { %4092 = vrot.lane.b32.xlu1 %v5310_v52, %s5456_s23 }
0x10ca   :  { %v5312_v53 = vpop.eup %5311 }
0x10cb   :  { %4090 = vrot.lane.b32.xlu0 %v5312_v53, %s5456_s23  ;;  %v5314_v35 = vpop.eup %5313 }
0x10cc   :  { %v5316_v9 = vpop.eup %5315 }
0x113b   :  { %v4093_v56 = vpop.permute.xlu1 %4092 }
0x113c   :  { %v4097_v59 = vmul.f32 %v5316_v9, %v4093_v56 }
0x113d   :  { %v4091_v54 = vpop.permute.xlu0 %4090 }
0x113e   :  { %v4096_v28 = vmul.f32 %v5314_v35, %v4091_v54 }
0x1140   :  { %4601 = vmatmul.mubr.msk.f32.vlgmr.msra.gmra.mxu0 %vm359_vm1, %v4096_v28 }
0x1141   :  { %4190 = vmatprep.mubr.f32.mxu0 %v5455_v10  ;;  %5080 = vmatpush3.msra.mxu0 %v4207_v13  ;;  %v4203_v10 = vld [vmem:[%s6701_s10 + $0x18] sm:$0xff] }
0x1142   :  { %5081 = vmatprep.subr.mxu0 %v4206_v5 }
0x1143   :  { %5082 = vmatpush3.msra.mxu0 %v4206_v5 }
0x1144   :  { %4602 = vmatmul.mubr.msk.f32.gmra.mxu0 %vm359_vm1, %v4097_v59  ;;  %5083 = vmatprep.subr.mxu0 %v4205_v48 }
0x1145   :  { %5084 = vmatpush3.msra.mxu0 %v4205_v48 }
0x1146   :  { %5085 = vmatprep.subr.mxu0 %v4204_v30 }
0x1147   :  { %5086 = vmatpush3.msra.mxu0 %v4204_v30 }
0x1148   :  { %5087 = vmatprep.subr.mxu0 %v4203_v10 }
0x1149   :  { %5088 = vmatpush3.msra.mxu0 %v4203_v10 }
0x114a   :  { %5089 = vmatprep.subr.mxu0 %v4202_v61 }
0x114b   :  { %5090 = vmatpush3.msra.mxu0 %v4202_v61 }
0x114c   :  { %5091 = vmatprep.subr.mxu0 %v4201_v57 }
0x114d   :  { %5092 = vmatpush3.msra.mxu0 %v4201_v57 }
0x114e   :  { %5093 = vmatprep.subr.mxu0 %v4200_v51 }
0x114f   :  { %5094 = vmatpush3.msra.mxu0 %v4200_v51 }
0x1200   :  { %v4187_v25 = vpop.f32.mrf.mxu0 }
0x1201   :  { %v4188_v45 = vadd.f32 %v4187_v25, %v4113_v40 }
0x1202   :  { %v4189_v4 = vpop.f32.mrf.mxu0 }
0x1203   :  { %v4196_v18 = vadd.f32 %v4188_v45, %v3584_v1 }
0x1204   :  { %v4192_v60 = vpop.f32.mrf.mxu0 }
0x1205   :  { %v4198_v21 = vmax.f32 %v4196_v18, 0.0  ;;  %v4193_v8 = vadd.f32 %v4192_v60, %v4113_v40 }
0x1206   :  { %v4194_v34 = vpop.f32.mrf.mxu0 }
0x1207   :  { %v4197_v55 = vadd.f32 %v4193_v8, %v3585_v24  ;;  %5095 = vmatprep.mubr.msk.f32.mxu0 %vm387_vm2, %v4198_v21 }
0x1209   :  { %v4199_v50 = vmax.f32 %v4197_v55, 0.0 }
0x120b   :  { %5096 = vmatmul.mubr.msk.f32.vlgmr.msra.gmra.mxu0 %vm387_vm2, %v4199_v50 }
0x12cb   :  { %v5097_v33 = vpop.f32.mrf.mxu0 }
0x12cc   :  { %v4293_v46 = vadd.f32 %v5097_v33, %v4603_v11 }
0x12cd   :  { %v4287_v38 = vpop.f32.mrf.mxu0 }
0x12ce   :  { %v4288_v12 = vadd.f32 %v4603_v11, %v4287_v38  ;;  %v4297_v44 = vmax.f32 %v4293_v46, 0.0 }
0x12d0   :  { %v4296_v14 = vmax.f32 %v4288_v12, 0.0 }
0x12d2   :  { %5130 = vmatprep.mubr.f32.mxu1 %v4296_v14 }
0x12d3   :  { %5131 = vmatmul.mubr.f32.vlgmr.msra.gmra.mxu1 %v4297_v44 }
0x1393   :  { %v5132_v17 = vpop.f32.mrf.mxu1 }
0x1394   :  { %v4393_v27 = vadd.f32 %v5132_v17, %v4606_v15 }
0x1395   :  { %v4387_v20 = vpop.f32.mrf.mxu1 }
0x1396   :  { %4398 = vst.msk [vmem:[#allocation11 + $0x8] sm:$0xff] %vm4396_vm5, %v4393_v27  ;;  %v4388_v19 = vadd.f32 %v4606_v15, %v4387_v20 }
0x1398   :  { %4397 = vst.msk [vmem:[#allocation11] sm:$0xff] %vm4396_vm5, %v4388_v19 }
0x1399   :  { %5429 = shalt.err (!%p5426_p1)
}
0x139a   :  { %s5460_s21 = smov 128   ;;  %s5461_s10 = smov 8  }
0x139b   :  { %4410 = dma.vmem_to_hbm [thread:$0]  %s4405_s20, 256, %s6705_s14, [#allocation4], %s5460_s21, %s5460_s21, %s5461_s10  }
0x139c   :  { %5444 = dma.done.wait [#allocation4], 256  }
0x139d   :  { %5445 = vsyncadd [#allocation4], 4294967040 }
0x139e   :  { %4414 = vsyncpa [#allocation3], 1 }
0x139f   :  { %4415 = vsyncpa [#allocation6], 1 }
0x13a0   :  { %4416 = vsyncpa [#allocation9], 1 }
0x13a1   :  { %4417 = vsyncpa [#allocation4], 1 }

</bundles_post_ra>
